<compile_context>
chip_gen: v7x
topology: tpu7x:2x2x1
jax: 0.10.0
libtpu: 0.0.40
codegen_flags: <defaults>
</compile_context>

<pallas_src>
import functools
import math

import numpy as np
import jax
import jax.numpy as jnp
from jax.experimental import pallas as pl
from jax.experimental.pallas import tpu as pltpu


# ----------------------------- in-kernel helpers -----------------------------

_ERF_A = (0.254829592, -0.284496736, 1.421413741, -1.453152027, 1.061405429)
_ERF_P = 0.3275911


def _erf_approx(x):
    # Abramowitz-Stegun 7.1.26 (|err| < 1.5e-7, matches PyTorch's exact-erf
    # GELU within test tolerance); the inner divide goes to the EUP via
    # approximate reciprocal so the VALU path stays short.
    a1, a2, a3, a4, a5 = _ERF_A
    sgn = jnp.where(x >= 0.0, 1.0, -1.0)
    ax = jnp.abs(x)
    t = pl.reciprocal(1.0 + _ERF_P * ax, approx=True)
    poly = ((((a5 * t + a4) * t + a3) * t + a2) * t + a1) * t
    return sgn * (1.0 - poly * jnp.exp(-ax * ax))


def _gelu(x):
    return 0.5 * x * (1.0 + _erf_approx(x * np.float32(1.0 / math.sqrt(2.0))))


def _layer_norm(x, w, b, eps):
    mu = jnp.mean(x, axis=-1, keepdims=True)
    var = jnp.mean(jnp.square(x - mu), axis=-1, keepdims=True)
    return (x - mu) * jax.lax.rsqrt(var + eps) * w + b


# ------------------------------- Pallas kernel --------------------------------

def _denoiser_kernel(
    # activations / precomputed step embeddings
    xt_ref, xs_ref, et_ref, es_ref,
    # temporal branch: input proj + folded (PE + bias) constant
    t_wi_ref, t_addc_ref,
    # temporal encoder stack (layer-stacked, pre-transposed)
    t_wqkv_ref, t_bqkv_ref, t_wout_ref, t_bout_ref,
    t_ln1w_ref, t_ln1b_ref, t_w1_ref, t_b1_ref, t_w2_ref, t_b2_ref,
    t_ln2w_ref, t_ln2b_ref,
    # temporal output proj
    t_wo_ref, t_bo_ref,
    # spatial branch
    s_wi_ref, s_addc_ref,
    s_wqkv_ref, s_bqkv_ref, s_wout_ref, s_bout_ref,
    s_ln1w_ref, s_ln1b_ref, s_w1_ref, s_b1_ref, s_w2_ref, s_b2_ref,
    s_ln2w_ref, s_ln2b_ref,
    s_wo_ref, s_bo_ref,
    # 1x1-conv combine coefficients [1, 3] = (w_temporal, w_spatial, bias)
    comb_ref,
    # output [L, B*In]
    o_ref,
    # VMEM scratch for attention head outputs
    attn_scr,
    *, num_layers, B, L, In, H, Dh, eps,
):
    D = H * Dh
    scale = np.float32(1.0 / math.sqrt(Dh))

    def encoder_stack(x, S, wqkv, bqkv, wout, bout,
                      ln1w, ln1b, w1, b1, w2, b2, ln2w, ln2b):
        M = B * S
        # TODO(synk): at larger num_layers/D, switch to a layer grid axis with
        # streamed (double-buffered) weight blocks + lax.fori_loop; the fully
        # resident stack is fine at this toy size on v5e/v6e/v7x.
        for l in range(num_layers):
            qkv = jnp.dot(x, wqkv[l], preferred_element_type=jnp.float32) + bqkv[l]
            # --- self attention: per (batch, head), all static slices ---
            for b in range(B):
                r0 = b * S
                for h in range(H):
                    q = qkv[r0:r0 + S, h * Dh:(h + 1) * Dh]
                    k = qkv[r0:r0 + S, D + h * Dh:D + (h + 1) * Dh]
                    v = qkv[r0:r0 + S, 2 * D + h * Dh:2 * D + (h + 1) * Dh]
                    s = jax.lax.dot_general(
                        q, k, (((1,), (1,)), ((), ())),
                        preferred_element_type=jnp.float32) * scale     # [S, S]
                    s = s - jnp.max(s, axis=-1, keepdims=True)
                    p = jnp.exp(s)
                    p = p * pl.reciprocal(jnp.sum(p, axis=-1, keepdims=True),
                                          approx=True)
                    # head output written straight into scratch (no concats)
                    attn_scr[r0:r0 + S, h * Dh:(h + 1) * Dh] = jnp.dot(
                        p, v, preferred_element_type=jnp.float32)
            attn = attn_scr[0:M, :]                                      # [M, D]
            attn = jnp.dot(attn, wout[l], preferred_element_type=jnp.float32) + bout[l]
            x = _layer_norm(x + attn, ln1w[l], ln1b[l], eps)
            hdn = jnp.dot(x, w1[l], preferred_element_type=jnp.float32) + b1[l]
            hdn = _gelu(hdn)
            ffn = jnp.dot(hdn, w2[l], preferred_element_type=jnp.float32) + b2[l]
            x = _layer_norm(x + ffn, ln2w[l], ln2b[l], eps)
        return x

    # ---- prologues: input Linear + folded (bias+PE) constant + step embed ----
    x_t = jnp.dot(xt_ref[...], t_wi_ref[...], preferred_element_type=jnp.float32)
    x_t = x_t + t_addc_ref[...] + et_ref[...]                            # [B*L, D]
    x_s = jnp.dot(xs_ref[...], s_wi_ref[...], preferred_element_type=jnp.float32)
    x_s = x_s + s_addc_ref[...] + es_ref[...]                            # [B*In, D]

    # ---- the two encoder stacks (fully VMEM resident) ----
    # TODO(synk): on v7x the two independent branches could be dispatched to the
    # two TensorCores (pl.core_map / 2-wide "parallel" grid); kept fused
    # sequential here because branch shapes differ and the config is tiny.
    x_t = encoder_stack(x_t, L, t_wqkv_ref, t_bqkv_ref, t_wout_ref, t_bout_ref,
                        t_ln1w_ref, t_ln1b_ref, t_w1_ref, t_b1_ref,
                        t_w2_ref, t_b2_ref, t_ln2w_ref, t_ln2b_ref)
    x_s = encoder_stack(x_s, In, s_wqkv_ref, s_bqkv_ref, s_wout_ref, s_bout_ref,
                        s_ln1w_ref, s_ln1b_ref, s_w1_ref, s_b1_ref,
                        s_w2_ref, s_b2_ref, s_ln2w_ref, s_ln2b_ref)

    # ---- epilogue: both output Linears + 1x1 Conv2d combine, [L, B*In] ----
    c = comb_ref[...]
    w0, w1c, cb = c[:, 0:1], c[:, 1:2], c[:, 2:3]
    # spatial out: contract on D so no transpose is ever materialized
    s_out = jax.lax.dot_general(
        s_wo_ref[...], x_s, (((1,), (1,)), ((), ())),
        preferred_element_type=jnp.float32) + s_bo_ref[...]              # [L, B*In]
    t_out = jnp.dot(x_t, t_wo_ref[...],
                    preferred_element_type=jnp.float32) + t_bo_ref[...]  # [B*L, In]
    for b in range(B):
        comb = (w0 * t_out[b * L:(b + 1) * L, :]
                + w1c * s_out[:, b * In:(b + 1) * In] + cb)              # [L, In]
        o_ref[:, b * In:(b + 1) * In] = comb.astype(o_ref.dtype)


# ------------------------------- full forward ---------------------------------

def parallel_denoiser_forward(params, noise, x, t, *, num_heads, prefix_len):
    """noise:[pred_len,B,In]  x:[prefix_len,B,In]  t: scalar diffusion step."""
    window = jnp.concatenate([x, noise], axis=0)                         # [L, B, In]
    L, B, In = window.shape
    tp, sp = params["temporal"], params["spatial"]
    ts, ss = tp["stack"], sp["stack"]
    D = tp["wi_t"].shape[1]
    num_layers = ts["wqkv_t"].shape[0]
    Dh = D // num_heads

    # tiny wrapper glue: batch-first flattened layouts + step-row gathers
    win_t = jnp.transpose(window, (1, 0, 2)).reshape(B * L, In).astype(jnp.float32)
    win_s = jnp.transpose(window, (1, 2, 0)).reshape(B * In, L).astype(jnp.float32)
    et = tp["emb_table"][t][None, :]     # precomputed MLP output, row t
    es = sp["emb_table"][t][None, :]

    out2d = pl.pallas_call(
        functools.partial(_denoiser_kernel, num_layers=num_layers, B=B, L=L,
                          In=In, H=num_heads, Dh=Dh, eps=1e-5),
        out_shape=jax.ShapeDtypeStruct((L, B * In), jnp.float32),
        scratch_shapes=[pltpu.VMEM((B * max(L, In), D), jnp.float32)],
    )(win_t, win_s, et, es,
      tp["wi_t"], tp["addc"],
      ts["wqkv_t"], ts["bqkv"], ts["wout_t"], ts["bout"],
      ts["ln1_w"], ts["ln1_b"], ts["w1_t"], ts["b1"], ts["w2_t"], ts["b2"],
      ts["ln2_w"], ts["ln2_b"],
      tp["wo_t"], tp["bo"],
      sp["wi_t"], sp["addc"],
      ss["wqkv_t"], ss["bqkv"], ss["wout_t"], ss["bout"],
      ss["ln1_w"], ss["ln1_b"], ss["w1_t"], ss["b1"], ss["w2_t"], ss["b2"],
      ss["ln2_w"], ss["ln2_b"],
      sp["wo"], sp["bo"],
      params["combine"])

    pred_len = L - prefix_len
    # static row slice + pure view-reshape (layout [l, b, i] already row-major)
    return out2d[prefix_len:].reshape(pred_len, B, In)                   # [pred_len, B, In]


# --------------------------------- parameters ---------------------------------

def build_diffusion_embedding_table(num_steps, embedding_dim):
    dim = embedding_dim / 2.0                     # float, exactly as in PyTorch
    half = int(dim)
    steps = np.arange(num_steps, dtype=np.float32)[:, None]
    frequencies = (10.0 ** (np.arange(half, dtype=np.float32) / (dim - 1.0) * 4.0))[None, :]
    table = steps * frequencies
    table = np.concatenate([np.sin(table), np.cos(table)], axis=1)
    return jnp.asarray(table, dtype=jnp.float32)


def build_positional_encoding(d_model, max_len=5000):
    position = np.arange(max_len, dtype=np.float32)[:, None]
    div_term = np.exp(np.arange(0, d_model, 2, dtype=np.float32) * (-math.log(10000.0) / d_model))
    pe = np.zeros((max_len, d_model), dtype=np.float32)
    pe[:, 0::2] = np.sin(position * div_term)
    pe[:, 1::2] = np.cos(position * div_term)
    return jnp.asarray(pe)


def _precompute_diff_embedding(emb):
    # The DiffusionEmbedding MLP is independent of the network input, so run it
    # over the whole step table once at init; the kernel only sees row t.
    e = jnp.dot(emb["table"], emb["p1w_t"]) + emb["p1b"]
    e = e * jax.nn.sigmoid(e)
    e = jnp.dot(e, emb["p2w_t"]) + emb["p2b"]
    e = e * jax.nn.sigmoid(e)
    return e                                      # [diff_steps, D]


def init_params(key, input_dim, qkv_dim, num_layers, num_heads,
                prefix_len, pred_len, diff_steps, batch):
    L = prefix_len + pred_len
    D = qkv_dim
    Dff = qkv_dim                                 # dim_feedforward = qkv_dim
    keys = iter(jax.random.split(key, 512))

    def lin(n_out, n_in, scale=0.1):
        w = jax.random.normal(next(keys), (n_out, n_in), jnp.float32) * scale
        b = jax.random.normal(next(keys), (n_out,), jnp.float32) * 0.01
        return w, b

    def enc_stack():
        def one():
            in_w, in_b = lin(3 * D, D)
            out_w, out_b = lin(D, D)
            l1w, l1b = lin(Dff, D)
            l2w, l2b = lin(D, Dff)
            return {
                "wqkv_t": in_w.T, "bqkv": in_b.reshape(1, -1),
                "wout_t": out_w.T, "bout": out_b.reshape(1, -1),
                "ln1_w": jnp.ones((1, D), jnp.float32), "ln1_b": jnp.zeros((1, D), jnp.float32),
                "w1_t": l1w.T, "b1": l1b.reshape(1, -1),
                "w2_t": l2w.T, "b2": l2b.reshape(1, -1),
                "ln2_w": jnp.ones((1, D), jnp.float32), "ln2_b": jnp.zeros((1, D), jnp.float32),
            }
        layers = [one() for _ in range(num_layers)]
        return {k: jnp.stack([lyr[k] for lyr in layers], axis=0) for k in layers[0]}

    def diff_emb():
        p1w, p1b = lin(D, D)
        p2w, p2b = lin(D, D)
        return {"table": build_diffusion_embedding_table(diff_steps, D),
                "p1w_t": p1w.T, "p1b": p1b.reshape(1, -1),
                "p2w_t": p2w.T, "p2b": p2b.reshape(1, -1)}

    pe = build_positional_encoding(D)

    ti_w, ti_b = lin(D, input_dim)                # temporal_inp_fc
    to_w, to_b = lin(input_dim, D)                # temporal_out_fc
    si_w, si_b = lin(D, L)                        # spatial_inp_fc
    so_w, so_b = lin(L, D)                        # spatial_out_fc

    cw = jax.random.normal(next(keys), (1, 2, 1, 1), jnp.float32) * 0.5   # Conv2d(2,1,1)
    cb = jax.random.normal(next(keys), (1,), jnp.float32) * 0.01

    t_emb = diff_emb()                            # step_spatial_encoder (feeds temporal branch)
    s_emb = diff_emb()                            # step_temporal_encoder (feeds spatial branch)

    return {
        "temporal": {
            "wi_t": ti_w.T, "bi": ti_b.reshape(1, -1),
            "pe": pe[:L],
            "emb": t_emb,                                       # raw (for reference check)
            "emb_table": _precompute_diff_embedding(t_emb),     # used by the kernel
            # (input bias + positional encoding) folded & tiled to [B*L, D]
            "addc": jnp.tile(pe[:L] + ti_b.reshape(1, -1), (batch, 1)),
            "stack": enc_stack(),
            "wo_t": to_w.T, "bo": to_b.reshape(1, -1),
        },
        "spatial": {
            "wi_t": si_w.T, "bi": si_b.reshape(1, -1),
            "pe": pe[:input_dim],
            "emb": s_emb,
            "emb_table": _precompute_diff_embedding(s_emb),
            "addc": jnp.tile(pe[:input_dim] + si_b.reshape(1, -1), (batch, 1)),
            "stack": enc_stack(),
            "wo": so_w, "bo": so_b.reshape(-1, 1),   # contracted on D in-kernel
        },
        "combine": jnp.concatenate([cw[0, :, 0, 0], cb]).reshape(1, 3),
    }


# ------------------------- pure-JAX reference (check) --------------------------

def _ref_forward(params, noise, x, t, *, num_heads, prefix_len):
    def linear(z, w_t, b):
        return z @ w_t + b.reshape(-1)

    def diff_emb(emb, step):
        e = emb["table"][step]
        e = linear(e, emb["p1w_t"], emb["p1b"]); e = e * jax.nn.sigmoid(e)
        e = linear(e, emb["p2w_t"], emb["p2b"]); e = e * jax.nn.sigmoid(e)
        return e

    def layer_norm(z, w, b):
        mu = z.mean(-1, keepdims=True)
        var = ((z - mu) ** 2).mean(-1, keepdims=True)
        return (z - mu) / jnp.sqrt(var + 1e-5) * w.reshape(-1) + b.reshape(-1)

    def encoder(z, stack, H):
        S, B, D = z.shape
        Dh = D // H
        for l in range(stack["wqkv_t"].shape[0]):
            qkv = linear(z, stack["wqkv_t"][l], stack["bqkv"][l])
            q, k, v = jnp.split(qkv, 3, axis=-1)
            heads = lambda a: a.reshape(S, B, H, Dh).transpose(1, 2, 0, 3)
            qh, kh, vh = heads(q), heads(k), heads(v)
            s = jnp.einsum("bhqd,bhkd->bhqk", qh, kh) / math.sqrt(Dh)
            p = jax.nn.softmax(s, axis=-1)
            o = jnp.einsum("bhqk,bhkd->bhqd", p, vh).transpose(2, 0, 1, 3).reshape(S, B, D)
            sa = linear(o, stack["wout_t"][l], stack["bout"][l])
            z = layer_norm(z + sa, stack["ln1_w"][l], stack["ln1_b"][l])
            hdn = linear(z, stack["w1_t"][l], stack["b1"][l])
            hdn = 0.5 * hdn * (1.0 + jax.lax.erf(hdn * np.float32(1.0 / math.sqrt(2.0))))
            ff = linear(hdn, stack["w2_t"][l], stack["b2"][l])
            z = layer_norm(z + ff, stack["ln2_w"][l], stack["ln2_b"][l])
        return z

    window = jnp.concatenate([x, noise], axis=0)
    tp, spp = params["temporal"], params["spatial"]
    temporal = linear(window, tp["wi_t"], tp["bi"]) + diff_emb(tp["emb"], t)
    temporal = temporal + tp["pe"][:, None, :]
    temporal = encoder(temporal, tp["stack"], num_heads)
    spatial = linear(window.transpose(2, 1, 0), spp["wi_t"], spp["bi"]) + diff_emb(spp["emb"], t)
    spatial = spatial + spp["pe"][:, None, :]
    spatial = encoder(spatial, spp["stack"], num_heads)
    t_out = linear(temporal, tp["wo_t"], tp["bo"])
    s_out = (spatial @ spp["wo"].T + spp["bo"].reshape(-1)).transpose(2, 1, 0)
    comb = params["combine"]
    out = comb[0, 0] * t_out + comb[0, 1] * s_out + comb[0, 2]
    return out[prefix_len:]


# ------------------------------------ main -------------------------------------

if __name__ == "__main__":
    input_dim, qkv_dim, num_layers, num_heads = 4, 32, 2, 2
    prefix_len, pred_len, diff_steps = 8, 8, 50
    batch = 2

    key = jax.random.PRNGKey(0)
    k_p, k_x, k_n = jax.random.split(key, 3)
    params = init_params(k_p, input_dim, qkv_dim, num_layers, num_heads,
                         prefix_len, pred_len, diff_steps, batch)

    x = jax.random.normal(k_x, (prefix_len, batch, input_dim), jnp.float32)
    noise = jax.random.normal(k_n, (pred_len, batch, input_dim), jnp.float32)
    t = jnp.int32(7)

    fwd = jax.jit(functools.partial(parallel_denoiser_forward,
                                    num_heads=num_heads, prefix_len=prefix_len))
    out = jax.block_until_ready(fwd(params, noise, x, t))

    assert out.shape == (pred_len, batch, input_dim), out.shape
    assert bool(jnp.all(jnp.isfinite(out)))

    ref = _ref_forward(params, noise, x, t, num_heads=num_heads, prefix_len=prefix_len)
    # 5e-3 tolerance: the only non-exact-f32 paths are the EUP approx
    # reciprocals in the softmax normalization and the erf-GELU inner divide;
    # all matmuls, LayerNorms and reductions stay in f32.
    assert bool(jnp.allclose(out, ref, atol=5e-3, rtol=5e-3)), (
        float(jnp.max(jnp.abs(out - ref))))

    print("KERNEL_OK")
</pallas_src>

<mosaic_0001>
module attributes {stable_mosaic.version = 11 : i64} {
  func.func @_denoiser_kernel(%arg0: memref<32x4xf32, #tpu.memory_space<vmem>>, %arg1: memref<8x16xf32, #tpu.memory_space<vmem>>, %arg2: memref<1x32xf32, #tpu.memory_space<vmem>>, %arg3: memref<1x32xf32, #tpu.memory_space<vmem>>, %arg4: memref<4x32xf32, #tpu.memory_space<vmem>>, %arg5: memref<32x32xf32, #tpu.memory_space<vmem>>, %arg6: memref<2x32x96xf32, #tpu.memory_space<vmem>>, %arg7: memref<2x1x96xf32, #tpu.memory_space<vmem>>, %arg8: memref<2x32x32xf32, #tpu.memory_space<vmem>>, %arg9: memref<2x1x32xf32, #tpu.memory_space<vmem>>, %arg10: memref<2x1x32xf32, #tpu.memory_space<vmem>>, %arg11: memref<2x1x32xf32, #tpu.memory_space<vmem>>, %arg12: memref<2x32x32xf32, #tpu.memory_space<vmem>>, %arg13: memref<2x1x32xf32, #tpu.memory_space<vmem>>, %arg14: memref<2x32x32xf32, #tpu.memory_space<vmem>>, %arg15: memref<2x1x32xf32, #tpu.memory_space<vmem>>, %arg16: memref<2x1x32xf32, #tpu.memory_space<vmem>>, %arg17: memref<2x1x32xf32, #tpu.memory_space<vmem>>, %arg18: memref<32x4xf32, #tpu.memory_space<vmem>>, %arg19: memref<1x4xf32, #tpu.memory_space<vmem>>, %arg20: memref<16x32xf32, #tpu.memory_space<vmem>>, %arg21: memref<8x32xf32, #tpu.memory_space<vmem>>, %arg22: memref<2x32x96xf32, #tpu.memory_space<vmem>>, %arg23: memref<2x1x96xf32, #tpu.memory_space<vmem>>, %arg24: memref<2x32x32xf32, #tpu.memory_space<vmem>>, %arg25: memref<2x1x32xf32, #tpu.memory_space<vmem>>, %arg26: memref<2x1x32xf32, #tpu.memory_space<vmem>>, %arg27: memref<2x1x32xf32, #tpu.memory_space<vmem>>, %arg28: memref<2x32x32xf32, #tpu.memory_space<vmem>>, %arg29: memref<2x1x32xf32, #tpu.memory_space<vmem>>, %arg30: memref<2x32x32xf32, #tpu.memory_space<vmem>>, %arg31: memref<2x1x32xf32, #tpu.memory_space<vmem>>, %arg32: memref<2x1x32xf32, #tpu.memory_space<vmem>>, %arg33: memref<2x1x32xf32, #tpu.memory_space<vmem>>, %arg34: memref<16x32xf32, #tpu.memory_space<vmem>>, %arg35: memref<16x1xf32, #tpu.memory_space<vmem>>, %arg36: memref<1x3xf32, #tpu.memory_space<vmem>>, %arg37: memref<16x8xf32, #tpu.memory_space<vmem>>, %arg38: memref<32x32xf32, #tpu.memory_space<vmem>>) attributes {dimension_semantics = [], scalar_prefetch = 0 : i64, scratch_operands = 1 : i64, tpu.core_type = #tpu.core_type<tc>} {
    %c0 = arith.constant 0 : index
    %c0_0 = arith.constant 0 : index
    %0 = vector.load %arg0[%c0, %c0_0] : memref<32x4xf32, #tpu.memory_space<vmem>>, vector<32x4xf32>
    %c0_1 = arith.constant 0 : index
    %c0_2 = arith.constant 0 : index
    %1 = vector.load %arg4[%c0_1, %c0_2] : memref<4x32xf32, #tpu.memory_space<vmem>>, vector<4x32xf32>
    %cst = arith.constant dense<0.000000e+00> : vector<32x32xf32>
    %2 = tpu.matmul %0, %1, %cst {dimension_numbers = #tpu.dot_dimension_numbers<[1], [0], [0], [1], [0, 0, 1, 1], [], []>} : vector<32x4xf32>, vector<4x32xf32>, vector<32x32xf32> -> vector<32x32xf32>
    %c0_3 = arith.constant 0 : index
    %c0_4 = arith.constant 0 : index
    %3 = vector.load %arg5[%c0_3, %c0_4] : memref<32x32xf32, #tpu.memory_space<vmem>>, vector<32x32xf32>
    %4 = arith.addf %2, %3 : vector<32x32xf32>
    %c0_5 = arith.constant 0 : index
    %c0_6 = arith.constant 0 : index
    %5 = vector.load %arg2[%c0_5, %c0_6] : memref<1x32xf32, #tpu.memory_space<vmem>>, vector<1x32xf32>
    %6 = vector.broadcast %5 : vector<1x32xf32> to vector<32x32xf32>
    %7 = arith.addf %4, %6 : vector<32x32xf32>
    %c0_7 = arith.constant 0 : index
    %c0_8 = arith.constant 0 : index
    %8 = vector.load %arg1[%c0_7, %c0_8] : memref<8x16xf32, #tpu.memory_space<vmem>>, vector<8x16xf32>
    %c0_9 = arith.constant 0 : index
    %c0_10 = arith.constant 0 : index
    %9 = vector.load %arg20[%c0_9, %c0_10] : memref<16x32xf32, #tpu.memory_space<vmem>>, vector<16x32xf32>
    %cst_11 = arith.constant dense<0.000000e+00> : vector<8x32xf32>
    %10 = tpu.matmul %8, %9, %cst_11 {dimension_numbers = #tpu.dot_dimension_numbers<[1], [0], [0], [1], [0, 0, 1, 1], [], []>} : vector<8x16xf32>, vector<16x32xf32>, vector<8x32xf32> -> vector<8x32xf32>
    %c0_12 = arith.constant 0 : index
    %c0_13 = arith.constant 0 : index
    %11 = vector.load %arg21[%c0_12, %c0_13] : memref<8x32xf32, #tpu.memory_space<vmem>>, vector<8x32xf32>
    %12 = arith.addf %10, %11 : vector<8x32xf32>
    %c0_14 = arith.constant 0 : index
    %c0_15 = arith.constant 0 : index
    %13 = vector.load %arg3[%c0_14, %c0_15] : memref<1x32xf32, #tpu.memory_space<vmem>>, vector<1x32xf32>
    %14 = vector.broadcast %13 : vector<1x32xf32> to vector<8x32xf32>
    %15 = arith.addf %12, %14 : vector<8x32xf32>
    %c0_16 = arith.constant 0 : index
    %c0_17 = arith.constant 0 : index
    %c0_18 = arith.constant 0 : index
    %16 = vector.load %arg6[%c0_16, %c0_17, %c0_18] : memref<2x32x96xf32, #tpu.memory_space<vmem>>, vector<1x32x96xf32>
    %17 = vector.shape_cast %16 : vector<1x32x96xf32> to vector<32x96xf32>
    %cst_19 = arith.constant dense<0.000000e+00> : vector<32x96xf32>
    %18 = tpu.matmul %7, %17, %cst_19 {dimension_numbers = #tpu.dot_dimension_numbers<[1], [0], [0], [1], [0, 0, 1, 1], [], []>} : vector<32x32xf32>, vector<32x96xf32>, vector<32x96xf32> -> vector<32x96xf32>
    %c0_20 = arith.constant 0 : index
    %c0_21 = arith.constant 0 : index
    %c0_22 = arith.constant 0 : index
    %19 = vector.load %arg7[%c0_20, %c0_21, %c0_22] : memref<2x1x96xf32, #tpu.memory_space<vmem>>, vector<1x1x96xf32>
    %20 = vector.shape_cast %19 : vector<1x1x96xf32> to vector<1x96xf32>
    %21 = vector.broadcast %20 : vector<1x96xf32> to vector<32x96xf32>
    %22 = arith.addf %18, %21 : vector<32x96xf32>
    %23 = vector.extract_strided_slice %22 {offsets = [0, 0], sizes = [16, 16], strides = [1, 1]} : vector<32x96xf32> to vector<16x16xf32>
    %24 = vector.extract_strided_slice %22 {offsets = [0, 32], sizes = [16, 16], strides = [1, 1]} : vector<32x96xf32> to vector<16x16xf32>
    %25 = vector.extract_strided_slice %22 {offsets = [0, 64], sizes = [16, 16], strides = [1, 1]} : vector<32x96xf32> to vector<16x16xf32>
    %cst_23 = arith.constant dense<0.000000e+00> : vector<16x16xf32>
    %26 = tpu.matmul %23, %24, %cst_23 {dimension_numbers = #tpu.dot_dimension_numbers<[1], [1], [0], [0], [0, 0, 1, 0], [], []>} : vector<16x16xf32>, vector<16x16xf32>, vector<16x16xf32> -> vector<16x16xf32>
    %cst_24 = arith.constant 2.500000e-01 : f32
    %27 = vector.broadcast %cst_24 : f32 to vector<16x16xf32>
    %28 = arith.mulf %26, %27 : vector<16x16xf32>
    %cst_25 = arith.constant dense<0xFF800000> : vector<16xf32>
    %29 = vector.multi_reduction <maximumf>, %28, %cst_25 [1] : vector<16x16xf32> to vector<16xf32>
    %30 = vector.shape_cast %29 : vector<16xf32> to vector<16x1xf32>
    %31 = vector.broadcast %30 : vector<16x1xf32> to vector<16x16xf32>
    %32 = arith.subf %28, %31 : vector<16x16xf32>
    %33 = math.exp %32 : vector<16x16xf32>
    %cst_26 = arith.constant dense<0.000000e+00> : vector<16xf32>
    %34 = vector.multi_reduction <add>, %33, %cst_26 [1] : vector<16x16xf32> to vector<16xf32>
    %35 = vector.shape_cast %34 : vector<16xf32> to vector<16x1xf32>
    %36 = tpu.reciprocal %35 {approx = true} : vector<16x1xf32> -> vector<16x1xf32>
    %37 = vector.broadcast %36 : vector<16x1xf32> to vector<16x16xf32>
    %38 = arith.mulf %33, %37 : vector<16x16xf32>
    %cst_27 = arith.constant dense<0.000000e+00> : vector<16x16xf32>
    %39 = tpu.matmul %38, %25, %cst_27 {dimension_numbers = #tpu.dot_dimension_numbers<[1], [0], [0], [1], [0, 0, 1, 1], [], []>} : vector<16x16xf32>, vector<16x16xf32>, vector<16x16xf32> -> vector<16x16xf32>
    %c0_28 = arith.constant 0 : index
    %c0_29 = arith.constant 0 : index
    %40 = vector.load %arg38[%c0_28, %c0_29] : memref<32x32xf32, #tpu.memory_space<vmem>>, vector<16x16xf32>
    tpu.vector_store %arg38[%c0_28, %c0_29], %39 {strides = array<i32>} : memref<32x32xf32, #tpu.memory_space<vmem>>, vector<16x16xf32>,
    %41 = vector.extract_strided_slice %22 {offsets = [0, 16], sizes = [16, 16], strides = [1, 1]} : vector<32x96xf32> to vector<16x16xf32>
    %42 = vector.extract_strided_slice %22 {offsets = [0, 48], sizes = [16, 16], strides = [1, 1]} : vector<32x96xf32> to vector<16x16xf32>
    %43 = vector.extract_strided_slice %22 {offsets = [0, 80], sizes = [16, 16], strides = [1, 1]} : vector<32x96xf32> to vector<16x16xf32>
    %cst_30 = arith.constant dense<0.000000e+00> : vector<16x16xf32>
    %44 = tpu.matmul %41, %42, %cst_30 {dimension_numbers = #tpu.dot_dimension_numbers<[1], [1], [0], [0], [0, 0, 1, 0], [], []>} : vector<16x16xf32>, vector<16x16xf32>, vector<16x16xf32> -> vector<16x16xf32>
    %cst_31 = arith.constant 2.500000e-01 : f32
    %45 = vector.broadcast %cst_31 : f32 to vector<16x16xf32>
    %46 = arith.mulf %44, %45 : vector<16x16xf32>
    %cst_32 = arith.constant dense<0xFF800000> : vector<16xf32>
    %47 = vector.multi_reduction <maximumf>, %46, %cst_32 [1] : vector<16x16xf32> to vector<16xf32>
    %48 = vector.shape_cast %47 : vector<16xf32> to vector<16x1xf32>
    %49 = vector.broadcast %48 : vector<16x1xf32> to vector<16x16xf32>
    %50 = arith.subf %46, %49 : vector<16x16xf32>
    %51 = math.exp %50 : vector<16x16xf32>
    %cst_33 = arith.constant dense<0.000000e+00> : vector<16xf32>
    %52 = vector.multi_reduction <add>, %51, %cst_33 [1] : vector<16x16xf32> to vector<16xf32>
    %53 = vector.shape_cast %52 : vector<16xf32> to vector<16x1xf32>
    %54 = tpu.reciprocal %53 {approx = true} : vector<16x1xf32> -> vector<16x1xf32>
    %55 = vector.broadcast %54 : vector<16x1xf32> to vector<16x16xf32>
    %56 = arith.mulf %51, %55 : vector<16x16xf32>
    %cst_34 = arith.constant dense<0.000000e+00> : vector<16x16xf32>
    %57 = tpu.matmul %56, %43, %cst_34 {dimension_numbers = #tpu.dot_dimension_numbers<[1], [0], [0], [1], [0, 0, 1, 1], [], []>} : vector<16x16xf32>, vector<16x16xf32>, vector<16x16xf32> -> vector<16x16xf32>
    %c0_35 = arith.constant 0 : index
    %c16 = arith.constant 16 : index
    %58 = vector.load %arg38[%c0_35, %c16] : memref<32x32xf32, #tpu.memory_space<vmem>>, vector<16x16xf32>
    tpu.vector_store %arg38[%c0_35, %c16], %57 {strides = array<i32>} : memref<32x32xf32, #tpu.memory_space<vmem>>, vector<16x16xf32>,
    %59 = vector.extract_strided_slice %22 {offsets = [16, 0], sizes = [16, 16], strides = [1, 1]} : vector<32x96xf32> to vector<16x16xf32>
    %60 = vector.extract_strided_slice %22 {offsets = [16, 32], sizes = [16, 16], strides = [1, 1]} : vector<32x96xf32> to vector<16x16xf32>
    %61 = vector.extract_strided_slice %22 {offsets = [16, 64], sizes = [16, 16], strides = [1, 1]} : vector<32x96xf32> to vector<16x16xf32>
    %cst_36 = arith.constant dense<0.000000e+00> : vector<16x16xf32>
    %62 = tpu.matmul %59, %60, %cst_36 {dimension_numbers = #tpu.dot_dimension_numbers<[1], [1], [0], [0], [0, 0, 1, 0], [], []>} : vector<16x16xf32>, vector<16x16xf32>, vector<16x16xf32> -> vector<16x16xf32>
    %cst_37 = arith.constant 2.500000e-01 : f32
    %63 = vector.broadcast %cst_37 : f32 to vector<16x16xf32>
    %64 = arith.mulf %62, %63 : vector<16x16xf32>
    %cst_38 = arith.constant dense<0xFF800000> : vector<16xf32>
    %65 = vector.multi_reduction <maximumf>, %64, %cst_38 [1] : vector<16x16xf32> to vector<16xf32>
    %66 = vector.shape_cast %65 : vector<16xf32> to vector<16x1xf32>
    %67 = vector.broadcast %66 : vector<16x1xf32> to vector<16x16xf32>
    %68 = arith.subf %64, %67 : vector<16x16xf32>
    %69 = math.exp %68 : vector<16x16xf32>
    %cst_39 = arith.constant dense<0.000000e+00> : vector<16xf32>
    %70 = vector.multi_reduction <add>, %69, %cst_39 [1] : vector<16x16xf32> to vector<16xf32>
    %71 = vector.shape_cast %70 : vector<16xf32> to vector<16x1xf32>
    %72 = tpu.reciprocal %71 {approx = true} : vector<16x1xf32> -> vector<16x1xf32>
    %73 = vector.broadcast %72 : vector<16x1xf32> to vector<16x16xf32>
    %74 = arith.mulf %69, %73 : vector<16x16xf32>
    %cst_40 = arith.constant dense<0.000000e+00> : vector<16x16xf32>
    %75 = tpu.matmul %74, %61, %cst_40 {dimension_numbers = #tpu.dot_dimension_numbers<[1], [0], [0], [1], [0, 0, 1, 1], [], []>} : vector<16x16xf32>, vector<16x16xf32>, vector<16x16xf32> -> vector<16x16xf32>
    %c16_41 = arith.constant 16 : index
    %c0_42 = arith.constant 0 : index
    %76 = vector.load %arg38[%c16_41, %c0_42] : memref<32x32xf32, #tpu.memory_space<vmem>>, vector<16x16xf32>
    tpu.vector_store %arg38[%c16_41, %c0_42], %75 {strides = array<i32>} : memref<32x32xf32, #tpu.memory_space<vmem>>, vector<16x16xf32>,
    %77 = vector.extract_strided_slice %22 {offsets = [16, 16], sizes = [16, 16], strides = [1, 1]} : vector<32x96xf32> to vector<16x16xf32>
    %78 = vector.extract_strided_slice %22 {offsets = [16, 48], sizes = [16, 16], strides = [1, 1]} : vector<32x96xf32> to vector<16x16xf32>
    %79 = vector.extract_strided_slice %22 {offsets = [16, 80], sizes = [16, 16], strides = [1, 1]} : vector<32x96xf32> to vector<16x16xf32>
    %cst_43 = arith.constant dense<0.000000e+00> : vector<16x16xf32>
    %80 = tpu.matmul %77, %78, %cst_43 {dimension_numbers = #tpu.dot_dimension_numbers<[1], [1], [0], [0], [0, 0, 1, 0], [], []>} : vector<16x16xf32>, vector<16x16xf32>, vector<16x16xf32> -> vector<16x16xf32>
    %cst_44 = arith.constant 2.500000e-01 : f32
    %81 = vector.broadcast %cst_44 : f32 to vector<16x16xf32>
    %82 = arith.mulf %80, %81 : vector<16x16xf32>
    %cst_45 = arith.constant dense<0xFF800000> : vector<16xf32>
    %83 = vector.multi_reduction <maximumf>, %82, %cst_45 [1] : vector<16x16xf32> to vector<16xf32>
    %84 = vector.shape_cast %83 : vector<16xf32> to vector<16x1xf32>
    %85 = vector.broadcast %84 : vector<16x1xf32> to vector<16x16xf32>
    %86 = arith.subf %82, %85 : vector<16x16xf32>
    %87 = math.exp %86 : vector<16x16xf32>
    %cst_46 = arith.constant dense<0.000000e+00> : vector<16xf32>
    %88 = vector.multi_reduction <add>, %87, %cst_46 [1] : vector<16x16xf32> to vector<16xf32>
    %89 = vector.shape_cast %88 : vector<16xf32> to vector<16x1xf32>
    %90 = tpu.reciprocal %89 {approx = true} : vector<16x1xf32> -> vector<16x1xf32>
    %91 = vector.broadcast %90 : vector<16x1xf32> to vector<16x16xf32>
    %92 = arith.mulf %87, %91 : vector<16x16xf32>
    %cst_47 = arith.constant dense<0.000000e+00> : vector<16x16xf32>
    %93 = tpu.matmul %92, %79, %cst_47 {dimension_numbers = #tpu.dot_dimension_numbers<[1], [0], [0], [1], [0, 0, 1, 1], [], []>} : vector<16x16xf32>, vector<16x16xf32>, vector<16x16xf32> -> vector<16x16xf32>
    %c16_48 = arith.constant 16 : index
    %c16_49 = arith.constant 16 : index
    %94 = vector.load %arg38[%c16_48, %c16_49] : memref<32x32xf32, #tpu.memory_space<vmem>>, vector<16x16xf32>
    tpu.vector_store %arg38[%c16_48, %c16_49], %93 {strides = array<i32>} : memref<32x32xf32, #tpu.memory_space<vmem>>, vector<16x16xf32>,
    %c0_50 = arith.constant 0 : index
    %c0_51 = arith.constant 0 : index
    %95 = vector.load %arg38[%c0_50, %c0_51] : memref<32x32xf32, #tpu.memory_space<vmem>>, vector<32x32xf32>
    %c0_52 = arith.constant 0 : index
    %c0_53 = arith.constant 0 : index
    %c0_54 = arith.constant 0 : index
    %96 = vector.load %arg8[%c0_52, %c0_53, %c0_54] : memref<2x32x32xf32, #tpu.memory_space<vmem>>, vector<1x32x32xf32>
    %97 = vector.shape_cast %96 : vector<1x32x32xf32> to vector<32x32xf32>
    %cst_55 = arith.constant dense<0.000000e+00> : vector<32x32xf32>
    %98 = tpu.matmul %95, %97, %cst_55 {dimension_numbers = #tpu.dot_dimension_numbers<[1], [0], [0], [1], [0, 0, 1, 1], [], []>} : vector<32x32xf32>, vector<32x32xf32>, vector<32x32xf32> -> vector<32x32xf32>
    %c0_56 = arith.constant 0 : index
    %c0_57 = arith.constant 0 : index
    %c0_58 = arith.constant 0 : index
    %99 = vector.load %arg9[%c0_56, %c0_57, %c0_58] : memref<2x1x32xf32, #tpu.memory_space<vmem>>, vector<1x1x32xf32>
    %100 = vector.shape_cast %99 : vector<1x1x32xf32> to vector<1x32xf32>
    %101 = vector.broadcast %100 : vector<1x32xf32> to vector<32x32xf32>
    %102 = arith.addf %98, %101 : vector<32x32xf32>
    %103 = arith.addf %7, %102 : vector<32x32xf32>
    %c0_59 = arith.constant 0 : index
    %c0_60 = arith.constant 0 : index
    %c0_61 = arith.constant 0 : index
    %104 = vector.load %arg10[%c0_59, %c0_60, %c0_61] : memref<2x1x32xf32, #tpu.memory_space<vmem>>, vector<1x1x32xf32>
    %105 = vector.shape_cast %104 : vector<1x1x32xf32> to vector<1x32xf32>
    %c0_62 = arith.constant 0 : index
    %c0_63 = arith.constant 0 : index
    %c0_64 = arith.constant 0 : index
    %106 = vector.load %arg11[%c0_62, %c0_63, %c0_64] : memref<2x1x32xf32, #tpu.memory_space<vmem>>, vector<1x1x32xf32>
    %107 = vector.shape_cast %106 : vector<1x1x32xf32> to vector<1x32xf32>
    %cst_65 = arith.constant dense<0.000000e+00> : vector<32xf32>
    %108 = vector.multi_reduction <add>, %103, %cst_65 [1] : vector<32x32xf32> to vector<32xf32>
    %109 = vector.shape_cast %108 : vector<32xf32> to vector<32x1xf32>
    %cst_66 = arith.constant 3.200000e+01 : f32
    %110 = vector.broadcast %cst_66 : f32 to vector<32x1xf32>
    %111 = arith.divf %109, %110 : vector<32x1xf32>
    %112 = vector.broadcast %111 : vector<32x1xf32> to vector<32x32xf32>
    %113 = arith.subf %103, %112 : vector<32x32xf32>
    %114 = arith.mulf %113, %113 : vector<32x32xf32>
    %cst_67 = arith.constant dense<0.000000e+00> : vector<32xf32>
    %115 = vector.multi_reduction <add>, %114, %cst_67 [1] : vector<32x32xf32> to vector<32xf32>
    %116 = vector.shape_cast %115 : vector<32xf32> to vector<32x1xf32>
    %cst_68 = arith.constant 3.200000e+01 : f32
    %117 = vector.broadcast %cst_68 : f32 to vector<32x1xf32>
    %118 = arith.divf %116, %117 : vector<32x1xf32>
    %119 = vector.broadcast %111 : vector<32x1xf32> to vector<32x32xf32>
    %120 = arith.subf %103, %119 : vector<32x32xf32>
    %cst_69 = arith.constant 9.99999974E-6 : f32
    %121 = vector.broadcast %cst_69 : f32 to vector<32x1xf32>
    %122 = arith.addf %118, %121 : vector<32x1xf32>
    %123 = math.rsqrt %122 : vector<32x1xf32>
    %124 = vector.broadcast %123 : vector<32x1xf32> to vector<32x32xf32>
    %125 = arith.mulf %120, %124 : vector<32x32xf32>
    %126 = vector.broadcast %105 : vector<1x32xf32> to vector<32x32xf32>
    %127 = arith.mulf %125, %126 : vector<32x32xf32>
    %128 = vector.broadcast %107 : vector<1x32xf32> to vector<32x32xf32>
    %129 = arith.addf %127, %128 : vector<32x32xf32>
    %c0_70 = arith.constant 0 : index
    %c0_71 = arith.constant 0 : index
    %c0_72 = arith.constant 0 : index
    %130 = vector.load %arg12[%c0_70, %c0_71, %c0_72] : memref<2x32x32xf32, #tpu.memory_space<vmem>>, vector<1x32x32xf32>
    %131 = vector.shape_cast %130 : vector<1x32x32xf32> to vector<32x32xf32>
    %cst_73 = arith.constant dense<0.000000e+00> : vector<32x32xf32>
    %132 = tpu.matmul %129, %131, %cst_73 {dimension_numbers = #tpu.dot_dimension_numbers<[1], [0], [0], [1], [0, 0, 1, 1], [], []>} : vector<32x32xf32>, vector<32x32xf32>, vector<32x32xf32> -> vector<32x32xf32>
    %c0_74 = arith.constant 0 : index
    %c0_75 = arith.constant 0 : index
    %c0_76 = arith.constant 0 : index
    %133 = vector.load %arg13[%c0_74, %c0_75, %c0_76] : memref<2x1x32xf32, #tpu.memory_space<vmem>>, vector<1x1x32xf32>
    %134 = vector.shape_cast %133 : vector<1x1x32xf32> to vector<1x32xf32>
    %135 = vector.broadcast %134 : vector<1x32xf32> to vector<32x32xf32>
    %136 = arith.addf %132, %135 : vector<32x32xf32>
    %cst_77 = arith.constant 5.000000e-01 : f32
    %137 = vector.broadcast %cst_77 : f32 to vector<32x32xf32>
    %138 = arith.mulf %137, %136 : vector<32x32xf32>
    %cst_78 = arith.constant 0.707106769 : f32
    %139 = vector.broadcast %cst_78 : f32 to vector<32x32xf32>
    %140 = arith.mulf %136, %139 : vector<32x32xf32>
    %cst_79 = arith.constant 0.000000e+00 : f32
    %141 = vector.broadcast %cst_79 : f32 to vector<32x32xf32>
    %142 = arith.cmpf oge, %140, %141 : vector<32x32xf32>
    %cst_80 = arith.constant 1.000000e+00 : f32
    %cst_81 = arith.constant -1.000000e+00 : f32
    %143 = vector.broadcast %cst_80 : f32 to vector<32x32xf32>
    %144 = vector.broadcast %cst_81 : f32 to vector<32x32xf32>
    %145 = arith.select %142, %143, %144 : vector<32x32xi1>, vector<32x32xf32>
    %146 = math.absf %140 : vector<32x32xf32>
    %cst_82 = arith.constant 0.327591091 : f32
    %147 = vector.broadcast %cst_82 : f32 to vector<32x32xf32>
    %148 = arith.mulf %147, %146 : vector<32x32xf32>
    %cst_83 = arith.constant 1.000000e+00 : f32
    %149 = vector.broadcast %cst_83 : f32 to vector<32x32xf32>
    %150 = arith.addf %149, %148 : vector<32x32xf32>
    %151 = tpu.reciprocal %150 {approx = true} : vector<32x32xf32> -> vector<32x32xf32>
    %cst_84 = arith.constant 1.06140542 : f32
    %152 = vector.broadcast %cst_84 : f32 to vector<32x32xf32>
    %153 = arith.mulf %152, %151 : vector<32x32xf32>
    %cst_85 = arith.constant -1.45315206 : f32
    %154 = vector.broadcast %cst_85 : f32 to vector<32x32xf32>
    %155 = arith.addf %153, %154 : vector<32x32xf32>
    %156 = arith.mulf %155, %151 : vector<32x32xf32>
    %cst_86 = arith.constant 1.42141378 : f32
    %157 = vector.broadcast %cst_86 : f32 to vector<32x32xf32>
    %158 = arith.addf %156, %157 : vector<32x32xf32>
    %159 = arith.mulf %158, %151 : vector<32x32xf32>
    %cst_87 = arith.constant -0.284496725 : f32
    %160 = vector.broadcast %cst_87 : f32 to vector<32x32xf32>
    %161 = arith.addf %159, %160 : vector<32x32xf32>
    %162 = arith.mulf %161, %151 : vector<32x32xf32>
    %cst_88 = arith.constant 0.254829586 : f32
    %163 = vector.broadcast %cst_88 : f32 to vector<32x32xf32>
    %164 = arith.addf %162, %163 : vector<32x32xf32>
    %165 = arith.mulf %164, %151 : vector<32x32xf32>
    %cst_89 = arith.constant 0.000000e+00 : f32
    %166 = vector.broadcast %cst_89 : f32 to vector<32x32xf32>
    %167 = arith.subf %166, %146 : vector<32x32xf32>
    %168 = arith.mulf %167, %146 : vector<32x32xf32>
    %169 = math.exp %168 : vector<32x32xf32>
    %170 = arith.mulf %165, %169 : vector<32x32xf32>
    %cst_90 = arith.constant 1.000000e+00 : f32
    %171 = vector.broadcast %cst_90 : f32 to vector<32x32xf32>
    %172 = arith.subf %171, %170 : vector<32x32xf32>
    %173 = arith.mulf %145, %172 : vector<32x32xf32>
    %cst_91 = arith.constant 1.000000e+00 : f32
    %174 = vector.broadcast %cst_91 : f32 to vector<32x32xf32>
    %175 = arith.addf %174, %173 : vector<32x32xf32>
    %176 = arith.mulf %138, %175 : vector<32x32xf32>
    %c0_92 = arith.constant 0 : index
    %c0_93 = arith.constant 0 : index
    %c0_94 = arith.constant 0 : index
    %177 = vector.load %arg14[%c0_92, %c0_93, %c0_94] : memref<2x32x32xf32, #tpu.memory_space<vmem>>, vector<1x32x32xf32>
    %178 = vector.shape_cast %177 : vector<1x32x32xf32> to vector<32x32xf32>
    %cst_95 = arith.constant dense<0.000000e+00> : vector<32x32xf32>
    %179 = tpu.matmul %176, %178, %cst_95 {dimension_numbers = #tpu.dot_dimension_numbers<[1], [0], [0], [1], [0, 0, 1, 1], [], []>} : vector<32x32xf32>, vector<32x32xf32>, vector<32x32xf32> -> vector<32x32xf32>
    %c0_96 = arith.constant 0 : index
    %c0_97 = arith.constant 0 : index
    %c0_98 = arith.constant 0 : index
    %180 = vector.load %arg15[%c0_96, %c0_97, %c0_98] : memref<2x1x32xf32, #tpu.memory_space<vmem>>, vector<1x1x32xf32>
    %181 = vector.shape_cast %180 : vector<1x1x32xf32> to vector<1x32xf32>
    %182 = vector.broadcast %181 : vector<1x32xf32> to vector<32x32xf32>
    %183 = arith.addf %179, %182 : vector<32x32xf32>
    %184 = arith.addf %129, %183 : vector<32x32xf32>
    %c0_99 = arith.constant 0 : index
    %c0_100 = arith.constant 0 : index
    %c0_101 = arith.constant 0 : index
    %185 = vector.load %arg16[%c0_99, %c0_100, %c0_101] : memref<2x1x32xf32, #tpu.memory_space<vmem>>, vector<1x1x32xf32>
    %186 = vector.shape_cast %185 : vector<1x1x32xf32> to vector<1x32xf32>
    %c0_102 = arith.constant 0 : index
    %c0_103 = arith.constant 0 : index
    %c0_104 = arith.constant 0 : index
    %187 = vector.load %arg17[%c0_102, %c0_103, %c0_104] : memref<2x1x32xf32, #tpu.memory_space<vmem>>, vector<1x1x32xf32>
    %188 = vector.shape_cast %187 : vector<1x1x32xf32> to vector<1x32xf32>
    %cst_105 = arith.constant dense<0.000000e+00> : vector<32xf32>
    %189 = vector.multi_reduction <add>, %184, %cst_105 [1] : vector<32x32xf32> to vector<32xf32>
    %190 = vector.shape_cast %189 : vector<32xf32> to vector<32x1xf32>
    %cst_106 = arith.constant 3.200000e+01 : f32
    %191 = vector.broadcast %cst_106 : f32 to vector<32x1xf32>
    %192 = arith.divf %190, %191 : vector<32x1xf32>
    %193 = vector.broadcast %192 : vector<32x1xf32> to vector<32x32xf32>
    %194 = arith.subf %184, %193 : vector<32x32xf32>
    %195 = arith.mulf %194, %194 : vector<32x32xf32>
    %cst_107 = arith.constant dense<0.000000e+00> : vector<32xf32>
    %196 = vector.multi_reduction <add>, %195, %cst_107 [1] : vector<32x32xf32> to vector<32xf32>
    %197 = vector.shape_cast %196 : vector<32xf32> to vector<32x1xf32>
    %cst_108 = arith.constant 3.200000e+01 : f32
    %198 = vector.broadcast %cst_108 : f32 to vector<32x1xf32>
    %199 = arith.divf %197, %198 : vector<32x1xf32>
    %200 = vector.broadcast %192 : vector<32x1xf32> to vector<32x32xf32>
    %201 = arith.subf %184, %200 : vector<32x32xf32>
    %cst_109 = arith.constant 9.99999974E-6 : f32
    %202 = vector.broadcast %cst_109 : f32 to vector<32x1xf32>
    %203 = arith.addf %199, %202 : vector<32x1xf32>
    %204 = math.rsqrt %203 : vector<32x1xf32>
    %205 = vector.broadcast %204 : vector<32x1xf32> to vector<32x32xf32>
    %206 = arith.mulf %201, %205 : vector<32x32xf32>
    %207 = vector.broadcast %186 : vector<1x32xf32> to vector<32x32xf32>
    %208 = arith.mulf %206, %207 : vector<32x32xf32>
    %209 = vector.broadcast %188 : vector<1x32xf32> to vector<32x32xf32>
    %210 = arith.addf %208, %209 : vector<32x32xf32>
    %c1 = arith.constant 1 : index
    %c0_110 = arith.constant 0 : index
    %c0_111 = arith.constant 0 : index
    %211 = vector.load %arg6[%c1, %c0_110, %c0_111] : memref<2x32x96xf32, #tpu.memory_space<vmem>>, vector<1x32x96xf32>
    %212 = vector.shape_cast %211 : vector<1x32x96xf32> to vector<32x96xf32>
    %cst_112 = arith.constant dense<0.000000e+00> : vector<32x96xf32>
    %213 = tpu.matmul %210, %212, %cst_112 {dimension_numbers = #tpu.dot_dimension_numbers<[1], [0], [0], [1], [0, 0, 1, 1], [], []>} : vector<32x32xf32>, vector<32x96xf32>, vector<32x96xf32> -> vector<32x96xf32>
    %c1_113 = arith.constant 1 : index
    %c0_114 = arith.constant 0 : index
    %c0_115 = arith.constant 0 : index
    %214 = vector.load %arg7[%c1_113, %c0_114, %c0_115] : memref<2x1x96xf32, #tpu.memory_space<vmem>>, vector<1x1x96xf32>
    %215 = vector.shape_cast %214 : vector<1x1x96xf32> to vector<1x96xf32>
    %216 = vector.broadcast %215 : vector<1x96xf32> to vector<32x96xf32>
    %217 = arith.addf %213, %216 : vector<32x96xf32>
    %218 = vector.extract_strided_slice %217 {offsets = [0, 0], sizes = [16, 16], strides = [1, 1]} : vector<32x96xf32> to vector<16x16xf32>
    %219 = vector.extract_strided_slice %217 {offsets = [0, 32], sizes = [16, 16], strides = [1, 1]} : vector<32x96xf32> to vector<16x16xf32>
    %220 = vector.extract_strided_slice %217 {offsets = [0, 64], sizes = [16, 16], strides = [1, 1]} : vector<32x96xf32> to vector<16x16xf32>
    %cst_116 = arith.constant dense<0.000000e+00> : vector<16x16xf32>
    %221 = tpu.matmul %218, %219, %cst_116 {dimension_numbers = #tpu.dot_dimension_numbers<[1], [1], [0], [0], [0, 0, 1, 0], [], []>} : vector<16x16xf32>, vector<16x16xf32>, vector<16x16xf32> -> vector<16x16xf32>
    %cst_117 = arith.constant 2.500000e-01 : f32
    %222 = vector.broadcast %cst_117 : f32 to vector<16x16xf32>
    %223 = arith.mulf %221, %222 : vector<16x16xf32>
    %cst_118 = arith.constant dense<0xFF800000> : vector<16xf32>
    %224 = vector.multi_reduction <maximumf>, %223, %cst_118 [1] : vector<16x16xf32> to vector<16xf32>
    %225 = vector.shape_cast %224 : vector<16xf32> to vector<16x1xf32>
    %226 = vector.broadcast %225 : vector<16x1xf32> to vector<16x16xf32>
    %227 = arith.subf %223, %226 : vector<16x16xf32>
    %228 = math.exp %227 : vector<16x16xf32>
    %cst_119 = arith.constant dense<0.000000e+00> : vector<16xf32>
    %229 = vector.multi_reduction <add>, %228, %cst_119 [1] : vector<16x16xf32> to vector<16xf32>
    %230 = vector.shape_cast %229 : vector<16xf32> to vector<16x1xf32>
    %231 = tpu.reciprocal %230 {approx = true} : vector<16x1xf32> -> vector<16x1xf32>
    %232 = vector.broadcast %231 : vector<16x1xf32> to vector<16x16xf32>
    %233 = arith.mulf %228, %232 : vector<16x16xf32>
    %cst_120 = arith.constant dense<0.000000e+00> : vector<16x16xf32>
    %234 = tpu.matmul %233, %220, %cst_120 {dimension_numbers = #tpu.dot_dimension_numbers<[1], [0], [0], [1], [0, 0, 1, 1], [], []>} : vector<16x16xf32>, vector<16x16xf32>, vector<16x16xf32> -> vector<16x16xf32>
    %c0_121 = arith.constant 0 : index
    %c0_122 = arith.constant 0 : index
    %235 = vector.load %arg38[%c0_121, %c0_122] : memref<32x32xf32, #tpu.memory_space<vmem>>, vector<16x16xf32>
    tpu.vector_store %arg38[%c0_121, %c0_122], %234 {strides = array<i32>} : memref<32x32xf32, #tpu.memory_space<vmem>>, vector<16x16xf32>,
    %236 = vector.extract_strided_slice %217 {offsets = [0, 16], sizes = [16, 16], strides = [1, 1]} : vector<32x96xf32> to vector<16x16xf32>
    %237 = vector.extract_strided_slice %217 {offsets = [0, 48], sizes = [16, 16], strides = [1, 1]} : vector<32x96xf32> to vector<16x16xf32>
    %238 = vector.extract_strided_slice %217 {offsets = [0, 80], sizes = [16, 16], strides = [1, 1]} : vector<32x96xf32> to vector<16x16xf32>
    %cst_123 = arith.constant dense<0.000000e+00> : vector<16x16xf32>
    %239 = tpu.matmul %236, %237, %cst_123 {dimension_numbers = #tpu.dot_dimension_numbers<[1], [1], [0], [0], [0, 0, 1, 0], [], []>} : vector<16x16xf32>, vector<16x16xf32>, vector<16x16xf32> -> vector<16x16xf32>
    %cst_124 = arith.constant 2.500000e-01 : f32
    %240 = vector.broadcast %cst_124 : f32 to vector<16x16xf32>
    %241 = arith.mulf %239, %240 : vector<16x16xf32>
    %cst_125 = arith.constant dense<0xFF800000> : vector<16xf32>
    %242 = vector.multi_reduction <maximumf>, %241, %cst_125 [1] : vector<16x16xf32> to vector<16xf32>
    %243 = vector.shape_cast %242 : vector<16xf32> to vector<16x1xf32>
    %244 = vector.broadcast %243 : vector<16x1xf32> to vector<16x16xf32>
    %245 = arith.subf %241, %244 : vector<16x16xf32>
    %246 = math.exp %245 : vector<16x16xf32>
    %cst_126 = arith.constant dense<0.000000e+00> : vector<16xf32>
    %247 = vector.multi_reduction <add>, %246, %cst_126 [1] : vector<16x16xf32> to vector<16xf32>
    %248 = vector.shape_cast %247 : vector<16xf32> to vector<16x1xf32>
    %249 = tpu.reciprocal %248 {approx = true} : vector<16x1xf32> -> vector<16x1xf32>
    %250 = vector.broadcast %249 : vector<16x1xf32> to vector<16x16xf32>
    %251 = arith.mulf %246, %250 : vector<16x16xf32>
    %cst_127 = arith.constant dense<0.000000e+00> : vector<16x16xf32>
    %252 = tpu.matmul %251, %238, %cst_127 {dimension_numbers = #tpu.dot_dimension_numbers<[1], [0], [0], [1], [0, 0, 1, 1], [], []>} : vector<16x16xf32>, vector<16x16xf32>, vector<16x16xf32> -> vector<16x16xf32>
    %c0_128 = arith.constant 0 : index
    %c16_129 = arith.constant 16 : index
    %253 = vector.load %arg38[%c0_128, %c16_129] : memref<32x32xf32, #tpu.memory_space<vmem>>, vector<16x16xf32>
    tpu.vector_store %arg38[%c0_128, %c16_129], %252 {strides = array<i32>} : memref<32x32xf32, #tpu.memory_space<vmem>>, vector<16x16xf32>,
    %254 = vector.extract_strided_slice %217 {offsets = [16, 0], sizes = [16, 16], strides = [1, 1]} : vector<32x96xf32> to vector<16x16xf32>
    %255 = vector.extract_strided_slice %217 {offsets = [16, 32], sizes = [16, 16], strides = [1, 1]} : vector<32x96xf32> to vector<16x16xf32>
    %256 = vector.extract_strided_slice %217 {offsets = [16, 64], sizes = [16, 16], strides = [1, 1]} : vector<32x96xf32> to vector<16x16xf32>
    %cst_130 = arith.constant dense<0.000000e+00> : vector<16x16xf32>
    %257 = tpu.matmul %254, %255, %cst_130 {dimension_numbers = #tpu.dot_dimension_numbers<[1], [1], [0], [0], [0, 0, 1, 0], [], []>} : vector<16x16xf32>, vector<16x16xf32>, vector<16x16xf32> -> vector<16x16xf32>
    %cst_131 = arith.constant 2.500000e-01 : f32
    %258 = vector.broadcast %cst_131 : f32 to vector<16x16xf32>
    %259 = arith.mulf %257, %258 : vector<16x16xf32>
    %cst_132 = arith.constant dense<0xFF800000> : vector<16xf32>
    %260 = vector.multi_reduction <maximumf>, %259, %cst_132 [1] : vector<16x16xf32> to vector<16xf32>
    %261 = vector.shape_cast %260 : vector<16xf32> to vector<16x1xf32>
    %262 = vector.broadcast %261 : vector<16x1xf32> to vector<16x16xf32>
    %263 = arith.subf %259, %262 : vector<16x16xf32>
    %264 = math.exp %263 : vector<16x16xf32>
    %cst_133 = arith.constant dense<0.000000e+00> : vector<16xf32>
    %265 = vector.multi_reduction <add>, %264, %cst_133 [1] : vector<16x16xf32> to vector<16xf32>
    %266 = vector.shape_cast %265 : vector<16xf32> to vector<16x1xf32>
    %267 = tpu.reciprocal %266 {approx = true} : vector<16x1xf32> -> vector<16x1xf32>
    %268 = vector.broadcast %267 : vector<16x1xf32> to vector<16x16xf32>
    %269 = arith.mulf %264, %268 : vector<16x16xf32>
    %cst_134 = arith.constant dense<0.000000e+00> : vector<16x16xf32>
    %270 = tpu.matmul %269, %256, %cst_134 {dimension_numbers = #tpu.dot_dimension_numbers<[1], [0], [0], [1], [0, 0, 1, 1], [], []>} : vector<16x16xf32>, vector<16x16xf32>, vector<16x16xf32> -> vector<16x16xf32>
    %c16_135 = arith.constant 16 : index
    %c0_136 = arith.constant 0 : index
    %271 = vector.load %arg38[%c16_135, %c0_136] : memref<32x32xf32, #tpu.memory_space<vmem>>, vector<16x16xf32>
    tpu.vector_store %arg38[%c16_135, %c0_136], %270 {strides = array<i32>} : memref<32x32xf32, #tpu.memory_space<vmem>>, vector<16x16xf32>,
    %272 = vector.extract_strided_slice %217 {offsets = [16, 16], sizes = [16, 16], strides = [1, 1]} : vector<32x96xf32> to vector<16x16xf32>
    %273 = vector.extract_strided_slice %217 {offsets = [16, 48], sizes = [16, 16], strides = [1, 1]} : vector<32x96xf32> to vector<16x16xf32>
    %274 = vector.extract_strided_slice %217 {offsets = [16, 80], sizes = [16, 16], strides = [1, 1]} : vector<32x96xf32> to vector<16x16xf32>
    %cst_137 = arith.constant dense<0.000000e+00> : vector<16x16xf32>
    %275 = tpu.matmul %272, %273, %cst_137 {dimension_numbers = #tpu.dot_dimension_numbers<[1], [1], [0], [0], [0, 0, 1, 0], [], []>} : vector<16x16xf32>, vector<16x16xf32>, vector<16x16xf32> -> vector<16x16xf32>
    %cst_138 = arith.constant 2.500000e-01 : f32
    %276 = vector.broadcast %cst_138 : f32 to vector<16x16xf32>
    %277 = arith.mulf %275, %276 : vector<16x16xf32>
    %cst_139 = arith.constant dense<0xFF800000> : vector<16xf32>
    %278 = vector.multi_reduction <maximumf>, %277, %cst_139 [1] : vector<16x16xf32> to vector<16xf32>
    %279 = vector.shape_cast %278 : vector<16xf32> to vector<16x1xf32>
    %280 = vector.broadcast %279 : vector<16x1xf32> to vector<16x16xf32>
    %281 = arith.subf %277, %280 : vector<16x16xf32>
    %282 = math.exp %281 : vector<16x16xf32>
    %cst_140 = arith.constant dense<0.000000e+00> : vector<16xf32>
    %283 = vector.multi_reduction <add>, %282, %cst_140 [1] : vector<16x16xf32> to vector<16xf32>
    %284 = vector.shape_cast %283 : vector<16xf32> to vector<16x1xf32>
    %285 = tpu.reciprocal %284 {approx = true} : vector<16x1xf32> -> vector<16x1xf32>
    %286 = vector.broadcast %285 : vector<16x1xf32> to vector<16x16xf32>
    %287 = arith.mulf %282, %286 : vector<16x16xf32>
    %cst_141 = arith.constant dense<0.000000e+00> : vector<16x16xf32>
    %288 = tpu.matmul %287, %274, %cst_141 {dimension_numbers = #tpu.dot_dimension_numbers<[1], [0], [0], [1], [0, 0, 1, 1], [], []>} : vector<16x16xf32>, vector<16x16xf32>, vector<16x16xf32> -> vector<16x16xf32>
    %c16_142 = arith.constant 16 : index
    %c16_143 = arith.constant 16 : index
    %289 = vector.load %arg38[%c16_142, %c16_143] : memref<32x32xf32, #tpu.memory_space<vmem>>, vector<16x16xf32>
    tpu.vector_store %arg38[%c16_142, %c16_143], %288 {strides = array<i32>} : memref<32x32xf32, #tpu.memory_space<vmem>>, vector<16x16xf32>,
    %c0_144 = arith.constant 0 : index
    %c0_145 = arith.constant 0 : index
    %290 = vector.load %arg38[%c0_144, %c0_145] : memref<32x32xf32, #tpu.memory_space<vmem>>, vector<32x32xf32>
    %c1_146 = arith.constant 1 : index
    %c0_147 = arith.constant 0 : index
    %c0_148 = arith.constant 0 : index
    %291 = vector.load %arg8[%c1_146, %c0_147, %c0_148] : memref<2x32x32xf32, #tpu.memory_space<vmem>>, vector<1x32x32xf32>
    %292 = vector.shape_cast %291 : vector<1x32x32xf32> to vector<32x32xf32>
    %cst_149 = arith.constant dense<0.000000e+00> : vector<32x32xf32>
    %293 = tpu.matmul %290, %292, %cst_149 {dimension_numbers = #tpu.dot_dimension_numbers<[1], [0], [0], [1], [0, 0, 1, 1], [], []>} : vector<32x32xf32>, vector<32x32xf32>, vector<32x32xf32> -> vector<32x32xf32>
    %c1_150 = arith.constant 1 : index
    %c0_151 = arith.constant 0 : index
    %c0_152 = arith.constant 0 : index
    %294 = vector.load %arg9[%c1_150, %c0_151, %c0_152] : memref<2x1x32xf32, #tpu.memory_space<vmem>>, vector<1x1x32xf32>
    %295 = vector.shape_cast %294 : vector<1x1x32xf32> to vector<1x32xf32>
    %296 = vector.broadcast %295 : vector<1x32xf32> to vector<32x32xf32>
    %297 = arith.addf %293, %296 : vector<32x32xf32>
    %298 = arith.addf %210, %297 : vector<32x32xf32>
    %c1_153 = arith.constant 1 : index
    %c0_154 = arith.constant 0 : index
    %c0_155 = arith.constant 0 : index
    %299 = vector.load %arg10[%c1_153, %c0_154, %c0_155] : memref<2x1x32xf32, #tpu.memory_space<vmem>>, vector<1x1x32xf32>
    %300 = vector.shape_cast %299 : vector<1x1x32xf32> to vector<1x32xf32>
    %c1_156 = arith.constant 1 : index
    %c0_157 = arith.constant 0 : index
    %c0_158 = arith.constant 0 : index
    %301 = vector.load %arg11[%c1_156, %c0_157, %c0_158] : memref<2x1x32xf32, #tpu.memory_space<vmem>>, vector<1x1x32xf32>
    %302 = vector.shape_cast %301 : vector<1x1x32xf32> to vector<1x32xf32>
    %cst_159 = arith.constant dense<0.000000e+00> : vector<32xf32>
    %303 = vector.multi_reduction <add>, %298, %cst_159 [1] : vector<32x32xf32> to vector<32xf32>
    %304 = vector.shape_cast %303 : vector<32xf32> to vector<32x1xf32>
    %cst_160 = arith.constant 3.200000e+01 : f32
    %305 = vector.broadcast %cst_160 : f32 to vector<32x1xf32>
    %306 = arith.divf %304, %305 : vector<32x1xf32>
    %307 = vector.broadcast %306 : vector<32x1xf32> to vector<32x32xf32>
    %308 = arith.subf %298, %307 : vector<32x32xf32>
    %309 = arith.mulf %308, %308 : vector<32x32xf32>
    %cst_161 = arith.constant dense<0.000000e+00> : vector<32xf32>
    %310 = vector.multi_reduction <add>, %309, %cst_161 [1] : vector<32x32xf32> to vector<32xf32>
    %311 = vector.shape_cast %310 : vector<32xf32> to vector<32x1xf32>
    %cst_162 = arith.constant 3.200000e+01 : f32
    %312 = vector.broadcast %cst_162 : f32 to vector<32x1xf32>
    %313 = arith.divf %311, %312 : vector<32x1xf32>
    %314 = vector.broadcast %306 : vector<32x1xf32> to vector<32x32xf32>
    %315 = arith.subf %298, %314 : vector<32x32xf32>
    %cst_163 = arith.constant 9.99999974E-6 : f32
    %316 = vector.broadcast %cst_163 : f32 to vector<32x1xf32>
    %317 = arith.addf %313, %316 : vector<32x1xf32>
    %318 = math.rsqrt %317 : vector<32x1xf32>
    %319 = vector.broadcast %318 : vector<32x1xf32> to vector<32x32xf32>
    %320 = arith.mulf %315, %319 : vector<32x32xf32>
    %321 = vector.broadcast %300 : vector<1x32xf32> to vector<32x32xf32>
    %322 = arith.mulf %320, %321 : vector<32x32xf32>
    %323 = vector.broadcast %302 : vector<1x32xf32> to vector<32x32xf32>
    %324 = arith.addf %322, %323 : vector<32x32xf32>
    %c1_164 = arith.constant 1 : index
    %c0_165 = arith.constant 0 : index
    %c0_166 = arith.constant 0 : index
    %325 = vector.load %arg12[%c1_164, %c0_165, %c0_166] : memref<2x32x32xf32, #tpu.memory_space<vmem>>, vector<1x32x32xf32>
    %326 = vector.shape_cast %325 : vector<1x32x32xf32> to vector<32x32xf32>
    %cst_167 = arith.constant dense<0.000000e+00> : vector<32x32xf32>
    %327 = tpu.matmul %324, %326, %cst_167 {dimension_numbers = #tpu.dot_dimension_numbers<[1], [0], [0], [1], [0, 0, 1, 1], [], []>} : vector<32x32xf32>, vector<32x32xf32>, vector<32x32xf32> -> vector<32x32xf32>
    %c1_168 = arith.constant 1 : index
    %c0_169 = arith.constant 0 : index
    %c0_170 = arith.constant 0 : index
    %328 = vector.load %arg13[%c1_168, %c0_169, %c0_170] : memref<2x1x32xf32, #tpu.memory_space<vmem>>, vector<1x1x32xf32>
    %329 = vector.shape_cast %328 : vector<1x1x32xf32> to vector<1x32xf32>
    %330 = vector.broadcast %329 : vector<1x32xf32> to vector<32x32xf32>
    %331 = arith.addf %327, %330 : vector<32x32xf32>
    %cst_171 = arith.constant 5.000000e-01 : f32
    %332 = vector.broadcast %cst_171 : f32 to vector<32x32xf32>
    %333 = arith.mulf %332, %331 : vector<32x32xf32>
    %cst_172 = arith.constant 0.707106769 : f32
    %334 = vector.broadcast %cst_172 : f32 to vector<32x32xf32>
    %335 = arith.mulf %331, %334 : vector<32x32xf32>
    %cst_173 = arith.constant 0.000000e+00 : f32
    %336 = vector.broadcast %cst_173 : f32 to vector<32x32xf32>
    %337 = arith.cmpf oge, %335, %336 : vector<32x32xf32>
    %cst_174 = arith.constant 1.000000e+00 : f32
    %cst_175 = arith.constant -1.000000e+00 : f32
    %338 = vector.broadcast %cst_174 : f32 to vector<32x32xf32>
    %339 = vector.broadcast %cst_175 : f32 to vector<32x32xf32>
    %340 = arith.select %337, %338, %339 : vector<32x32xi1>, vector<32x32xf32>
    %341 = math.absf %335 : vector<32x32xf32>
    %cst_176 = arith.constant 0.327591091 : f32
    %342 = vector.broadcast %cst_176 : f32 to vector<32x32xf32>
    %343 = arith.mulf %342, %341 : vector<32x32xf32>
    %cst_177 = arith.constant 1.000000e+00 : f32
    %344 = vector.broadcast %cst_177 : f32 to vector<32x32xf32>
    %345 = arith.addf %344, %343 : vector<32x32xf32>
    %346 = tpu.reciprocal %345 {approx = true} : vector<32x32xf32> -> vector<32x32xf32>
    %cst_178 = arith.constant 1.06140542 : f32
    %347 = vector.broadcast %cst_178 : f32 to vector<32x32xf32>
    %348 = arith.mulf %347, %346 : vector<32x32xf32>
    %cst_179 = arith.constant -1.45315206 : f32
    %349 = vector.broadcast %cst_179 : f32 to vector<32x32xf32>
    %350 = arith.addf %348, %349 : vector<32x32xf32>
    %351 = arith.mulf %350, %346 : vector<32x32xf32>
    %cst_180 = arith.constant 1.42141378 : f32
    %352 = vector.broadcast %cst_180 : f32 to vector<32x32xf32>
    %353 = arith.addf %351, %352 : vector<32x32xf32>
    %354 = arith.mulf %353, %346 : vector<32x32xf32>
    %cst_181 = arith.constant -0.284496725 : f32
    %355 = vector.broadcast %cst_181 : f32 to vector<32x32xf32>
    %356 = arith.addf %354, %355 : vector<32x32xf32>
    %357 = arith.mulf %356, %346 : vector<32x32xf32>
    %cst_182 = arith.constant 0.254829586 : f32
    %358 = vector.broadcast %cst_182 : f32 to vector<32x32xf32>
    %359 = arith.addf %357, %358 : vector<32x32xf32>
    %360 = arith.mulf %359, %346 : vector<32x32xf32>
    %cst_183 = arith.constant 0.000000e+00 : f32
    %361 = vector.broadcast %cst_183 : f32 to vector<32x32xf32>
    %362 = arith.subf %361, %341 : vector<32x32xf32>
    %363 = arith.mulf %362, %341 : vector<32x32xf32>
    %364 = math.exp %363 : vector<32x32xf32>
    %365 = arith.mulf %360, %364 : vector<32x32xf32>
    %cst_184 = arith.constant 1.000000e+00 : f32
    %366 = vector.broadcast %cst_184 : f32 to vector<32x32xf32>
    %367 = arith.subf %366, %365 : vector<32x32xf32>
    %368 = arith.mulf %340, %367 : vector<32x32xf32>
    %cst_185 = arith.constant 1.000000e+00 : f32
    %369 = vector.broadcast %cst_185 : f32 to vector<32x32xf32>
    %370 = arith.addf %369, %368 : vector<32x32xf32>
    %371 = arith.mulf %333, %370 : vector<32x32xf32>
    %c1_186 = arith.constant 1 : index
    %c0_187 = arith.constant 0 : index
    %c0_188 = arith.constant 0 : index
    %372 = vector.load %arg14[%c1_186, %c0_187, %c0_188] : memref<2x32x32xf32, #tpu.memory_space<vmem>>, vector<1x32x32xf32>
    %373 = vector.shape_cast %372 : vector<1x32x32xf32> to vector<32x32xf32>
    %cst_189 = arith.constant dense<0.000000e+00> : vector<32x32xf32>
    %374 = tpu.matmul %371, %373, %cst_189 {dimension_numbers = #tpu.dot_dimension_numbers<[1], [0], [0], [1], [0, 0, 1, 1], [], []>} : vector<32x32xf32>, vector<32x32xf32>, vector<32x32xf32> -> vector<32x32xf32>
    %c1_190 = arith.constant 1 : index
    %c0_191 = arith.constant 0 : index
    %c0_192 = arith.constant 0 : index
    %375 = vector.load %arg15[%c1_190, %c0_191, %c0_192] : memref<2x1x32xf32, #tpu.memory_space<vmem>>, vector<1x1x32xf32>
    %376 = vector.shape_cast %375 : vector<1x1x32xf32> to vector<1x32xf32>
    %377 = vector.broadcast %376 : vector<1x32xf32> to vector<32x32xf32>
    %378 = arith.addf %374, %377 : vector<32x32xf32>
    %379 = arith.addf %324, %378 : vector<32x32xf32>
    %c1_193 = arith.constant 1 : index
    %c0_194 = arith.constant 0 : index
    %c0_195 = arith.constant 0 : index
    %380 = vector.load %arg16[%c1_193, %c0_194, %c0_195] : memref<2x1x32xf32, #tpu.memory_space<vmem>>, vector<1x1x32xf32>
    %381 = vector.shape_cast %380 : vector<1x1x32xf32> to vector<1x32xf32>
    %c1_196 = arith.constant 1 : index
    %c0_197 = arith.constant 0 : index
    %c0_198 = arith.constant 0 : index
    %382 = vector.load %arg17[%c1_196, %c0_197, %c0_198] : memref<2x1x32xf32, #tpu.memory_space<vmem>>, vector<1x1x32xf32>
    %383 = vector.shape_cast %382 : vector<1x1x32xf32> to vector<1x32xf32>
    %cst_199 = arith.constant dense<0.000000e+00> : vector<32xf32>
    %384 = vector.multi_reduction <add>, %379, %cst_199 [1] : vector<32x32xf32> to vector<32xf32>
    %385 = vector.shape_cast %384 : vector<32xf32> to vector<32x1xf32>
    %cst_200 = arith.constant 3.200000e+01 : f32
    %386 = vector.broadcast %cst_200 : f32 to vector<32x1xf32>
    %387 = arith.divf %385, %386 : vector<32x1xf32>
    %388 = vector.broadcast %387 : vector<32x1xf32> to vector<32x32xf32>
    %389 = arith.subf %379, %388 : vector<32x32xf32>
    %390 = arith.mulf %389, %389 : vector<32x32xf32>
    %cst_201 = arith.constant dense<0.000000e+00> : vector<32xf32>
    %391 = vector.multi_reduction <add>, %390, %cst_201 [1] : vector<32x32xf32> to vector<32xf32>
    %392 = vector.shape_cast %391 : vector<32xf32> to vector<32x1xf32>
    %cst_202 = arith.constant 3.200000e+01 : f32
    %393 = vector.broadcast %cst_202 : f32 to vector<32x1xf32>
    %394 = arith.divf %392, %393 : vector<32x1xf32>
    %395 = vector.broadcast %387 : vector<32x1xf32> to vector<32x32xf32>
    %396 = arith.subf %379, %395 : vector<32x32xf32>
    %cst_203 = arith.constant 9.99999974E-6 : f32
    %397 = vector.broadcast %cst_203 : f32 to vector<32x1xf32>
    %398 = arith.addf %394, %397 : vector<32x1xf32>
    %399 = math.rsqrt %398 : vector<32x1xf32>
    %400 = vector.broadcast %399 : vector<32x1xf32> to vector<32x32xf32>
    %401 = arith.mulf %396, %400 : vector<32x32xf32>
    %402 = vector.broadcast %381 : vector<1x32xf32> to vector<32x32xf32>
    %403 = arith.mulf %401, %402 : vector<32x32xf32>
    %404 = vector.broadcast %383 : vector<1x32xf32> to vector<32x32xf32>
    %405 = arith.addf %403, %404 : vector<32x32xf32>
    %c0_204 = arith.constant 0 : index
    %c0_205 = arith.constant 0 : index
    %c0_206 = arith.constant 0 : index
    %406 = vector.load %arg22[%c0_204, %c0_205, %c0_206] : memref<2x32x96xf32, #tpu.memory_space<vmem>>, vector<1x32x96xf32>
    %407 = vector.shape_cast %406 : vector<1x32x96xf32> to vector<32x96xf32>
    %cst_207 = arith.constant dense<0.000000e+00> : vector<8x96xf32>
    %408 = tpu.matmul %15, %407, %cst_207 {dimension_numbers = #tpu.dot_dimension_numbers<[1], [0], [0], [1], [0, 0, 1, 1], [], []>} : vector<8x32xf32>, vector<32x96xf32>, vector<8x96xf32> -> vector<8x96xf32>
    %c0_208 = arith.constant 0 : index
    %c0_209 = arith.constant 0 : index
    %c0_210 = arith.constant 0 : index
    %409 = vector.load %arg23[%c0_208, %c0_209, %c0_210] : memref<2x1x96xf32, #tpu.memory_space<vmem>>, vector<1x1x96xf32>
    %410 = vector.shape_cast %409 : vector<1x1x96xf32> to vector<1x96xf32>
    %411 = vector.broadcast %410 : vector<1x96xf32> to vector<8x96xf32>
    %412 = arith.addf %408, %411 : vector<8x96xf32>
    %413 = vector.extract_strided_slice %412 {offsets = [0, 0], sizes = [4, 16], strides = [1, 1]} : vector<8x96xf32> to vector<4x16xf32>
    %414 = vector.extract_strided_slice %412 {offsets = [0, 32], sizes = [4, 16], strides = [1, 1]} : vector<8x96xf32> to vector<4x16xf32>
    %415 = vector.extract_strided_slice %412 {offsets = [0, 64], sizes = [4, 16], strides = [1, 1]} : vector<8x96xf32> to vector<4x16xf32>
    %cst_211 = arith.constant dense<0.000000e+00> : vector<4x4xf32>
    %416 = tpu.matmul %413, %414, %cst_211 {dimension_numbers = #tpu.dot_dimension_numbers<[1], [1], [0], [0], [0, 0, 1, 0], [], []>} : vector<4x16xf32>, vector<4x16xf32>, vector<4x4xf32> -> vector<4x4xf32>
    %cst_212 = arith.constant 2.500000e-01 : f32
    %417 = vector.broadcast %cst_212 : f32 to vector<4x4xf32>
    %418 = arith.mulf %416, %417 : vector<4x4xf32>
    %cst_213 = arith.constant dense<0xFF800000> : vector<4xf32>
    %419 = vector.multi_reduction <maximumf>, %418, %cst_213 [1] : vector<4x4xf32> to vector<4xf32>
    %420 = vector.shape_cast %419 : vector<4xf32> to vector<4x1xf32>
    %421 = vector.broadcast %420 : vector<4x1xf32> to vector<4x4xf32>
    %422 = arith.subf %418, %421 : vector<4x4xf32>
    %423 = math.exp %422 : vector<4x4xf32>
    %cst_214 = arith.constant dense<0.000000e+00> : vector<4xf32>
    %424 = vector.multi_reduction <add>, %423, %cst_214 [1] : vector<4x4xf32> to vector<4xf32>
    %425 = vector.shape_cast %424 : vector<4xf32> to vector<4x1xf32>
    %426 = tpu.reciprocal %425 {approx = true} : vector<4x1xf32> -> vector<4x1xf32>
    %427 = vector.broadcast %426 : vector<4x1xf32> to vector<4x4xf32>
    %428 = arith.mulf %423, %427 : vector<4x4xf32>
    %cst_215 = arith.constant dense<0.000000e+00> : vector<4x16xf32>
    %429 = tpu.matmul %428, %415, %cst_215 {dimension_numbers = #tpu.dot_dimension_numbers<[1], [0], [0], [1], [0, 0, 1, 1], [], []>} : vector<4x4xf32>, vector<4x16xf32>, vector<4x16xf32> -> vector<4x16xf32>
    %c0_216 = arith.constant 0 : index
    %c0_217 = arith.constant 0 : index
    %430 = vector.load %arg38[%c0_216, %c0_217] : memref<32x32xf32, #tpu.memory_space<vmem>>, vector<4x16xf32>
    tpu.vector_store %arg38[%c0_216, %c0_217], %429 {strides = array<i32>} : memref<32x32xf32, #tpu.memory_space<vmem>>, vector<4x16xf32>,
    %431 = vector.extract_strided_slice %412 {offsets = [0, 16], sizes = [4, 16], strides = [1, 1]} : vector<8x96xf32> to vector<4x16xf32>
    %432 = vector.extract_strided_slice %412 {offsets = [0, 48], sizes = [4, 16], strides = [1, 1]} : vector<8x96xf32> to vector<4x16xf32>
    %433 = vector.extract_strided_slice %412 {offsets = [0, 80], sizes = [4, 16], strides = [1, 1]} : vector<8x96xf32> to vector<4x16xf32>
    %cst_218 = arith.constant dense<0.000000e+00> : vector<4x4xf32>
    %434 = tpu.matmul %431, %432, %cst_218 {dimension_numbers = #tpu.dot_dimension_numbers<[1], [1], [0], [0], [0, 0, 1, 0], [], []>} : vector<4x16xf32>, vector<4x16xf32>, vector<4x4xf32> -> vector<4x4xf32>
    %cst_219 = arith.constant 2.500000e-01 : f32
    %435 = vector.broadcast %cst_219 : f32 to vector<4x4xf32>
    %436 = arith.mulf %434, %435 : vector<4x4xf32>
    %cst_220 = arith.constant dense<0xFF800000> : vector<4xf32>
    %437 = vector.multi_reduction <maximumf>, %436, %cst_220 [1] : vector<4x4xf32> to vector<4xf32>
    %438 = vector.shape_cast %437 : vector<4xf32> to vector<4x1xf32>
    %439 = vector.broadcast %438 : vector<4x1xf32> to vector<4x4xf32>
    %440 = arith.subf %436, %439 : vector<4x4xf32>
    %441 = math.exp %440 : vector<4x4xf32>
    %cst_221 = arith.constant dense<0.000000e+00> : vector<4xf32>
    %442 = vector.multi_reduction <add>, %441, %cst_221 [1] : vector<4x4xf32> to vector<4xf32>
    %443 = vector.shape_cast %442 : vector<4xf32> to vector<4x1xf32>
    %444 = tpu.reciprocal %443 {approx = true} : vector<4x1xf32> -> vector<4x1xf32>
    %445 = vector.broadcast %444 : vector<4x1xf32> to vector<4x4xf32>
    %446 = arith.mulf %441, %445 : vector<4x4xf32>
    %cst_222 = arith.constant dense<0.000000e+00> : vector<4x16xf32>
    %447 = tpu.matmul %446, %433, %cst_222 {dimension_numbers = #tpu.dot_dimension_numbers<[1], [0], [0], [1], [0, 0, 1, 1], [], []>} : vector<4x4xf32>, vector<4x16xf32>, vector<4x16xf32> -> vector<4x16xf32>
    %c0_223 = arith.constant 0 : index
    %c16_224 = arith.constant 16 : index
    %448 = vector.load %arg38[%c0_223, %c16_224] : memref<32x32xf32, #tpu.memory_space<vmem>>, vector<4x16xf32>
    tpu.vector_store %arg38[%c0_223, %c16_224], %447 {strides = array<i32>} : memref<32x32xf32, #tpu.memory_space<vmem>>, vector<4x16xf32>,
    %449 = vector.extract_strided_slice %412 {offsets = [4, 0], sizes = [4, 16], strides = [1, 1]} : vector<8x96xf32> to vector<4x16xf32>
    %450 = vector.extract_strided_slice %412 {offsets = [4, 32], sizes = [4, 16], strides = [1, 1]} : vector<8x96xf32> to vector<4x16xf32>
    %451 = vector.extract_strided_slice %412 {offsets = [4, 64], sizes = [4, 16], strides = [1, 1]} : vector<8x96xf32> to vector<4x16xf32>
    %cst_225 = arith.constant dense<0.000000e+00> : vector<4x4xf32>
    %452 = tpu.matmul %449, %450, %cst_225 {dimension_numbers = #tpu.dot_dimension_numbers<[1], [1], [0], [0], [0, 0, 1, 0], [], []>} : vector<4x16xf32>, vector<4x16xf32>, vector<4x4xf32> -> vector<4x4xf32>
    %cst_226 = arith.constant 2.500000e-01 : f32
    %453 = vector.broadcast %cst_226 : f32 to vector<4x4xf32>
    %454 = arith.mulf %452, %453 : vector<4x4xf32>
    %cst_227 = arith.constant dense<0xFF800000> : vector<4xf32>
    %455 = vector.multi_reduction <maximumf>, %454, %cst_227 [1] : vector<4x4xf32> to vector<4xf32>
    %456 = vector.shape_cast %455 : vector<4xf32> to vector<4x1xf32>
    %457 = vector.broadcast %456 : vector<4x1xf32> to vector<4x4xf32>
    %458 = arith.subf %454, %457 : vector<4x4xf32>
    %459 = math.exp %458 : vector<4x4xf32>
    %cst_228 = arith.constant dense<0.000000e+00> : vector<4xf32>
    %460 = vector.multi_reduction <add>, %459, %cst_228 [1] : vector<4x4xf32> to vector<4xf32>
    %461 = vector.shape_cast %460 : vector<4xf32> to vector<4x1xf32>
    %462 = tpu.reciprocal %461 {approx = true} : vector<4x1xf32> -> vector<4x1xf32>
    %463 = vector.broadcast %462 : vector<4x1xf32> to vector<4x4xf32>
    %464 = arith.mulf %459, %463 : vector<4x4xf32>
    %cst_229 = arith.constant dense<0.000000e+00> : vector<4x16xf32>
    %465 = tpu.matmul %464, %451, %cst_229 {dimension_numbers = #tpu.dot_dimension_numbers<[1], [0], [0], [1], [0, 0, 1, 1], [], []>} : vector<4x4xf32>, vector<4x16xf32>, vector<4x16xf32> -> vector<4x16xf32>
    %c4 = arith.constant 4 : index
    %c0_230 = arith.constant 0 : index
    %466 = vector.load %arg38[%c4, %c0_230] : memref<32x32xf32, #tpu.memory_space<vmem>>, vector<4x16xf32>
    tpu.vector_store %arg38[%c4, %c0_230], %465 {strides = array<i32>} : memref<32x32xf32, #tpu.memory_space<vmem>>, vector<4x16xf32>,
    %467 = vector.extract_strided_slice %412 {offsets = [4, 16], sizes = [4, 16], strides = [1, 1]} : vector<8x96xf32> to vector<4x16xf32>
    %468 = vector.extract_strided_slice %412 {offsets = [4, 48], sizes = [4, 16], strides = [1, 1]} : vector<8x96xf32> to vector<4x16xf32>
    %469 = vector.extract_strided_slice %412 {offsets = [4, 80], sizes = [4, 16], strides = [1, 1]} : vector<8x96xf32> to vector<4x16xf32>
    %cst_231 = arith.constant dense<0.000000e+00> : vector<4x4xf32>
    %470 = tpu.matmul %467, %468, %cst_231 {dimension_numbers = #tpu.dot_dimension_numbers<[1], [1], [0], [0], [0, 0, 1, 0], [], []>} : vector<4x16xf32>, vector<4x16xf32>, vector<4x4xf32> -> vector<4x4xf32>
    %cst_232 = arith.constant 2.500000e-01 : f32
    %471 = vector.broadcast %cst_232 : f32 to vector<4x4xf32>
    %472 = arith.mulf %470, %471 : vector<4x4xf32>
    %cst_233 = arith.constant dense<0xFF800000> : vector<4xf32>
    %473 = vector.multi_reduction <maximumf>, %472, %cst_233 [1] : vector<4x4xf32> to vector<4xf32>
    %474 = vector.shape_cast %473 : vector<4xf32> to vector<4x1xf32>
    %475 = vector.broadcast %474 : vector<4x1xf32> to vector<4x4xf32>
    %476 = arith.subf %472, %475 : vector<4x4xf32>
    %477 = math.exp %476 : vector<4x4xf32>
    %cst_234 = arith.constant dense<0.000000e+00> : vector<4xf32>
    %478 = vector.multi_reduction <add>, %477, %cst_234 [1] : vector<4x4xf32> to vector<4xf32>
    %479 = vector.shape_cast %478 : vector<4xf32> to vector<4x1xf32>
    %480 = tpu.reciprocal %479 {approx = true} : vector<4x1xf32> -> vector<4x1xf32>
    %481 = vector.broadcast %480 : vector<4x1xf32> to vector<4x4xf32>
    %482 = arith.mulf %477, %481 : vector<4x4xf32>
    %cst_235 = arith.constant dense<0.000000e+00> : vector<4x16xf32>
    %483 = tpu.matmul %482, %469, %cst_235 {dimension_numbers = #tpu.dot_dimension_numbers<[1], [0], [0], [1], [0, 0, 1, 1], [], []>} : vector<4x4xf32>, vector<4x16xf32>, vector<4x16xf32> -> vector<4x16xf32>
    %c4_236 = arith.constant 4 : index
    %c16_237 = arith.constant 16 : index
    %484 = vector.load %arg38[%c4_236, %c16_237] : memref<32x32xf32, #tpu.memory_space<vmem>>, vector<4x16xf32>
    tpu.vector_store %arg38[%c4_236, %c16_237], %483 {strides = array<i32>} : memref<32x32xf32, #tpu.memory_space<vmem>>, vector<4x16xf32>,
    %c0_238 = arith.constant 0 : index
    %c0_239 = arith.constant 0 : index
    %485 = vector.load %arg38[%c0_238, %c0_239] : memref<32x32xf32, #tpu.memory_space<vmem>>, vector<8x32xf32>
    %c0_240 = arith.constant 0 : index
    %c0_241 = arith.constant 0 : index
    %c0_242 = arith.constant 0 : index
    %486 = vector.load %arg24[%c0_240, %c0_241, %c0_242] : memref<2x32x32xf32, #tpu.memory_space<vmem>>, vector<1x32x32xf32>
    %487 = vector.shape_cast %486 : vector<1x32x32xf32> to vector<32x32xf32>
    %cst_243 = arith.constant dense<0.000000e+00> : vector<8x32xf32>
    %488 = tpu.matmul %485, %487, %cst_243 {dimension_numbers = #tpu.dot_dimension_numbers<[1], [0], [0], [1], [0, 0, 1, 1], [], []>} : vector<8x32xf32>, vector<32x32xf32>, vector<8x32xf32> -> vector<8x32xf32>
    %c0_244 = arith.constant 0 : index
    %c0_245 = arith.constant 0 : index
    %c0_246 = arith.constant 0 : index
    %489 = vector.load %arg25[%c0_244, %c0_245, %c0_246] : memref<2x1x32xf32, #tpu.memory_space<vmem>>, vector<1x1x32xf32>
    %490 = vector.shape_cast %489 : vector<1x1x32xf32> to vector<1x32xf32>
    %491 = vector.broadcast %490 : vector<1x32xf32> to vector<8x32xf32>
    %492 = arith.addf %488, %491 : vector<8x32xf32>
    %493 = arith.addf %15, %492 : vector<8x32xf32>
    %c0_247 = arith.constant 0 : index
    %c0_248 = arith.constant 0 : index
    %c0_249 = arith.constant 0 : index
    %494 = vector.load %arg26[%c0_247, %c0_248, %c0_249] : memref<2x1x32xf32, #tpu.memory_space<vmem>>, vector<1x1x32xf32>
    %495 = vector.shape_cast %494 : vector<1x1x32xf32> to vector<1x32xf32>
    %c0_250 = arith.constant 0 : index
    %c0_251 = arith.constant 0 : index
    %c0_252 = arith.constant 0 : index
    %496 = vector.load %arg27[%c0_250, %c0_251, %c0_252] : memref<2x1x32xf32, #tpu.memory_space<vmem>>, vector<1x1x32xf32>
    %497 = vector.shape_cast %496 : vector<1x1x32xf32> to vector<1x32xf32>
    %cst_253 = arith.constant dense<0.000000e+00> : vector<8xf32>
    %498 = vector.multi_reduction <add>, %493, %cst_253 [1] : vector<8x32xf32> to vector<8xf32>
    %499 = vector.shape_cast %498 : vector<8xf32> to vector<8x1xf32>
    %cst_254 = arith.constant 3.200000e+01 : f32
    %500 = vector.broadcast %cst_254 : f32 to vector<8x1xf32>
    %501 = arith.divf %499, %500 : vector<8x1xf32>
    %502 = vector.broadcast %501 : vector<8x1xf32> to vector<8x32xf32>
    %503 = arith.subf %493, %502 : vector<8x32xf32>
    %504 = arith.mulf %503, %503 : vector<8x32xf32>
    %cst_255 = arith.constant dense<0.000000e+00> : vector<8xf32>
    %505 = vector.multi_reduction <add>, %504, %cst_255 [1] : vector<8x32xf32> to vector<8xf32>
    %506 = vector.shape_cast %505 : vector<8xf32> to vector<8x1xf32>
    %cst_256 = arith.constant 3.200000e+01 : f32
    %507 = vector.broadcast %cst_256 : f32 to vector<8x1xf32>
    %508 = arith.divf %506, %507 : vector<8x1xf32>
    %509 = vector.broadcast %501 : vector<8x1xf32> to vector<8x32xf32>
    %510 = arith.subf %493, %509 : vector<8x32xf32>
    %cst_257 = arith.constant 9.99999974E-6 : f32
    %511 = vector.broadcast %cst_257 : f32 to vector<8x1xf32>
    %512 = arith.addf %508, %511 : vector<8x1xf32>
    %513 = math.rsqrt %512 : vector<8x1xf32>
    %514 = vector.broadcast %513 : vector<8x1xf32> to vector<8x32xf32>
    %515 = arith.mulf %510, %514 : vector<8x32xf32>
    %516 = vector.broadcast %495 : vector<1x32xf32> to vector<8x32xf32>
    %517 = arith.mulf %515, %516 : vector<8x32xf32>
    %518 = vector.broadcast %497 : vector<1x32xf32> to vector<8x32xf32>
    %519 = arith.addf %517, %518 : vector<8x32xf32>
    %c0_258 = arith.constant 0 : index
    %c0_259 = arith.constant 0 : index
    %c0_260 = arith.constant 0 : index
    %520 = vector.load %arg28[%c0_258, %c0_259, %c0_260] : memref<2x32x32xf32, #tpu.memory_space<vmem>>, vector<1x32x32xf32>
    %521 = vector.shape_cast %520 : vector<1x32x32xf32> to vector<32x32xf32>
    %cst_261 = arith.constant dense<0.000000e+00> : vector<8x32xf32>
    %522 = tpu.matmul %519, %521, %cst_261 {dimension_numbers = #tpu.dot_dimension_numbers<[1], [0], [0], [1], [0, 0, 1, 1], [], []>} : vector<8x32xf32>, vector<32x32xf32>, vector<8x32xf32> -> vector<8x32xf32>
    %c0_262 = arith.constant 0 : index
    %c0_263 = arith.constant 0 : index
    %c0_264 = arith.constant 0 : index
    %523 = vector.load %arg29[%c0_262, %c0_263, %c0_264] : memref<2x1x32xf32, #tpu.memory_space<vmem>>, vector<1x1x32xf32>
    %524 = vector.shape_cast %523 : vector<1x1x32xf32> to vector<1x32xf32>
    %525 = vector.broadcast %524 : vector<1x32xf32> to vector<8x32xf32>
    %526 = arith.addf %522, %525 : vector<8x32xf32>
    %cst_265 = arith.constant 5.000000e-01 : f32
    %527 = vector.broadcast %cst_265 : f32 to vector<8x32xf32>
    %528 = arith.mulf %527, %526 : vector<8x32xf32>
    %cst_266 = arith.constant 0.707106769 : f32
    %529 = vector.broadcast %cst_266 : f32 to vector<8x32xf32>
    %530 = arith.mulf %526, %529 : vector<8x32xf32>
    %cst_267 = arith.constant 0.000000e+00 : f32
    %531 = vector.broadcast %cst_267 : f32 to vector<8x32xf32>
    %532 = arith.cmpf oge, %530, %531 : vector<8x32xf32>
    %cst_268 = arith.constant 1.000000e+00 : f32
    %cst_269 = arith.constant -1.000000e+00 : f32
    %533 = vector.broadcast %cst_268 : f32 to vector<8x32xf32>
    %534 = vector.broadcast %cst_269 : f32 to vector<8x32xf32>
    %535 = arith.select %532, %533, %534 : vector<8x32xi1>, vector<8x32xf32>
    %536 = math.absf %530 : vector<8x32xf32>
    %cst_270 = arith.constant 0.327591091 : f32
    %537 = vector.broadcast %cst_270 : f32 to vector<8x32xf32>
    %538 = arith.mulf %537, %536 : vector<8x32xf32>
    %cst_271 = arith.constant 1.000000e+00 : f32
    %539 = vector.broadcast %cst_271 : f32 to vector<8x32xf32>
    %540 = arith.addf %539, %538 : vector<8x32xf32>
    %541 = tpu.reciprocal %540 {approx = true} : vector<8x32xf32> -> vector<8x32xf32>
    %cst_272 = arith.constant 1.06140542 : f32
    %542 = vector.broadcast %cst_272 : f32 to vector<8x32xf32>
    %543 = arith.mulf %542, %541 : vector<8x32xf32>
    %cst_273 = arith.constant -1.45315206 : f32
    %544 = vector.broadcast %cst_273 : f32 to vector<8x32xf32>
    %545 = arith.addf %543, %544 : vector<8x32xf32>
    %546 = arith.mulf %545, %541 : vector<8x32xf32>
    %cst_274 = arith.constant 1.42141378 : f32
    %547 = vector.broadcast %cst_274 : f32 to vector<8x32xf32>
    %548 = arith.addf %546, %547 : vector<8x32xf32>
    %549 = arith.mulf %548, %541 : vector<8x32xf32>
    %cst_275 = arith.constant -0.284496725 : f32
    %550 = vector.broadcast %cst_275 : f32 to vector<8x32xf32>
    %551 = arith.addf %549, %550 : vector<8x32xf32>
    %552 = arith.mulf %551, %541 : vector<8x32xf32>
    %cst_276 = arith.constant 0.254829586 : f32
    %553 = vector.broadcast %cst_276 : f32 to vector<8x32xf32>
    %554 = arith.addf %552, %553 : vector<8x32xf32>
    %555 = arith.mulf %554, %541 : vector<8x32xf32>
    %cst_277 = arith.constant 0.000000e+00 : f32
    %556 = vector.broadcast %cst_277 : f32 to vector<8x32xf32>
    %557 = arith.subf %556, %536 : vector<8x32xf32>
    %558 = arith.mulf %557, %536 : vector<8x32xf32>
    %559 = math.exp %558 : vector<8x32xf32>
    %560 = arith.mulf %555, %559 : vector<8x32xf32>
    %cst_278 = arith.constant 1.000000e+00 : f32
    %561 = vector.broadcast %cst_278 : f32 to vector<8x32xf32>
    %562 = arith.subf %561, %560 : vector<8x32xf32>
    %563 = arith.mulf %535, %562 : vector<8x32xf32>
    %cst_279 = arith.constant 1.000000e+00 : f32
    %564 = vector.broadcast %cst_279 : f32 to vector<8x32xf32>
    %565 = arith.addf %564, %563 : vector<8x32xf32>
    %566 = arith.mulf %528, %565 : vector<8x32xf32>
    %c0_280 = arith.constant 0 : index
    %c0_281 = arith.constant 0 : index
    %c0_282 = arith.constant 0 : index
    %567 = vector.load %arg30[%c0_280, %c0_281, %c0_282] : memref<2x32x32xf32, #tpu.memory_space<vmem>>, vector<1x32x32xf32>
    %568 = vector.shape_cast %567 : vector<1x32x32xf32> to vector<32x32xf32>
    %cst_283 = arith.constant dense<0.000000e+00> : vector<8x32xf32>
    %569 = tpu.matmul %566, %568, %cst_283 {dimension_numbers = #tpu.dot_dimension_numbers<[1], [0], [0], [1], [0, 0, 1, 1], [], []>} : vector<8x32xf32>, vector<32x32xf32>, vector<8x32xf32> -> vector<8x32xf32>
    %c0_284 = arith.constant 0 : index
    %c0_285 = arith.constant 0 : index
    %c0_286 = arith.constant 0 : index
    %570 = vector.load %arg31[%c0_284, %c0_285, %c0_286] : memref<2x1x32xf32, #tpu.memory_space<vmem>>, vector<1x1x32xf32>
    %571 = vector.shape_cast %570 : vector<1x1x32xf32> to vector<1x32xf32>
    %572 = vector.broadcast %571 : vector<1x32xf32> to vector<8x32xf32>
    %573 = arith.addf %569, %572 : vector<8x32xf32>
    %574 = arith.addf %519, %573 : vector<8x32xf32>
    %c0_287 = arith.constant 0 : index
    %c0_288 = arith.constant 0 : index
    %c0_289 = arith.constant 0 : index
    %575 = vector.load %arg32[%c0_287, %c0_288, %c0_289] : memref<2x1x32xf32, #tpu.memory_space<vmem>>, vector<1x1x32xf32>
    %576 = vector.shape_cast %575 : vector<1x1x32xf32> to vector<1x32xf32>
    %c0_290 = arith.constant 0 : index
    %c0_291 = arith.constant 0 : index
    %c0_292 = arith.constant 0 : index
    %577 = vector.load %arg33[%c0_290, %c0_291, %c0_292] : memref<2x1x32xf32, #tpu.memory_space<vmem>>, vector<1x1x32xf32>
    %578 = vector.shape_cast %577 : vector<1x1x32xf32> to vector<1x32xf32>
    %cst_293 = arith.constant dense<0.000000e+00> : vector<8xf32>
    %579 = vector.multi_reduction <add>, %574, %cst_293 [1] : vector<8x32xf32> to vector<8xf32>
    %580 = vector.shape_cast %579 : vector<8xf32> to vector<8x1xf32>
    %cst_294 = arith.constant 3.200000e+01 : f32
    %581 = vector.broadcast %cst_294 : f32 to vector<8x1xf32>
    %582 = arith.divf %580, %581 : vector<8x1xf32>
    %583 = vector.broadcast %582 : vector<8x1xf32> to vector<8x32xf32>
    %584 = arith.subf %574, %583 : vector<8x32xf32>
    %585 = arith.mulf %584, %584 : vector<8x32xf32>
    %cst_295 = arith.constant dense<0.000000e+00> : vector<8xf32>
    %586 = vector.multi_reduction <add>, %585, %cst_295 [1] : vector<8x32xf32> to vector<8xf32>
    %587 = vector.shape_cast %586 : vector<8xf32> to vector<8x1xf32>
    %cst_296 = arith.constant 3.200000e+01 : f32
    %588 = vector.broadcast %cst_296 : f32 to vector<8x1xf32>
    %589 = arith.divf %587, %588 : vector<8x1xf32>
    %590 = vector.broadcast %582 : vector<8x1xf32> to vector<8x32xf32>
    %591 = arith.subf %574, %590 : vector<8x32xf32>
    %cst_297 = arith.constant 9.99999974E-6 : f32
    %592 = vector.broadcast %cst_297 : f32 to vector<8x1xf32>
    %593 = arith.addf %589, %592 : vector<8x1xf32>
    %594 = math.rsqrt %593 : vector<8x1xf32>
    %595 = vector.broadcast %594 : vector<8x1xf32> to vector<8x32xf32>
    %596 = arith.mulf %591, %595 : vector<8x32xf32>
    %597 = vector.broadcast %576 : vector<1x32xf32> to vector<8x32xf32>
    %598 = arith.mulf %596, %597 : vector<8x32xf32>
    %599 = vector.broadcast %578 : vector<1x32xf32> to vector<8x32xf32>
    %600 = arith.addf %598, %599 : vector<8x32xf32>
    %c1_298 = arith.constant 1 : index
    %c0_299 = arith.constant 0 : index
    %c0_300 = arith.constant 0 : index
    %601 = vector.load %arg22[%c1_298, %c0_299, %c0_300] : memref<2x32x96xf32, #tpu.memory_space<vmem>>, vector<1x32x96xf32>
    %602 = vector.shape_cast %601 : vector<1x32x96xf32> to vector<32x96xf32>
    %cst_301 = arith.constant dense<0.000000e+00> : vector<8x96xf32>
    %603 = tpu.matmul %600, %602, %cst_301 {dimension_numbers = #tpu.dot_dimension_numbers<[1], [0], [0], [1], [0, 0, 1, 1], [], []>} : vector<8x32xf32>, vector<32x96xf32>, vector<8x96xf32> -> vector<8x96xf32>
    %c1_302 = arith.constant 1 : index
    %c0_303 = arith.constant 0 : index
    %c0_304 = arith.constant 0 : index
    %604 = vector.load %arg23[%c1_302, %c0_303, %c0_304] : memref<2x1x96xf32, #tpu.memory_space<vmem>>, vector<1x1x96xf32>
    %605 = vector.shape_cast %604 : vector<1x1x96xf32> to vector<1x96xf32>
    %606 = vector.broadcast %605 : vector<1x96xf32> to vector<8x96xf32>
    %607 = arith.addf %603, %606 : vector<8x96xf32>
    %608 = vector.extract_strided_slice %607 {offsets = [0, 0], sizes = [4, 16], strides = [1, 1]} : vector<8x96xf32> to vector<4x16xf32>
    %609 = vector.extract_strided_slice %607 {offsets = [0, 32], sizes = [4, 16], strides = [1, 1]} : vector<8x96xf32> to vector<4x16xf32>
    %610 = vector.extract_strided_slice %607 {offsets = [0, 64], sizes = [4, 16], strides = [1, 1]} : vector<8x96xf32> to vector<4x16xf32>
    %cst_305 = arith.constant dense<0.000000e+00> : vector<4x4xf32>
    %611 = tpu.matmul %608, %609, %cst_305 {dimension_numbers = #tpu.dot_dimension_numbers<[1], [1], [0], [0], [0, 0, 1, 0], [], []>} : vector<4x16xf32>, vector<4x16xf32>, vector<4x4xf32> -> vector<4x4xf32>
    %cst_306 = arith.constant 2.500000e-01 : f32
    %612 = vector.broadcast %cst_306 : f32 to vector<4x4xf32>
    %613 = arith.mulf %611, %612 : vector<4x4xf32>
    %cst_307 = arith.constant dense<0xFF800000> : vector<4xf32>
    %614 = vector.multi_reduction <maximumf>, %613, %cst_307 [1] : vector<4x4xf32> to vector<4xf32>
    %615 = vector.shape_cast %614 : vector<4xf32> to vector<4x1xf32>
    %616 = vector.broadcast %615 : vector<4x1xf32> to vector<4x4xf32>
    %617 = arith.subf %613, %616 : vector<4x4xf32>
    %618 = math.exp %617 : vector<4x4xf32>
    %cst_308 = arith.constant dense<0.000000e+00> : vector<4xf32>
    %619 = vector.multi_reduction <add>, %618, %cst_308 [1] : vector<4x4xf32> to vector<4xf32>
    %620 = vector.shape_cast %619 : vector<4xf32> to vector<4x1xf32>
    %621 = tpu.reciprocal %620 {approx = true} : vector<4x1xf32> -> vector<4x1xf32>
    %622 = vector.broadcast %621 : vector<4x1xf32> to vector<4x4xf32>
    %623 = arith.mulf %618, %622 : vector<4x4xf32>
    %cst_309 = arith.constant dense<0.000000e+00> : vector<4x16xf32>
    %624 = tpu.matmul %623, %610, %cst_309 {dimension_numbers = #tpu.dot_dimension_numbers<[1], [0], [0], [1], [0, 0, 1, 1], [], []>} : vector<4x4xf32>, vector<4x16xf32>, vector<4x16xf32> -> vector<4x16xf32>
    %c0_310 = arith.constant 0 : index
    %c0_311 = arith.constant 0 : index
    %625 = vector.load %arg38[%c0_310, %c0_311] : memref<32x32xf32, #tpu.memory_space<vmem>>, vector<4x16xf32>
    tpu.vector_store %arg38[%c0_310, %c0_311], %624 {strides = array<i32>} : memref<32x32xf32, #tpu.memory_space<vmem>>, vector<4x16xf32>,
    %626 = vector.extract_strided_slice %607 {offsets = [0, 16], sizes = [4, 16], strides = [1, 1]} : vector<8x96xf32> to vector<4x16xf32>
    %627 = vector.extract_strided_slice %607 {offsets = [0, 48], sizes = [4, 16], strides = [1, 1]} : vector<8x96xf32> to vector<4x16xf32>
    %628 = vector.extract_strided_slice %607 {offsets = [0, 80], sizes = [4, 16], strides = [1, 1]} : vector<8x96xf32> to vector<4x16xf32>
    %cst_312 = arith.constant dense<0.000000e+00> : vector<4x4xf32>
    %629 = tpu.matmul %626, %627, %cst_312 {dimension_numbers = #tpu.dot_dimension_numbers<[1], [1], [0], [0], [0, 0, 1, 0], [], []>} : vector<4x16xf32>, vector<4x16xf32>, vector<4x4xf32> -> vector<4x4xf32>
    %cst_313 = arith.constant 2.500000e-01 : f32
    %630 = vector.broadcast %cst_313 : f32 to vector<4x4xf32>
    %631 = arith.mulf %629, %630 : vector<4x4xf32>
    %cst_314 = arith.constant dense<0xFF800000> : vector<4xf32>
    %632 = vector.multi_reduction <maximumf>, %631, %cst_314 [1] : vector<4x4xf32> to vector<4xf32>
    %633 = vector.shape_cast %632 : vector<4xf32> to vector<4x1xf32>
    %634 = vector.broadcast %633 : vector<4x1xf32> to vector<4x4xf32>
    %635 = arith.subf %631, %634 : vector<4x4xf32>
    %636 = math.exp %635 : vector<4x4xf32>
    %cst_315 = arith.constant dense<0.000000e+00> : vector<4xf32>
    %637 = vector.multi_reduction <add>, %636, %cst_315 [1] : vector<4x4xf32> to vector<4xf32>
    %638 = vector.shape_cast %637 : vector<4xf32> to vector<4x1xf32>
    %639 = tpu.reciprocal %638 {approx = true} : vector<4x1xf32> -> vector<4x1xf32>
    %640 = vector.broadcast %639 : vector<4x1xf32> to vector<4x4xf32>
    %641 = arith.mulf %636, %640 : vector<4x4xf32>
    %cst_316 = arith.constant dense<0.000000e+00> : vector<4x16xf32>
    %642 = tpu.matmul %641, %628, %cst_316 {dimension_numbers = #tpu.dot_dimension_numbers<[1], [0], [0], [1], [0, 0, 1, 1], [], []>} : vector<4x4xf32>, vector<4x16xf32>, vector<4x16xf32> -> vector<4x16xf32>
    %c0_317 = arith.constant 0 : index
    %c16_318 = arith.constant 16 : index
    %643 = vector.load %arg38[%c0_317, %c16_318] : memref<32x32xf32, #tpu.memory_space<vmem>>, vector<4x16xf32>
    tpu.vector_store %arg38[%c0_317, %c16_318], %642 {strides = array<i32>} : memref<32x32xf32, #tpu.memory_space<vmem>>, vector<4x16xf32>,
    %644 = vector.extract_strided_slice %607 {offsets = [4, 0], sizes = [4, 16], strides = [1, 1]} : vector<8x96xf32> to vector<4x16xf32>
    %645 = vector.extract_strided_slice %607 {offsets = [4, 32], sizes = [4, 16], strides = [1, 1]} : vector<8x96xf32> to vector<4x16xf32>
    %646 = vector.extract_strided_slice %607 {offsets = [4, 64], sizes = [4, 16], strides = [1, 1]} : vector<8x96xf32> to vector<4x16xf32>
    %cst_319 = arith.constant dense<0.000000e+00> : vector<4x4xf32>
    %647 = tpu.matmul %644, %645, %cst_319 {dimension_numbers = #tpu.dot_dimension_numbers<[1], [1], [0], [0], [0, 0, 1, 0], [], []>} : vector<4x16xf32>, vector<4x16xf32>, vector<4x4xf32> -> vector<4x4xf32>
    %cst_320 = arith.constant 2.500000e-01 : f32
    %648 = vector.broadcast %cst_320 : f32 to vector<4x4xf32>
    %649 = arith.mulf %647, %648 : vector<4x4xf32>
    %cst_321 = arith.constant dense<0xFF800000> : vector<4xf32>
    %650 = vector.multi_reduction <maximumf>, %649, %cst_321 [1] : vector<4x4xf32> to vector<4xf32>
    %651 = vector.shape_cast %650 : vector<4xf32> to vector<4x1xf32>
    %652 = vector.broadcast %651 : vector<4x1xf32> to vector<4x4xf32>
    %653 = arith.subf %649, %652 : vector<4x4xf32>
    %654 = math.exp %653 : vector<4x4xf32>
    %cst_322 = arith.constant dense<0.000000e+00> : vector<4xf32>
    %655 = vector.multi_reduction <add>, %654, %cst_322 [1] : vector<4x4xf32> to vector<4xf32>
    %656 = vector.shape_cast %655 : vector<4xf32> to vector<4x1xf32>
    %657 = tpu.reciprocal %656 {approx = true} : vector<4x1xf32> -> vector<4x1xf32>
    %658 = vector.broadcast %657 : vector<4x1xf32> to vector<4x4xf32>
    %659 = arith.mulf %654, %658 : vector<4x4xf32>
    %cst_323 = arith.constant dense<0.000000e+00> : vector<4x16xf32>
    %660 = tpu.matmul %659, %646, %cst_323 {dimension_numbers = #tpu.dot_dimension_numbers<[1], [0], [0], [1], [0, 0, 1, 1], [], []>} : vector<4x4xf32>, vector<4x16xf32>, vector<4x16xf32> -> vector<4x16xf32>
    %c4_324 = arith.constant 4 : index
    %c0_325 = arith.constant 0 : index
    %661 = vector.load %arg38[%c4_324, %c0_325] : memref<32x32xf32, #tpu.memory_space<vmem>>, vector<4x16xf32>
    tpu.vector_store %arg38[%c4_324, %c0_325], %660 {strides = array<i32>} : memref<32x32xf32, #tpu.memory_space<vmem>>, vector<4x16xf32>,
    %662 = vector.extract_strided_slice %607 {offsets = [4, 16], sizes = [4, 16], strides = [1, 1]} : vector<8x96xf32> to vector<4x16xf32>
    %663 = vector.extract_strided_slice %607 {offsets = [4, 48], sizes = [4, 16], strides = [1, 1]} : vector<8x96xf32> to vector<4x16xf32>
    %664 = vector.extract_strided_slice %607 {offsets = [4, 80], sizes = [4, 16], strides = [1, 1]} : vector<8x96xf32> to vector<4x16xf32>
    %cst_326 = arith.constant dense<0.000000e+00> : vector<4x4xf32>
    %665 = tpu.matmul %662, %663, %cst_326 {dimension_numbers = #tpu.dot_dimension_numbers<[1], [1], [0], [0], [0, 0, 1, 0], [], []>} : vector<4x16xf32>, vector<4x16xf32>, vector<4x4xf32> -> vector<4x4xf32>
    %cst_327 = arith.constant 2.500000e-01 : f32
    %666 = vector.broadcast %cst_327 : f32 to vector<4x4xf32>
    %667 = arith.mulf %665, %666 : vector<4x4xf32>
    %cst_328 = arith.constant dense<0xFF800000> : vector<4xf32>
    %668 = vector.multi_reduction <maximumf>, %667, %cst_328 [1] : vector<4x4xf32> to vector<4xf32>
    %669 = vector.shape_cast %668 : vector<4xf32> to vector<4x1xf32>
    %670 = vector.broadcast %669 : vector<4x1xf32> to vector<4x4xf32>
    %671 = arith.subf %667, %670 : vector<4x4xf32>
    %672 = math.exp %671 : vector<4x4xf32>
    %cst_329 = arith.constant dense<0.000000e+00> : vector<4xf32>
    %673 = vector.multi_reduction <add>, %672, %cst_329 [1] : vector<4x4xf32> to vector<4xf32>
    %674 = vector.shape_cast %673 : vector<4xf32> to vector<4x1xf32>
    %675 = tpu.reciprocal %674 {approx = true} : vector<4x1xf32> -> vector<4x1xf32>
    %676 = vector.broadcast %675 : vector<4x1xf32> to vector<4x4xf32>
    %677 = arith.mulf %672, %676 : vector<4x4xf32>
    %cst_330 = arith.constant dense<0.000000e+00> : vector<4x16xf32>
    %678 = tpu.matmul %677, %664, %cst_330 {dimension_numbers = #tpu.dot_dimension_numbers<[1], [0], [0], [1], [0, 0, 1, 1], [], []>} : vector<4x4xf32>, vector<4x16xf32>, vector<4x16xf32> -> vector<4x16xf32>
    %c4_331 = arith.constant 4 : index
    %c16_332 = arith.constant 16 : index
    %679 = vector.load %arg38[%c4_331, %c16_332] : memref<32x32xf32, #tpu.memory_space<vmem>>, vector<4x16xf32>
    tpu.vector_store %arg38[%c4_331, %c16_332], %678 {strides = array<i32>} : memref<32x32xf32, #tpu.memory_space<vmem>>, vector<4x16xf32>,
    %c0_333 = arith.constant 0 : index
    %c0_334 = arith.constant 0 : index
    %680 = vector.load %arg38[%c0_333, %c0_334] : memref<32x32xf32, #tpu.memory_space<vmem>>, vector<8x32xf32>
    %c1_335 = arith.constant 1 : index
    %c0_336 = arith.constant 0 : index
    %c0_337 = arith.constant 0 : index
    %681 = vector.load %arg24[%c1_335, %c0_336, %c0_337] : memref<2x32x32xf32, #tpu.memory_space<vmem>>, vector<1x32x32xf32>
    %682 = vector.shape_cast %681 : vector<1x32x32xf32> to vector<32x32xf32>
    %cst_338 = arith.constant dense<0.000000e+00> : vector<8x32xf32>
    %683 = tpu.matmul %680, %682, %cst_338 {dimension_numbers = #tpu.dot_dimension_numbers<[1], [0], [0], [1], [0, 0, 1, 1], [], []>} : vector<8x32xf32>, vector<32x32xf32>, vector<8x32xf32> -> vector<8x32xf32>
    %c1_339 = arith.constant 1 : index
    %c0_340 = arith.constant 0 : index
    %c0_341 = arith.constant 0 : index
    %684 = vector.load %arg25[%c1_339, %c0_340, %c0_341] : memref<2x1x32xf32, #tpu.memory_space<vmem>>, vector<1x1x32xf32>
    %685 = vector.shape_cast %684 : vector<1x1x32xf32> to vector<1x32xf32>
    %686 = vector.broadcast %685 : vector<1x32xf32> to vector<8x32xf32>
    %687 = arith.addf %683, %686 : vector<8x32xf32>
    %688 = arith.addf %600, %687 : vector<8x32xf32>
    %c1_342 = arith.constant 1 : index
    %c0_343 = arith.constant 0 : index
    %c0_344 = arith.constant 0 : index
    %689 = vector.load %arg26[%c1_342, %c0_343, %c0_344] : memref<2x1x32xf32, #tpu.memory_space<vmem>>, vector<1x1x32xf32>
    %690 = vector.shape_cast %689 : vector<1x1x32xf32> to vector<1x32xf32>
    %c1_345 = arith.constant 1 : index
    %c0_346 = arith.constant 0 : index
    %c0_347 = arith.constant 0 : index
    %691 = vector.load %arg27[%c1_345, %c0_346, %c0_347] : memref<2x1x32xf32, #tpu.memory_space<vmem>>, vector<1x1x32xf32>
    %692 = vector.shape_cast %691 : vector<1x1x32xf32> to vector<1x32xf32>
    %cst_348 = arith.constant dense<0.000000e+00> : vector<8xf32>
    %693 = vector.multi_reduction <add>, %688, %cst_348 [1] : vector<8x32xf32> to vector<8xf32>
    %694 = vector.shape_cast %693 : vector<8xf32> to vector<8x1xf32>
    %cst_349 = arith.constant 3.200000e+01 : f32
    %695 = vector.broadcast %cst_349 : f32 to vector<8x1xf32>
    %696 = arith.divf %694, %695 : vector<8x1xf32>
    %697 = vector.broadcast %696 : vector<8x1xf32> to vector<8x32xf32>
    %698 = arith.subf %688, %697 : vector<8x32xf32>
    %699 = arith.mulf %698, %698 : vector<8x32xf32>
    %cst_350 = arith.constant dense<0.000000e+00> : vector<8xf32>
    %700 = vector.multi_reduction <add>, %699, %cst_350 [1] : vector<8x32xf32> to vector<8xf32>
    %701 = vector.shape_cast %700 : vector<8xf32> to vector<8x1xf32>
    %cst_351 = arith.constant 3.200000e+01 : f32
    %702 = vector.broadcast %cst_351 : f32 to vector<8x1xf32>
    %703 = arith.divf %701, %702 : vector<8x1xf32>
    %704 = vector.broadcast %696 : vector<8x1xf32> to vector<8x32xf32>
    %705 = arith.subf %688, %704 : vector<8x32xf32>
    %cst_352 = arith.constant 9.99999974E-6 : f32
    %706 = vector.broadcast %cst_352 : f32 to vector<8x1xf32>
    %707 = arith.addf %703, %706 : vector<8x1xf32>
    %708 = math.rsqrt %707 : vector<8x1xf32>
    %709 = vector.broadcast %708 : vector<8x1xf32> to vector<8x32xf32>
    %710 = arith.mulf %705, %709 : vector<8x32xf32>
    %711 = vector.broadcast %690 : vector<1x32xf32> to vector<8x32xf32>
    %712 = arith.mulf %710, %711 : vector<8x32xf32>
    %713 = vector.broadcast %692 : vector<1x32xf32> to vector<8x32xf32>
    %714 = arith.addf %712, %713 : vector<8x32xf32>
    %c1_353 = arith.constant 1 : index
    %c0_354 = arith.constant 0 : index
    %c0_355 = arith.constant 0 : index
    %715 = vector.load %arg28[%c1_353, %c0_354, %c0_355] : memref<2x32x32xf32, #tpu.memory_space<vmem>>, vector<1x32x32xf32>
    %716 = vector.shape_cast %715 : vector<1x32x32xf32> to vector<32x32xf32>
    %cst_356 = arith.constant dense<0.000000e+00> : vector<8x32xf32>
    %717 = tpu.matmul %714, %716, %cst_356 {dimension_numbers = #tpu.dot_dimension_numbers<[1], [0], [0], [1], [0, 0, 1, 1], [], []>} : vector<8x32xf32>, vector<32x32xf32>, vector<8x32xf32> -> vector<8x32xf32>
    %c1_357 = arith.constant 1 : index
    %c0_358 = arith.constant 0 : index
    %c0_359 = arith.constant 0 : index
    %718 = vector.load %arg29[%c1_357, %c0_358, %c0_359] : memref<2x1x32xf32, #tpu.memory_space<vmem>>, vector<1x1x32xf32>
    %719 = vector.shape_cast %718 : vector<1x1x32xf32> to vector<1x32xf32>
    %720 = vector.broadcast %719 : vector<1x32xf32> to vector<8x32xf32>
    %721 = arith.addf %717, %720 : vector<8x32xf32>
    %cst_360 = arith.constant 5.000000e-01 : f32
    %722 = vector.broadcast %cst_360 : f32 to vector<8x32xf32>
    %723 = arith.mulf %722, %721 : vector<8x32xf32>
    %cst_361 = arith.constant 0.707106769 : f32
    %724 = vector.broadcast %cst_361 : f32 to vector<8x32xf32>
    %725 = arith.mulf %721, %724 : vector<8x32xf32>
    %cst_362 = arith.constant 0.000000e+00 : f32
    %726 = vector.broadcast %cst_362 : f32 to vector<8x32xf32>
    %727 = arith.cmpf oge, %725, %726 : vector<8x32xf32>
    %cst_363 = arith.constant 1.000000e+00 : f32
    %cst_364 = arith.constant -1.000000e+00 : f32
    %728 = vector.broadcast %cst_363 : f32 to vector<8x32xf32>
    %729 = vector.broadcast %cst_364 : f32 to vector<8x32xf32>
    %730 = arith.select %727, %728, %729 : vector<8x32xi1>, vector<8x32xf32>
    %731 = math.absf %725 : vector<8x32xf32>
    %cst_365 = arith.constant 0.327591091 : f32
    %732 = vector.broadcast %cst_365 : f32 to vector<8x32xf32>
    %733 = arith.mulf %732, %731 : vector<8x32xf32>
    %cst_366 = arith.constant 1.000000e+00 : f32
    %734 = vector.broadcast %cst_366 : f32 to vector<8x32xf32>
    %735 = arith.addf %734, %733 : vector<8x32xf32>
    %736 = tpu.reciprocal %735 {approx = true} : vector<8x32xf32> -> vector<8x32xf32>
    %cst_367 = arith.constant 1.06140542 : f32
    %737 = vector.broadcast %cst_367 : f32 to vector<8x32xf32>
    %738 = arith.mulf %737, %736 : vector<8x32xf32>
    %cst_368 = arith.constant -1.45315206 : f32
    %739 = vector.broadcast %cst_368 : f32 to vector<8x32xf32>
    %740 = arith.addf %738, %739 : vector<8x32xf32>
    %741 = arith.mulf %740, %736 : vector<8x32xf32>
    %cst_369 = arith.constant 1.42141378 : f32
    %742 = vector.broadcast %cst_369 : f32 to vector<8x32xf32>
    %743 = arith.addf %741, %742 : vector<8x32xf32>
    %744 = arith.mulf %743, %736 : vector<8x32xf32>
    %cst_370 = arith.constant -0.284496725 : f32
    %745 = vector.broadcast %cst_370 : f32 to vector<8x32xf32>
    %746 = arith.addf %744, %745 : vector<8x32xf32>
    %747 = arith.mulf %746, %736 : vector<8x32xf32>
    %cst_371 = arith.constant 0.254829586 : f32
    %748 = vector.broadcast %cst_371 : f32 to vector<8x32xf32>
    %749 = arith.addf %747, %748 : vector<8x32xf32>
    %750 = arith.mulf %749, %736 : vector<8x32xf32>
    %cst_372 = arith.constant 0.000000e+00 : f32
    %751 = vector.broadcast %cst_372 : f32 to vector<8x32xf32>
    %752 = arith.subf %751, %731 : vector<8x32xf32>
    %753 = arith.mulf %752, %731 : vector<8x32xf32>
    %754 = math.exp %753 : vector<8x32xf32>
    %755 = arith.mulf %750, %754 : vector<8x32xf32>
    %cst_373 = arith.constant 1.000000e+00 : f32
    %756 = vector.broadcast %cst_373 : f32 to vector<8x32xf32>
    %757 = arith.subf %756, %755 : vector<8x32xf32>
    %758 = arith.mulf %730, %757 : vector<8x32xf32>
    %cst_374 = arith.constant 1.000000e+00 : f32
    %759 = vector.broadcast %cst_374 : f32 to vector<8x32xf32>
    %760 = arith.addf %759, %758 : vector<8x32xf32>
    %761 = arith.mulf %723, %760 : vector<8x32xf32>
    %c1_375 = arith.constant 1 : index
    %c0_376 = arith.constant 0 : index
    %c0_377 = arith.constant 0 : index
    %762 = vector.load %arg30[%c1_375, %c0_376, %c0_377] : memref<2x32x32xf32, #tpu.memory_space<vmem>>, vector<1x32x32xf32>
    %763 = vector.shape_cast %762 : vector<1x32x32xf32> to vector<32x32xf32>
    %cst_378 = arith.constant dense<0.000000e+00> : vector<8x32xf32>
    %764 = tpu.matmul %761, %763, %cst_378 {dimension_numbers = #tpu.dot_dimension_numbers<[1], [0], [0], [1], [0, 0, 1, 1], [], []>} : vector<8x32xf32>, vector<32x32xf32>, vector<8x32xf32> -> vector<8x32xf32>
    %c1_379 = arith.constant 1 : index
    %c0_380 = arith.constant 0 : index
    %c0_381 = arith.constant 0 : index
    %765 = vector.load %arg31[%c1_379, %c0_380, %c0_381] : memref<2x1x32xf32, #tpu.memory_space<vmem>>, vector<1x1x32xf32>
    %766 = vector.shape_cast %765 : vector<1x1x32xf32> to vector<1x32xf32>
    %767 = vector.broadcast %766 : vector<1x32xf32> to vector<8x32xf32>
    %768 = arith.addf %764, %767 : vector<8x32xf32>
    %769 = arith.addf %714, %768 : vector<8x32xf32>
    %c1_382 = arith.constant 1 : index
    %c0_383 = arith.constant 0 : index
    %c0_384 = arith.constant 0 : index
    %770 = vector.load %arg32[%c1_382, %c0_383, %c0_384] : memref<2x1x32xf32, #tpu.memory_space<vmem>>, vector<1x1x32xf32>
    %771 = vector.shape_cast %770 : vector<1x1x32xf32> to vector<1x32xf32>
    %c1_385 = arith.constant 1 : index
    %c0_386 = arith.constant 0 : index
    %c0_387 = arith.constant 0 : index
    %772 = vector.load %arg33[%c1_385, %c0_386, %c0_387] : memref<2x1x32xf32, #tpu.memory_space<vmem>>, vector<1x1x32xf32>
    %773 = vector.shape_cast %772 : vector<1x1x32xf32> to vector<1x32xf32>
    %cst_388 = arith.constant dense<0.000000e+00> : vector<8xf32>
    %774 = vector.multi_reduction <add>, %769, %cst_388 [1] : vector<8x32xf32> to vector<8xf32>
    %775 = vector.shape_cast %774 : vector<8xf32> to vector<8x1xf32>
    %cst_389 = arith.constant 3.200000e+01 : f32
    %776 = vector.broadcast %cst_389 : f32 to vector<8x1xf32>
    %777 = arith.divf %775, %776 : vector<8x1xf32>
    %778 = vector.broadcast %777 : vector<8x1xf32> to vector<8x32xf32>
    %779 = arith.subf %769, %778 : vector<8x32xf32>
    %780 = arith.mulf %779, %779 : vector<8x32xf32>
    %cst_390 = arith.constant dense<0.000000e+00> : vector<8xf32>
    %781 = vector.multi_reduction <add>, %780, %cst_390 [1] : vector<8x32xf32> to vector<8xf32>
    %782 = vector.shape_cast %781 : vector<8xf32> to vector<8x1xf32>
    %cst_391 = arith.constant 3.200000e+01 : f32
    %783 = vector.broadcast %cst_391 : f32 to vector<8x1xf32>
    %784 = arith.divf %782, %783 : vector<8x1xf32>
    %785 = vector.broadcast %777 : vector<8x1xf32> to vector<8x32xf32>
    %786 = arith.subf %769, %785 : vector<8x32xf32>
    %cst_392 = arith.constant 9.99999974E-6 : f32
    %787 = vector.broadcast %cst_392 : f32 to vector<8x1xf32>
    %788 = arith.addf %784, %787 : vector<8x1xf32>
    %789 = math.rsqrt %788 : vector<8x1xf32>
    %790 = vector.broadcast %789 : vector<8x1xf32> to vector<8x32xf32>
    %791 = arith.mulf %786, %790 : vector<8x32xf32>
    %792 = vector.broadcast %771 : vector<1x32xf32> to vector<8x32xf32>
    %793 = arith.mulf %791, %792 : vector<8x32xf32>
    %794 = vector.broadcast %773 : vector<1x32xf32> to vector<8x32xf32>
    %795 = arith.addf %793, %794 : vector<8x32xf32>
    %c0_393 = arith.constant 0 : index
    %c0_394 = arith.constant 0 : index
    %796 = vector.load %arg36[%c0_393, %c0_394] : memref<1x3xf32, #tpu.memory_space<vmem>>, vector<1x3xf32>
    %797 = vector.extract_strided_slice %796 {offsets = [0, 0], sizes = [1, 1], strides = [1, 1]} : vector<1x3xf32> to vector<1x1xf32>
    %798 = vector.extract_strided_slice %796 {offsets = [0, 1], sizes = [1, 1], strides = [1, 1]} : vector<1x3xf32> to vector<1x1xf32>
    %799 = vector.extract_strided_slice %796 {offsets = [0, 2], sizes = [1, 1], strides = [1, 1]} : vector<1x3xf32> to vector<1x1xf32>
    %c0_395 = arith.constant 0 : index
    %c0_396 = arith.constant 0 : index
    %800 = vector.load %arg34[%c0_395, %c0_396] : memref<16x32xf32, #tpu.memory_space<vmem>>, vector<16x32xf32>
    %cst_397 = arith.constant dense<0.000000e+00> : vector<16x8xf32>
    %801 = tpu.matmul %800, %795, %cst_397 {dimension_numbers = #tpu.dot_dimension_numbers<[1], [1], [0], [0], [0, 0, 1, 0], [], []>} : vector<16x32xf32>, vector<8x32xf32>, vector<16x8xf32> -> vector<16x8xf32>
    %c0_398 = arith.constant 0 : index
    %c0_399 = arith.constant 0 : index
    %802 = vector.load %arg35[%c0_398, %c0_399] : memref<16x1xf32, #tpu.memory_space<vmem>>, vector<16x1xf32>
    %803 = vector.broadcast %802 : vector<16x1xf32> to vector<16x8xf32>
    %804 = arith.addf %801, %803 : vector<16x8xf32>
    %c0_400 = arith.constant 0 : index
    %c0_401 = arith.constant 0 : index
    %805 = vector.load %arg18[%c0_400, %c0_401] : memref<32x4xf32, #tpu.memory_space<vmem>>, vector<32x4xf32>
    %cst_402 = arith.constant dense<0.000000e+00> : vector<32x4xf32>
    %806 = tpu.matmul %405, %805, %cst_402 {dimension_numbers = #tpu.dot_dimension_numbers<[1], [0], [0], [1], [0, 0, 1, 1], [], []>} : vector<32x32xf32>, vector<32x4xf32>, vector<32x4xf32> -> vector<32x4xf32>
    %c0_403 = arith.constant 0 : index
    %c0_404 = arith.constant 0 : index
    %807 = vector.load %arg19[%c0_403, %c0_404] : memref<1x4xf32, #tpu.memory_space<vmem>>, vector<1x4xf32>
    %808 = vector.broadcast %807 : vector<1x4xf32> to vector<32x4xf32>
    %809 = arith.addf %806, %808 : vector<32x4xf32>
    %810 = vector.extract_strided_slice %809 {offsets = [0, 0], sizes = [16, 4], strides = [1, 1]} : vector<32x4xf32> to vector<16x4xf32>
    %811 = vector.broadcast %797 : vector<1x1xf32> to vector<16x4xf32>
    %812 = arith.mulf %811, %810 : vector<16x4xf32>
    %813 = vector.extract_strided_slice %804 {offsets = [0, 0], sizes = [16, 4], strides = [1, 1]} : vector<16x8xf32> to vector<16x4xf32>
    %814 = vector.broadcast %798 : vector<1x1xf32> to vector<16x4xf32>
    %815 = arith.mulf %814, %813 : vector<16x4xf32>
    %816 = arith.addf %812, %815 : vector<16x4xf32>
    %817 = vector.broadcast %799 : vector<1x1xf32> to vector<16x4xf32>
    %818 = arith.addf %816, %817 : vector<16x4xf32>
    %c0_405 = arith.constant 0 : index
    %c0_406 = arith.constant 0 : index
    %819 = vector.load %arg37[%c0_405, %c0_406] : memref<16x8xf32, #tpu.memory_space<vmem>>, vector<16x4xf32>
    tpu.vector_store %arg37[%c0_405, %c0_406], %818 {strides = array<i32>} : memref<16x8xf32, #tpu.memory_space<vmem>>, vector<16x4xf32>,
    %820 = vector.extract_strided_slice %809 {offsets = [16, 0], sizes = [16, 4], strides = [1, 1]} : vector<32x4xf32> to vector<16x4xf32>
    %821 = vector.broadcast %797 : vector<1x1xf32> to vector<16x4xf32>
    %822 = arith.mulf %821, %820 : vector<16x4xf32>
    %823 = vector.extract_strided_slice %804 {offsets = [0, 4], sizes = [16, 4], strides = [1, 1]} : vector<16x8xf32> to vector<16x4xf32>
    %824 = vector.broadcast %798 : vector<1x1xf32> to vector<16x4xf32>
    %825 = arith.mulf %824, %823 : vector<16x4xf32>
    %826 = arith.addf %822, %825 : vector<16x4xf32>
    %827 = vector.broadcast %799 : vector<1x1xf32> to vector<16x4xf32>
    %828 = arith.addf %826, %827 : vector<16x4xf32>
    %c0_407 = arith.constant 0 : index
    %c4_408 = arith.constant 4 : index
    %829 = vector.load %arg37[%c0_407, %c4_408] : memref<16x8xf32, #tpu.memory_space<vmem>>, vector<16x4xf32>
    tpu.vector_store %arg37[%c0_407, %c4_408], %828 {strides = array<i32>} : memref<16x8xf32, #tpu.memory_space<vmem>>, vector<16x4xf32>,
    return
  }
}

</mosaic_0001>

<bundles_post_ra>
// kernel: parallel_denoiser_forward.1
= control target key start
LH: loop header
LB: loop body
LE: loop exit
PB: predicated region body
PF: predicated region fallthrough
CT: control target
= control target key end

     0   :  { %s8169_s6 = smov 1   ;;  %s8170_s10 = smov 2   ;;  %s9410_s0 = inlined_call_operand.smem [shape: u32[38], index: -1, kind: input, shape index: {}] }
   0x1   :  { %s8255_s5 = sld [smem:[%s9410_s0]]   ;;  %s8171_s14 = smov 3  }
   0x2   :  { %s8260_s9 = sld [smem:[%s9410_s0 + %s8169_s6]]   ;;  %s8172_s18 = smov 4  }
   0x3   :  { %s8265_s13 = sld [smem:[%s9410_s0 + %s8170_s10]]   ;;  %s8173_s22 = smov 5  }
   0x4   :  { %s8270_s17 = sld [smem:[%s9410_s0 + %s8171_s14]]   ;;  %s8174_s26 = smov 6  }
   0x5   :  { %s8275_s21 = sld [smem:[%s9410_s0 + %s8172_s18]]   ;;  %s8175_s30 = smov 7  }
   0x6   :  { %s8280_s25 = sld [smem:[%s9410_s0 + %s8173_s22]]   ;;  %s8176_s4 = smov 8  }
   0x7   :  { %9428 = sst [smem:[#allocation50_spill]] %s8255_s5  ;;  %s8177_s10 = smov 9  }
   0x8   :  { %9429 = sst [smem:[#allocation51_spill]] %s8260_s9  ;;  %s8178_s15 = smov 10  }
   0x9   :  { %9430 = sst [smem:[#allocation52_spill]] %s8265_s13  ;;  %s8179_s20 = smov 11  }
   0xa   :  { %9431 = sst [smem:[#allocation53_spill]] %s8270_s17  ;;  %s8181_s1 = smov 13  }
   0xb   :  { %s8285_s29 = sld [smem:[%s9410_s0 + %s8174_s26]]   ;;  %s8180_s26 = smov 12  }
   0xc   :  { %9432 = sst [smem:[#allocation54_spill]] %s8280_s25  ;;  %s8182_s7 = smov 14  }
   0xd   :  { %s8290_s3 = sld [smem:[%s9410_s0 + %s8175_s30]]   ;;  %s8184_s22 = smov 16  }
   0xe   :  { %s8295_s8 = sld [smem:[%s9410_s0 + %s8176_s4]]   ;;  %s8185_s28 = smov 17  }
   0xf   :  { %s8300_s14 = sld [smem:[%s9410_s0 + %s8177_s10]]  }
  0x10   :  { %s8305_s19 = sld [smem:[%s9410_s0 + %s8178_s15]]   ;;  %s8183_s15 = smov 15  }
  0x11   :  { %9433 = sst [smem:[#allocation55_spill]] %s8285_s29 }
  0x12   :  { %s8310_s24 = sld [smem:[%s9410_s0 + %s8179_s20]]  }
  0x13   :  { %s8315_s30 = sld [smem:[%s9410_s0 + %s8180_s26]]  }
  0x14   :  { %9434 = sst [smem:[#allocation56_spill]] %s8295_s8 }
  0x15   :  { %s8320_s6 = sld [smem:[%s9410_s0 + %s8181_s1]]  }
  0x16   :  { %s8325_s12 = sld [smem:[%s9410_s0 + %s8182_s7]]   ;;  %s8186_s7 = smov 18  }
  0x17   :  { %s8330_s20 = sld [smem:[%s9410_s0 + %s8183_s15]]   ;;  %s8187_s15 = smov 19  }
  0x18   :  { %s8335_s27 = sld [smem:[%s9410_s0 + %s8184_s22]]   ;;  %s8188_s22 = smov 20  }
  0x19   :  { %9435 = sst [smem:[#allocation57_spill]] %s8315_s30 }
  0x1a   :  { %s8340_s4 = sld [smem:[%s9410_s0 + %s8185_s28]]   ;;  %s8189_s28 = smov 21  }
  0x1b   :  { %s8345_s17 = sld [smem:[%s9410_s0 + %s8186_s7]]   ;;  %s8190_s7 = smov 22  }
  0x1c   :  { %9436 = sst [smem:[#allocation58_spill]] %s8325_s12 }
  0x1d   :  { %s8350_s12 = sld [smem:[%s9410_s0 + %s8187_s15]]   ;;  %s8191_s15 = smov 23  }
  0x1e   :  { %s8355_s30 = sld [smem:[%s9410_s0 + %s8188_s22]]   ;;  %s8192_s22 = smov 24  }
  0x1f   :  { %s8360_s8 = sld [smem:[%s9410_s0 + %s8189_s28]]   ;;  %s8193_s28 = smov 25  }
  0x20   :  { %9437 = sst [smem:[#allocation59_spill]] %s8340_s4 }
  0x21   :  { %9438 = sst [smem:[#allocation60_spill]] %s8345_s17 }
  0x22   :  { %s8365_s17 = sld [smem:[%s9410_s0 + %s8190_s7]]   ;;  %s8194_s7 = smov 26  }
  0x23   :  { %s8370_s9 = sld [smem:[%s9410_s0 + %s8191_s15]]   ;;  %s8195_s15 = smov 27  }
  0x24   :  { %9439 = sst [smem:[#allocation61_spill]] %s8355_s30 }
  0x25   :  { %s8375_s13 = sld [smem:[%s9410_s0 + %s8192_s22]]   ;;  %s8196_s22 = smov 28  }
  0x26   :  { %s8380_s25 = sld [smem:[%s9410_s0 + %s8193_s28]]   ;;  %s8197_s28 = smov 29  }
  0x27   :  { %s8390_s29 = sld [smem:[%s9410_s0 + %s8195_s15]]   ;;  %s8199_s15 = smov 31  }
  0x28   :  { %9440 = sst [smem:[#allocation62_spill]] %s8365_s17 }
  0x29   :  { %9441 = sst [smem:[#allocation63_spill]] %s8370_s9 }
  0x2a   :  { %s8385_s17 = sld [smem:[%s9410_s0 + %s8194_s7]]   ;;  %s8198_s7 = smov 30  }
  0x2b   :  { %9442 = sst [smem:[#allocation64_spill]] %s8375_s13 }
  0x2c   :  { %s8395_s13 = sld [smem:[%s9410_s0 + %s8196_s22]]   ;;  %s8200_s22 = smov 32  }
  0x2d   :  { %s8400_s5 = sld [smem:[%s9410_s0 + %s8197_s28]]   ;;  %s8201_s28 = smov 33  }
  0x2e   :  { %s8410_s9 = sld [smem:[%s9410_s0 + %s8199_s15]]   ;;  %s8203_s15 = smov 35  }
  0x30   :  { %9443 = sst [smem:[#allocation65_spill]] %s8385_s17 }
  0x31   :  { %s8405_s17 = sld [smem:[%s9410_s0 + %s8198_s7]]   ;;  %s8202_s7 = smov 34  }
  0x32   :  { %9444 = sst [smem:[#allocation66_spill]] %s8395_s13 }
  0x33   :  { %9445 = sst [smem:[#allocation67_spill]] %s8400_s5 }
  0x34   :  { %9446 = sst [smem:[#allocation68_spill]] %s8410_s9 }
  0x35   :  { %s8415_s13 = sld [smem:[%s9410_s0 + %s8200_s22]]   ;;  %s8204_s22 = smov 36  }
  0x36   :  { %s8420_s5 = sld [smem:[%s9410_s0 + %s8201_s28]]   ;;  %s8205_s28 = smov 37  }
  0x37   :  { %s8425_s30 = sld [smem:[%s9410_s0 + %s8202_s7]]  }
  0x38   :  { %s8430_s9 = sld [smem:[%s9410_s0 + %s8203_s15]]  }
  0x39   :  { %s8435_s4 = sld [smem:[%s9410_s0 + %s8204_s22]]  }
  0x3c   :  { %9447 = sst [smem:[#allocation69_spill]] %s8420_s5 }
  0x3d   :  { %s8440_s5 = sld [smem:[%s9410_s0 + %s8205_s28]]  }
  0x3e   :  { %80 = vsyncpa [#allocation4], 0 }
  0x3f   :  { %81 = vsyncpa [#allocation6], 0 }
  0x40   :  { %82 = vsyncpa [#allocation9], 0 }
  0x41   :  { %83 = vsyncpa [#allocation12], 0 }
  0x42   :  { %84 = vsyncpa [#allocation15], 0 }
  0x43   :  { %85 = vsyncpa [#allocation18], 0 }
  0x44   :  { %86 = vsyncpa [#allocation21], 0 }
  0x45   :  { %87 = vsyncpa [#allocation24], 0 }
  0x46   :  { %88 = vsyncpa [#allocation27], 0 }
  0x47   :  { %89 = vsyncpa [#allocation30], 0 }
  0x48   :  { %90 = vsyncpa [#allocation33], 0 }
  0x49   :  { %91 = vsyncpa [#allocation36], 0  ;;  %s8206_s7 = smov [#allocation5]   ;;  %s7639_s0 = scalar_lea.hbm %s8290_s3, 32 }
  0x4a   :  { %s119_s10 = sshll.u32 %s8206_s7, 4  ;;  %p7640_p0 = scmp.ne.s32.totalorder %s8290_s3, %s7639_s0  ;;  %s120_s10 = int_to_ptr.vmem [resolvable:$true] %s119_s10 }
  0x4b   :  { %p7643_p1 = scmp.lt.u32.totalorder %s7639_s0, %s8290_s3 }
  0x4d   :  { %p7645_p2 = pnand %p7643_p1, %p7640_p0 }
  0x4f   :  { %7648 = shalt.err (!%p7645_p2)
}
  0x50   :  { %s7649_s11 = scalar_lea.vmem %s120_s10, 32  ;;  %p7654_p4 = scmp.lt.s32.totalorder %s120_s10, %s120_s10 }
  0x51   :  { %p7650_p3 = scmp.ne.s32.totalorder %s120_s10, %s7649_s11  ;;  %p7655_p5 = scmp.lt.s32.totalorder %s7649_s11, %s7649_s11 }
  0x53   :  { %p7656_p6 = por %p7655_p5, %p7654_p4 }
  0x55   :  { %p7657_p7 = pnand %p7656_p6, %p7650_p3 }
  0x57   :  { %7660 = shalt.err (!%p7657_p7)
}
  0x58   :  { %s8207_s15 = smov 16   ;;  %s8208_s16 = smov 1  }
  0x59   :  { %125 = dma.hbm_to_vmem [thread:$0]  %s8290_s3, 32, %s120_s10, [#allocation6], %s8207_s15, %s8207_s15, %s8208_s16  }
  0x5a   :  { %s8209_s18 = smov [#allocation8]   ;;  %s8210_s23 = smov [#allocation11]  }
  0x5b   :  { %s145_s22 = sshll.u32 %s8209_s18, 4  ;;  %s171_s26 = sshll.u32 %s8210_s23, 4  ;;  %s146_s22 = int_to_ptr.vmem [resolvable:$true] %s145_s22  ;;  %s172_s26 = int_to_ptr.vmem [resolvable:$true] %s171_s26 }
  0x5c   :  { %s7661_s28 = scalar_lea.hbm %s8305_s19, 32 }
  0x5d   :  { %p7662_p8 = scmp.ne.s32.totalorder %s8305_s19, %s7661_s28  ;;  %p7665_p9 = scmp.lt.u32.totalorder %s7661_s28, %s8305_s19 }
  0x5f   :  { %p7667_p10 = pnand %p7665_p9, %p7662_p8 }
  0x61   :  { %7670 = shalt.err (!%p7667_p10)
}
  0x62   :  { %s7671_s1 = scalar_lea.vmem %s146_s22, 32  ;;  %p7676_p12 = scmp.lt.s32.totalorder %s146_s22, %s146_s22 }
  0x63   :  { %p7672_p11 = scmp.ne.s32.totalorder %s146_s22, %s7671_s1  ;;  %p7677_p13 = scmp.lt.s32.totalorder %s7671_s1, %s7671_s1 }
  0x65   :  { %p7678_p0 = por %p7677_p13, %p7676_p12 }
  0x67   :  { %p7679_p1 = pnand %p7678_p0, %p7672_p11 }
  0x69   :  { %7682 = shalt.err (!%p7679_p1)
}
  0x6a   :  { %151 = dma.hbm_to_vmem [thread:$0]  %s8305_s19, 32, %s146_s22, [#allocation9], %s8207_s15, %s8207_s15, %s8208_s16  }
  0x6b   :  { %s7683_s3 = scalar_lea.hbm %s8320_s6, 32 }
  0x6c   :  { %p7684_p2 = scmp.ne.s32.totalorder %s8320_s6, %s7683_s3  ;;  %p7687_p3 = scmp.lt.u32.totalorder %s7683_s3, %s8320_s6 }
  0x6e   :  { %p7689_p4 = pnand %p7687_p3, %p7684_p2 }
  0x70   :  { %7692 = shalt.err (!%p7689_p4)
}
  0x71   :  { %s7693_s2 = scalar_lea.vmem %s172_s26, 32  ;;  %p7698_p6 = scmp.lt.s32.totalorder %s172_s26, %s172_s26 }
  0x72   :  { %p7694_p5 = scmp.ne.s32.totalorder %s172_s26, %s7693_s2  ;;  %p7699_p7 = scmp.lt.s32.totalorder %s7693_s2, %s7693_s2 }
  0x74   :  { %p7700_p8 = por %p7699_p7, %p7698_p6 }
  0x76   :  { %p7701_p9 = pnand %p7700_p8, %p7694_p5 }
  0x78   :  { %7704 = shalt.err (!%p7701_p9)
}
  0x79   :  { %177 = dma.hbm_to_vmem [thread:$0]  %s8320_s6, 32, %s172_s26, [#allocation12], %s8207_s15, %s8207_s15, %s8208_s16  }
  0x7a   :  { %s8211_s19 = smov [#allocation14]   ;;  %s8212_s10 = smov [#allocation17]  }
  0x7b   :  { %s197_s7 = sshll.u32 %s8211_s19, 4  ;;  %s224_s0 = sshll.u32 %s8212_s10, 4  ;;  %s198_s7 = int_to_ptr.vmem [resolvable:$true] %s197_s7  ;;  %s225_s0 = int_to_ptr.vmem [resolvable:$true] %s224_s0 }
  0x7c   :  { %s7705_s11 = scalar_lea.hbm %s8335_s27, 32 }
  0x7d   :  { %p7706_p10 = scmp.ne.s32.totalorder %s8335_s27, %s7705_s11  ;;  %p7709_p11 = scmp.lt.u32.totalorder %s7705_s11, %s8335_s27 }
  0x7f   :  { %p7711_p12 = pnand %p7709_p11, %p7706_p10 }
  0x81   :  { %7714 = shalt.err (!%p7711_p12)
}
  0x82   :  { %s7715_s18 = scalar_lea.vmem %s198_s7, 32  ;;  %p7720_p0 = scmp.lt.s32.totalorder %s198_s7, %s198_s7 }
  0x83   :  { %p7716_p13 = scmp.ne.s32.totalorder %s198_s7, %s7715_s18  ;;  %p7721_p1 = scmp.lt.s32.totalorder %s7715_s18, %s7715_s18 }
  0x85   :  { %p7722_p2 = por %p7721_p1, %p7720_p0 }
  0x87   :  { %p7723_p3 = pnand %p7722_p2, %p7716_p13 }
  0x89   :  { %7726 = shalt.err (!%p7723_p3)
}
  0x8a   :  { %203 = dma.hbm_to_vmem [thread:$0]  %s8335_s27, 32, %s198_s7, [#allocation15], %s8207_s15, %s8207_s15, %s8208_s16  }
  0x8b   :  { %s7727_s6 = scalar_lea.hbm %s8350_s12, 16 }
  0x8c   :  { %p7728_p4 = scmp.ne.s32.totalorder %s8350_s12, %s7727_s6  ;;  %p7731_p5 = scmp.lt.u32.totalorder %s7727_s6, %s8350_s12 }
  0x8e   :  { %p7733_p6 = pnand %p7731_p5, %p7728_p4 }
  0x90   :  { %7736 = shalt.err (!%p7733_p6)
}
  0x91   :  { %s7737_s22 = scalar_lea.vmem %s225_s0, 16  ;;  %s7741_s23 = scalar_lea.vmem %s225_s0, 32 }
  0x92   :  { %p7738_p7 = scmp.ne.s32.totalorder %s225_s0, %s7737_s22  ;;  %p7742_p8 = scmp.lt.s32.totalorder %s225_s0, %s225_s0 }
  0x93   :  { %p7743_p9 = scmp.lt.s32.totalorder %s7741_s23, %s7737_s22 }
  0x95   :  { %p7744_p10 = por %p7743_p9, %p7742_p8 }
  0x97   :  { %p7745_p11 = pnand %p7744_p10, %p7738_p7 }
  0x99   :  { %7748 = shalt.err (!%p7745_p11)
}
  0x9a   :  { %227 = dma.hbm_to_vmem [thread:$0]  %s8350_s12, 16, %s225_s0, [#allocation18]  }
  0x9b   :  { %s8213_s27 = smov [#allocation20]   ;;  %s8214_s28 = smov [#allocation23]  }
  0x9c   :  { %s246_s26 = sshll.u32 %s8213_s27, 4  ;;  %s271_s1 = sshll.u32 %s8214_s28, 4  ;;  %s247_s26 = int_to_ptr.vmem [resolvable:$true] %s246_s26  ;;  %s272_s1 = int_to_ptr.vmem [resolvable:$true] %s271_s1 }
  0x9d   :  { %s7749_s3 = scalar_lea.hbm %s8360_s8, 128 }
  0x9e   :  { %p7750_p12 = scmp.ne.s32.totalorder %s8360_s8, %s7749_s3  ;;  %p7753_p13 = scmp.lt.u32.totalorder %s7749_s3, %s8360_s8 }
  0xa0   :  { %p7755_p0 = pnand %p7753_p13, %p7750_p12 }
  0xa2   :  { %7758 = shalt.err (!%p7755_p0)
}
  0xa3   :  { %s7759_s2 = scalar_lea.vmem %s247_s26, 128  ;;  %p7764_p2 = scmp.lt.s32.totalorder %s247_s26, %s247_s26 }
  0xa4   :  { %p7760_p1 = scmp.ne.s32.totalorder %s247_s26, %s7759_s2  ;;  %p7765_p3 = scmp.lt.s32.totalorder %s7759_s2, %s7759_s2 }
  0xa6   :  { %p7766_p4 = por %p7765_p3, %p7764_p2 }
  0xa8   :  { %p7767_p5 = pnand %p7766_p4, %p7760_p1 }
  0xaa   :  { %7770 = shalt.err (!%p7767_p5)
}
  0xab   :  { %249 = dma.hbm_to_vmem [thread:$0]  %s8360_s8, 128, %s247_s26, [#allocation21]  }
  0xac   :  { %s7771_s12 = scalar_lea.hbm %s8380_s25, 32 }
  0xad   :  { %p7772_p6 = scmp.ne.s32.totalorder %s8380_s25, %s7771_s12  ;;  %p7775_p7 = scmp.lt.u32.totalorder %s7771_s12, %s8380_s25 }
  0xaf   :  { %p7777_p8 = pnand %p7775_p7, %p7772_p6 }
  0xb1   :  { %7780 = shalt.err (!%p7777_p8)
}
  0xb2   :  { %s7781_s19 = scalar_lea.vmem %s272_s1, 32  ;;  %p7786_p10 = scmp.lt.s32.totalorder %s272_s1, %s272_s1 }
  0xb3   :  { %p7782_p9 = scmp.ne.s32.totalorder %s272_s1, %s7781_s19  ;;  %p7787_p11 = scmp.lt.s32.totalorder %s7781_s19, %s7781_s19 }
  0xb5   :  { %p7788_p12 = por %p7787_p11, %p7786_p10 }
  0xb7   :  { %p7789_p13 = pnand %p7788_p12, %p7782_p9 }
  0xb9   :  { %7792 = shalt.err (!%p7789_p13)
}
  0xba   :  { %277 = dma.hbm_to_vmem [thread:$0]  %s8380_s25, 32, %s272_s1, [#allocation24], %s8207_s15, %s8207_s15, %s8208_s16  }
  0xbb   :  { %s8215_s8 = smov [#allocation26]   ;;  %s7793_s10 = scalar_lea.hbm %s8390_s29, 32 }
  0xbc   :  { %s295_s7 = sshll.u32 %s8215_s8, 4  ;;  %p7794_p0 = scmp.ne.s32.totalorder %s8390_s29, %s7793_s10  ;;  %s296_s7 = int_to_ptr.vmem [resolvable:$true] %s295_s7 }
  0xbd   :  { %p7797_p1 = scmp.lt.u32.totalorder %s7793_s10, %s8390_s29 }
  0xbf   :  { %p7799_p2 = pnand %p7797_p1, %p7794_p0 }
  0xc1   :  { %7802 = shalt.err (!%p7799_p2)
}
  0xc2   :  { %s7803_s0 = scalar_lea.vmem %s296_s7, 32  ;;  %p7808_p4 = scmp.lt.s32.totalorder %s296_s7, %s296_s7 }
  0xc3   :  { %p7804_p3 = scmp.ne.s32.totalorder %s296_s7, %s7803_s0  ;;  %p7809_p5 = scmp.lt.s32.totalorder %s7803_s0, %s7803_s0 }
  0xc5   :  { %p7810_p6 = por %p7809_p5, %p7808_p4 }
  0xc7   :  { %p7811_p7 = pnand %p7810_p6, %p7804_p3 }
  0xc9   :  { %7814 = shalt.err (!%p7811_p7)
}
  0xca   :  { %301 = dma.hbm_to_vmem [thread:$0]  %s8390_s29, 32, %s296_s7, [#allocation27], %s8207_s15, %s8207_s15, %s8208_s16  }
  0xcb   :  { %s8216_s25 = smov [#allocation29]   ;;  %s8217_s18 = smov [#allocation32]  }
  0xcc   :  { %s321_s11 = sshll.u32 %s8216_s25, 4  ;;  %s345_s6 = sshll.u32 %s8217_s18, 4  ;;  %s322_s11 = int_to_ptr.vmem [resolvable:$true] %s321_s11  ;;  %s8492_s6 = int_to_ptr.vmem [resolvable:$true] %s345_s6 }
  0xcd   :  { %s7815_s22 = scalar_lea.hbm %s8405_s17, 1024 }
  0xce   :  { %p7816_p8 = scmp.ne.s32.totalorder %s8405_s17, %s7815_s22  ;;  %p7819_p9 = scmp.lt.u32.totalorder %s7815_s22, %s8405_s17 }
  0xd0   :  { %p7821_p10 = pnand %p7819_p9, %p7816_p8 }
  0xd2   :  { %7824 = shalt.err (!%p7821_p10)
}
  0xd3   :  { %s7825_s23 = scalar_lea.vmem %s322_s11, 1024  ;;  %p7830_p12 = scmp.lt.s32.totalorder %s322_s11, %s322_s11 }
  0xd4   :  { %p7826_p11 = scmp.ne.s32.totalorder %s322_s11, %s7825_s23  ;;  %p7831_p13 = scmp.lt.s32.totalorder %s7825_s23, %s7825_s23 }
  0xd6   :  { %p7832_p0 = por %p7831_p13, %p7830_p12 }
  0xd8   :  { %p7833_p1 = pnand %p7832_p0, %p7826_p11 }
  0xda   :  { %7836 = shalt.err (!%p7833_p1)
}
  0xdb   :  { %s8218_s29 = smov 128   ;;  %s8219_s27 = smov 8  }
  0xdc   :  { %327 = dma.hbm_to_vmem [thread:$0]  %s8405_s17, 1024, %s322_s11, [#allocation30], %s8218_s29, %s8218_s29, %s8219_s27  }
  0xdd   :  { %s7837_s26 = scalar_lea.hbm %s8415_s13, 32 }
  0xde   :  { %p7838_p2 = scmp.ne.s32.totalorder %s8415_s13, %s7837_s26  ;;  %p7841_p3 = scmp.lt.u32.totalorder %s7837_s26, %s8415_s13 }
  0xe0   :  { %p7843_p4 = pnand %p7841_p3, %p7838_p2 }
  0xe2   :  { %7846 = shalt.err (!%p7843_p4)
}
  0xe3   :  { %s7847_s28 = scalar_lea.vmem %s8492_s6, 32  ;;  %p7852_p6 = scmp.lt.s32.totalorder %s8492_s6, %s8492_s6 }
  0xe4   :  { %p7848_p5 = scmp.ne.s32.totalorder %s8492_s6, %s7847_s28  ;;  %p7853_p7 = scmp.lt.s32.totalorder %s7847_s28, %s7847_s28 }
  0xe6   :  { %p7854_p8 = por %p7853_p7, %p7852_p6 }
  0xe8   :  { %p7855_p9 = pnand %p7854_p8, %p7848_p5 }
  0xea   :  { %7858 = shalt.err (!%p7855_p9)
}
  0xeb   :  { %351 = dma.hbm_to_vmem [thread:$0]  %s8415_s13, 32, %s8492_s6, [#allocation33], %s8207_s15, %s8207_s15, %s8208_s16  }
  0xec   :  { %s8220_s17 = smov [#allocation35]   ;;  %s8221_s3 = smov [#allocation3]  }
  0xed   :  { %s369_s1 = sshll.u32 %s8220_s17, 4  ;;  %s106_s2 = sshll.u32 %s8221_s3, 4  ;;  %s370_s1 = int_to_ptr.vmem [resolvable:$true] %s369_s1  ;;  %s107_s2 = int_to_ptr.vmem [resolvable:$true] %s106_s2 }
  0xee   :  { %s7859_s12 = scalar_lea.hbm %s8425_s30, 256 }
  0xef   :  { %p7860_p10 = scmp.ne.s32.totalorder %s8425_s30, %s7859_s12  ;;  %p7863_p11 = scmp.lt.u32.totalorder %s7859_s12, %s8425_s30 }
  0xf1   :  { %p7865_p12 = pnand %p7863_p11, %p7860_p10 }
  0xf3   :  { %7868 = shalt.err (!%p7865_p12)
}
  0xf4   :  { %s7869_s19 = scalar_lea.vmem %s370_s1, 256  ;;  %p7874_p0 = scmp.lt.s32.totalorder %s370_s1, %s370_s1 }
  0xf5   :  { %p7870_p13 = scmp.ne.s32.totalorder %s370_s1, %s7869_s19  ;;  %p7875_p1 = scmp.lt.s32.totalorder %s7869_s19, %s7869_s19 }
  0xf7   :  { %p7876_p2 = por %p7875_p1, %p7874_p0 }
  0xf9   :  { %p7877_p3 = pnand %p7876_p2, %p7870_p13 }
  0xfb   :  { %7880 = shalt.err (!%p7877_p3)
}
  0xfc   :  { %375 = dma.hbm_to_vmem [thread:$0]  %s8425_s30, 256, %s370_s1, [#allocation36], %s8218_s29, %s8218_s29, %s8219_s27  }
  0xfd   :  { %s7881_s13 = scalar_lea.hbm %s8275_s21, 64 }
  0xfe   :  { %p7882_p4 = scmp.ne.s32.totalorder %s8275_s21, %s7881_s13  ;;  %p7885_p5 = scmp.lt.u32.totalorder %s7881_s13, %s8275_s21 }
 0x100   :  { %p7887_p6 = pnand %p7885_p5, %p7882_p4 }
 0x102   :  { %7890 = shalt.err (!%p7887_p6)
}
 0x103   :  { %s7891_s8 = scalar_lea.vmem %s107_s2, 64  ;;  %p7896_p8 = scmp.lt.s32.totalorder %s107_s2, %s107_s2 }
 0x104   :  { %p7892_p7 = scmp.ne.s32.totalorder %s107_s2, %s7891_s8  ;;  %p7897_p9 = scmp.lt.s32.totalorder %s7891_s8, %s7891_s8 }
 0x106   :  { %p7898_p10 = por %p7897_p9, %p7896_p8 }
 0x108   :  { %p7899_p11 = pnand %p7898_p10, %p7892_p7 }
 0x10a   :  { %7902 = shalt.err (!%p7899_p11)
}
 0x10b   :  { %109 = dma.hbm_to_vmem [thread:$0]  %s8275_s21, 64, %s107_s2, [#allocation4]  }
 0x10c   :  { %s8222_s7 = smov [#allocation7]   ;;  %s8223_s30 = smov [#allocation10]  }
 0x10d   :  { %s133_s10 = sshll.u32 %s8222_s7, 4  ;;  %s157_s0 = sshll.u32 %s8223_s30, 4  ;;  %s134_s10 = int_to_ptr.vmem [resolvable:$true] %s133_s10  ;;  %s8524_s0 = int_to_ptr.vmem [resolvable:$true] %s157_s0 }
 0x10e   :  { %s7903_s25 = scalar_lea.hbm %s8300_s14, 32 }
 0x10f   :  { %p7904_p12 = scmp.ne.s32.totalorder %s8300_s14, %s7903_s25  ;;  %p7907_p13 = scmp.lt.u32.totalorder %s7903_s25, %s8300_s14 }
 0x111   :  { %p7909_p0 = pnand %p7907_p13, %p7904_p12 }
 0x113   :  { %7912 = shalt.err (!%p7909_p0)
}
 0x114   :  { %s7913_s11 = scalar_lea.vmem %s134_s10, 32  ;;  %p7918_p2 = scmp.lt.s32.totalorder %s134_s10, %s134_s10 }
 0x115   :  { %p7914_p1 = scmp.ne.s32.totalorder %s134_s10, %s7913_s11  ;;  %p7919_p3 = scmp.lt.s32.totalorder %s7913_s11, %s7913_s11 }
 0x117   :  { %p7920_p4 = por %p7919_p3, %p7918_p2 }
 0x119   :  { %p7921_p5 = pnand %p7920_p4, %p7914_p1 }
 0x11b   :  { %7924 = shalt.err (!%p7921_p5)
}
 0x11c   :  { %139 = dma.hbm_to_vmem [thread:$0]  %s8300_s14, 32, %s134_s10, [#allocation6], %s8207_s15, %s8207_s15, %s8208_s16  }
 0x11d   :  { %s7925_s21 = scalar_lea.hbm %s8310_s24, 32 }
 0x11e   :  { %p7926_p6 = scmp.ne.s32.totalorder %s8310_s24, %s7925_s21  ;;  %p7929_p7 = scmp.lt.u32.totalorder %s7925_s21, %s8310_s24 }
 0x120   :  { %p7931_p8 = pnand %p7929_p7, %p7926_p6 }
 0x122   :  { %7934 = shalt.err (!%p7931_p8)
}
 0x123   :  { %s7935_s18 = scalar_lea.vmem %s8524_s0, 32  ;;  %p7940_p10 = scmp.lt.s32.totalorder %s8524_s0, %s8524_s0 }
 0x124   :  { %p7936_p9 = scmp.ne.s32.totalorder %s8524_s0, %s7935_s18  ;;  %p7941_p11 = scmp.lt.s32.totalorder %s7935_s18, %s7935_s18 }
 0x126   :  { %p7942_p12 = por %p7941_p11, %p7940_p10 }
 0x128   :  { %p7943_p13 = pnand %p7942_p12, %p7936_p9 }
 0x12a   :  { %7946 = shalt.err (!%p7943_p13)
}
 0x12b   :  { %163 = dma.hbm_to_vmem [thread:$0]  %s8310_s24, 32, %s8524_s0, [#allocation9], %s8207_s15, %s8207_s15, %s8208_s16  }
 0x12c   :  { %s8224_s14 = smov [#allocation13]   ;;  %s8225_s22 = smov [#allocation16]  }
 0x12d   :  { %s185_s6 = sshll.u32 %s8224_s14, 4  ;;  %s209_s23 = sshll.u32 %s8225_s22, 4  ;;  %s186_s6 = int_to_ptr.vmem [resolvable:$true] %s185_s6  ;;  %s8545_s23 = int_to_ptr.vmem [resolvable:$true] %s209_s23 }
 0x12e   :  { %s7947_s26 = scalar_lea.hbm %s8330_s20, 32 }
 0x12f   :  { %p7948_p0 = scmp.ne.s32.totalorder %s8330_s20, %s7947_s26  ;;  %p7951_p1 = scmp.lt.u32.totalorder %s7947_s26, %s8330_s20 }
 0x131   :  { %p7953_p2 = pnand %p7951_p1, %p7948_p0 }
 0x133   :  { %7956 = shalt.err (!%p7953_p2)
}
 0x134   :  { %s7957_s28 = scalar_lea.vmem %s186_s6, 32  ;;  %p7962_p4 = scmp.lt.s32.totalorder %s186_s6, %s186_s6 }
 0x135   :  { %p7958_p3 = scmp.ne.s32.totalorder %s186_s6, %s7957_s28  ;;  %p7963_p5 = scmp.lt.s32.totalorder %s7957_s28, %s7957_s28 }
 0x137   :  { %p7964_p6 = por %p7963_p5, %p7962_p4 }
 0x139   :  { %p7965_p7 = pnand %p7964_p6, %p7958_p3 }
 0x13b   :  { %7968 = shalt.err (!%p7965_p7)
}
 0x13c   :  { %s9448_s24 = sld [smem:[#allocation59_spill]] }
 0x13d   :  { %191 = dma.hbm_to_vmem [thread:$0]  %s8330_s20, 32, %s186_s6, [#allocation12], %s8207_s15, %s8207_s15, %s8208_s16  }
 0x142   :  { %s7969_s17 = scalar_lea.hbm %s9448_s24, 32 }
 0x143   :  { %p7970_p8 = scmp.ne.s32.totalorder %s9448_s24, %s7969_s17  ;;  %p7973_p9 = scmp.lt.u32.totalorder %s7969_s17, %s9448_s24 }
 0x145   :  { %p7975_p10 = pnand %p7973_p9, %p7970_p8 }
 0x147   :  { %7978 = shalt.err (!%p7975_p10)
}
 0x148   :  { %s7979_s1 = scalar_lea.vmem %s8545_s23, 32  ;;  %p7984_p12 = scmp.lt.s32.totalorder %s8545_s23, %s8545_s23 }
 0x149   :  { %p7980_p11 = scmp.ne.s32.totalorder %s8545_s23, %s7979_s1  ;;  %p7985_p13 = scmp.lt.s32.totalorder %s7979_s1, %s7979_s1 }
 0x14b   :  { %p7986_p0 = por %p7985_p13, %p7984_p12 }
 0x14d   :  { %p7987_p1 = pnand %p7986_p0, %p7980_p11 }
 0x14f   :  { %7990 = shalt.err (!%p7987_p1)
}
 0x150   :  { %s9449_s20 = sld [smem:[#allocation61_spill]]  ;;  %s8226_s3 = smov [#allocation19]  }
 0x151   :  { %215 = dma.hbm_to_vmem [thread:$0]  %s9448_s24, 32, %s8545_s23, [#allocation15], %s8207_s15, %s8207_s15, %s8208_s16  }
 0x152   :  { %s233_s2 = sshll.u32 %s8226_s3, 4  ;;  %s8227_s12 = smov [#allocation22]   ;;  %s234_s2 = int_to_ptr.vmem [resolvable:$true] %s233_s2 }
 0x153   :  { %s257_s19 = sshll.u32 %s8227_s12, 4  ;;  %s8566_s19 = int_to_ptr.vmem [resolvable:$true] %s257_s19 }
 0x156   :  { %s7991_s13 = scalar_lea.hbm %s9449_s20, 256 }
 0x157   :  { %p7992_p2 = scmp.ne.s32.totalorder %s9449_s20, %s7991_s13  ;;  %p7995_p3 = scmp.lt.u32.totalorder %s7991_s13, %s9449_s20 }
 0x159   :  { %p7997_p4 = pnand %p7995_p3, %p7992_p2 }
 0x15b   :  { %8000 = shalt.err (!%p7997_p4)
}
 0x15c   :  { %s8001_s8 = scalar_lea.vmem %s234_s2, 256  ;;  %p8006_p6 = scmp.lt.s32.totalorder %s234_s2, %s234_s2 }
 0x15d   :  { %p8002_p5 = scmp.ne.s32.totalorder %s234_s2, %s8001_s8  ;;  %p8007_p7 = scmp.lt.s32.totalorder %s8001_s8, %s8001_s8 }
 0x15f   :  { %p8008_p8 = por %p8007_p7, %p8006_p6 }
 0x161   :  { %p8009_p9 = pnand %p8008_p8, %p8002_p5 }
 0x163   :  { %8012 = shalt.err (!%p8009_p9)
}
 0x164   :  { %s9450_s7 = sld [smem:[#allocation63_spill]] }
 0x165   :  { %239 = dma.hbm_to_vmem [thread:$0]  %s9449_s20, 256, %s234_s2, [#allocation18], %s8218_s29, %s8218_s29, %s8219_s27  }
 0x16a   :  { %s8013_s10 = scalar_lea.hbm %s9450_s7, 32 }
 0x16b   :  { %p8014_p10 = scmp.ne.s32.totalorder %s9450_s7, %s8013_s10  ;;  %p8017_p11 = scmp.lt.u32.totalorder %s8013_s10, %s9450_s7 }
 0x16d   :  { %p8019_p12 = pnand %p8017_p11, %p8014_p10 }
 0x16f   :  { %8022 = shalt.err (!%p8019_p12)
}
 0x170   :  { %s8023_s30 = scalar_lea.vmem %s8566_s19, 32  ;;  %p8028_p0 = scmp.lt.s32.totalorder %s8566_s19, %s8566_s19 }
 0x171   :  { %p8024_p13 = scmp.ne.s32.totalorder %s8566_s19, %s8023_s30  ;;  %p8029_p1 = scmp.lt.s32.totalorder %s8023_s30, %s8023_s30 }
 0x173   :  { %p8030_p2 = por %p8029_p1, %p8028_p0 }
 0x175   :  { %p8031_p3 = pnand %p8030_p2, %p8024_p13 }
 0x177   :  { %8034 = shalt.err (!%p8031_p3)
}
 0x178   :  { %s9451_s0 = sld [smem:[#allocation65_spill]]  ;;  %s8228_s25 = smov [#allocation25]  }
 0x179   :  { %263 = dma.hbm_to_vmem [thread:$0]  %s9450_s7, 32, %s8566_s19, [#allocation21], %s8207_s15, %s8207_s15, %s8208_s16  }
 0x17a   :  { %s283_s11 = sshll.u32 %s8228_s25, 4  ;;  %s8229_s21 = smov [#allocation28]   ;;  %s284_s11 = int_to_ptr.vmem [resolvable:$true] %s283_s11 }
 0x17b   :  { %s307_s18 = sshll.u32 %s8229_s21, 4  ;;  %s8587_s18 = int_to_ptr.vmem [resolvable:$true] %s307_s18 }
 0x17e   :  { %s8035_s14 = scalar_lea.hbm %s9451_s0, 32 }
 0x17f   :  { %p8036_p4 = scmp.ne.s32.totalorder %s9451_s0, %s8035_s14  ;;  %p8039_p5 = scmp.lt.u32.totalorder %s8035_s14, %s9451_s0 }
 0x181   :  { %p8041_p6 = pnand %p8039_p5, %p8036_p4 }
 0x183   :  { %8044 = shalt.err (!%p8041_p6)
}
 0x184   :  { %s8045_s6 = scalar_lea.vmem %s284_s11, 32  ;;  %p8050_p8 = scmp.lt.s32.totalorder %s284_s11, %s284_s11 }
 0x185   :  { %p8046_p7 = scmp.ne.s32.totalorder %s284_s11, %s8045_s6  ;;  %p8051_p9 = scmp.lt.s32.totalorder %s8045_s6, %s8045_s6 }
 0x187   :  { %p8052_p10 = por %p8051_p9, %p8050_p8 }
 0x189   :  { %p8053_p11 = pnand %p8052_p10, %p8046_p7 }
 0x18b   :  { %8056 = shalt.err (!%p8053_p11)
}
 0x18c   :  { %s9452_s22 = sld [smem:[#allocation66_spill]] }
 0x18d   :  { %289 = dma.hbm_to_vmem [thread:$0]  %s9451_s0, 32, %s284_s11, [#allocation24], %s8207_s15, %s8207_s15, %s8208_s16  }
 0x192   :  { %s8057_s23 = scalar_lea.hbm %s9452_s22, 1024 }
 0x193   :  { %p8058_p12 = scmp.ne.s32.totalorder %s9452_s22, %s8057_s23  ;;  %p8061_p13 = scmp.lt.u32.totalorder %s8057_s23, %s9452_s22 }
 0x195   :  { %p8063_p0 = pnand %p8061_p13, %p8058_p12 }
 0x197   :  { %8066 = shalt.err (!%p8063_p0)
}
 0x198   :  { %s8067_s26 = scalar_lea.vmem %s8587_s18, 1024  ;;  %p8072_p2 = scmp.lt.s32.totalorder %s8587_s18, %s8587_s18 }
 0x199   :  { %p8068_p1 = scmp.ne.s32.totalorder %s8587_s18, %s8067_s26  ;;  %p8073_p3 = scmp.lt.s32.totalorder %s8067_s26, %s8067_s26 }
 0x19b   :  { %p8074_p4 = por %p8073_p3, %p8072_p2 }
 0x19d   :  { %p8075_p5 = pnand %p8074_p4, %p8068_p1 }
 0x19f   :  { %8078 = shalt.err (!%p8075_p5)
}
 0x1a0   :  { %s9453_s28 = sld [smem:[#allocation68_spill]]  ;;  %s8230_s24 = smov [#allocation31]  }
 0x1a1   :  { %313 = dma.hbm_to_vmem [thread:$0]  %s9452_s22, 1024, %s8587_s18, [#allocation27], %s8218_s29, %s8218_s29, %s8219_s27  }
 0x1a2   :  { %s333_s17 = sshll.u32 %s8230_s24, 4  ;;  %s8231_s1 = smov [#allocation34]   ;;  %s334_s17 = int_to_ptr.vmem [resolvable:$true] %s333_s17 }
 0x1a3   :  { %s357_s20 = sshll.u32 %s8231_s1, 4  ;;  %s8608_s20 = int_to_ptr.vmem [resolvable:$true] %s357_s20 }
 0x1a6   :  { %s8079_s3 = scalar_lea.hbm %s9453_s28, 32 }
 0x1a7   :  { %p8080_p6 = scmp.ne.s32.totalorder %s9453_s28, %s8079_s3  ;;  %p8083_p7 = scmp.lt.u32.totalorder %s8079_s3, %s9453_s28 }
 0x1a9   :  { %p8085_p8 = pnand %p8083_p7, %p8080_p6 }
 0x1ab   :  { %8088 = shalt.err (!%p8085_p8)
}
 0x1ac   :  { %s8089_s2 = scalar_lea.vmem %s334_s17, 32  ;;  %p8094_p10 = scmp.lt.s32.totalorder %s334_s17, %s334_s17 }
 0x1ad   :  { %p8090_p9 = scmp.ne.s32.totalorder %s334_s17, %s8089_s2  ;;  %p8095_p11 = scmp.lt.s32.totalorder %s8089_s2, %s8089_s2 }
 0x1af   :  { %p8096_p12 = por %p8095_p11, %p8094_p10 }
 0x1b1   :  { %p8097_p13 = pnand %p8096_p12, %p8090_p9 }
 0x1b3   :  { %8100 = shalt.err (!%p8097_p13)
}
 0x1b4   :  { %s9454_s29 = sld [smem:[#allocation69_spill]] }
 0x1b5   :  { %339 = dma.hbm_to_vmem [thread:$0]  %s9453_s28, 32, %s334_s17, [#allocation30], %s8207_s15, %s8207_s15, %s8208_s16  }
 0x1ba   :  { %s8101_s27 = scalar_lea.hbm %s9454_s29, 32 }
 0x1bb   :  { %p8102_p0 = scmp.ne.s32.totalorder %s9454_s29, %s8101_s27  ;;  %p8105_p1 = scmp.lt.u32.totalorder %s8101_s27, %s9454_s29 }
 0x1bd   :  { %p8107_p2 = pnand %p8105_p1, %p8102_p0 }
 0x1bf   :  { %8110 = shalt.err (!%p8107_p2)
}
 0x1c0   :  { %s8111_s12 = scalar_lea.vmem %s8608_s20, 32  ;;  %p8116_p4 = scmp.lt.s32.totalorder %s8608_s20, %s8608_s20 }
 0x1c1   :  { %p8112_p3 = scmp.ne.s32.totalorder %s8608_s20, %s8111_s12  ;;  %p8117_p5 = scmp.lt.s32.totalorder %s8111_s12, %s8111_s12 }
 0x1c3   :  { %p8118_p6 = por %p8117_p5, %p8116_p4 }
 0x1c5   :  { %p8119_p7 = pnand %p8118_p6, %p8112_p3 }
 0x1c7   :  { %8122 = shalt.err (!%p8119_p7)
}
 0x1c8   :  { %363 = dma.hbm_to_vmem [thread:$0]  %s9454_s29, 32, %s8608_s20, [#allocation33], %s8207_s15, %s8207_s15, %s8208_s16  }
 0x1c9   :  { %s8232_s19 = smov [#allocation37]   ;;  %s8123_s8 = scalar_lea.hbm %s8435_s4, 16 }
 0x1ca   :  { %s384_s13 = sshll.u32 %s8232_s19, 4  ;;  %p8124_p8 = scmp.ne.s32.totalorder %s8435_s4, %s8123_s8  ;;  %s385_s13 = int_to_ptr.vmem [resolvable:$true] %s384_s13 }
 0x1cb   :  { %p8127_p9 = scmp.lt.u32.totalorder %s8123_s8, %s8435_s4 }
 0x1cd   :  { %p8129_p10 = pnand %p8127_p9, %p8124_p8 }
 0x1cf   :  { %8132 = shalt.err (!%p8129_p10)
}
 0x1d0   :  { %s8133_s7 = scalar_lea.vmem %s385_s13, 16  ;;  %s8137_s10 = scalar_lea.vmem %s385_s13, 32 }
 0x1d1   :  { %p8134_p11 = scmp.ne.s32.totalorder %s385_s13, %s8133_s7  ;;  %p8138_p12 = scmp.lt.s32.totalorder %s385_s13, %s385_s13 }
 0x1d2   :  { %p8139_p13 = scmp.lt.s32.totalorder %s8137_s10, %s8133_s7 }
 0x1d4   :  { %p8140_p0 = por %p8139_p13, %p8138_p12 }
 0x1d6   :  { %p8141_p1 = pnand %p8140_p0, %p8134_p11 }
 0x1d8   :  { %8144 = shalt.err (!%p8141_p1)
}
 0x1d9   :  { %387 = dma.hbm_to_vmem [thread:$0]  %s8435_s4, 16, %s385_s13, [#allocation36]  }
 0x1da   :  { %8145 = dma.done.wait [#allocation4], 64  }
 0x1db   :  { %8146 = vsyncadd [#allocation4], 4294967232 }
 0x1dc   :  { %8147 = dma.done.wait [#allocation6], 64  }
 0x1dd   :  { %8148 = vsyncadd [#allocation6], 4294967232 }
 0x1de   :  { %8149 = dma.done.wait [#allocation9], 64  }
 0x1df   :  { %8150 = vsyncadd [#allocation9], 4294967232 }
 0x1e0   :  { %8151 = dma.done.wait [#allocation12], 64  }
 0x1e1   :  { %8152 = vsyncadd [#allocation12], 4294967232 }
 0x1e2   :  { %8153 = dma.done.wait [#allocation15], 64  }
 0x1e3   :  { %8154 = vsyncadd [#allocation15], 4294967232 }
 0x1e4   :  { %8155 = dma.done.wait [#allocation18], 272  }
 0x1e5   :  { %8156 = vsyncadd [#allocation18], 4294967024 }
 0x1e6   :  { %8157 = dma.done.wait [#allocation21], 160  }
 0x1e7   :  { %8158 = vsyncadd [#allocation21], 4294967136 }
 0x1e8   :  { %8159 = dma.done.wait [#allocation24], 64  }
 0x1e9   :  { %8160 = vsyncadd [#allocation24], 4294967232 }
 0x1ea   :  { %8161 = dma.done.wait [#allocation27], 1056  }
 0x1eb   :  { %8162 = vsyncadd [#allocation27], 4294966240 }
 0x1ec   :  { %8163 = dma.done.wait [#allocation30], 1056  }
 0x1ed   :  { %8164 = vsyncadd [#allocation30], 4294966240 }
 0x1ee   :  { %8165 = dma.done.wait [#allocation33], 64  }
 0x1ef   :  { %8166 = vsyncadd [#allocation33], 4294967232 }
 0x1f0   :  { %8167 = dma.done.wait [#allocation36], 272  }
 0x1f1   :  { %8168 = vsyncadd [#allocation36], 4294967024  ;;  %s9455_s4 = sld [smem:[#allocation50_spill]]  ;;  %s9456_s16 = sld [smem:[#allocation55_spill]]  ;;  %vm479_vm0 = vcmask 1043456   ;;  %vm466_vm1 = vcmask 31744  }
 0x1f2   :  { %v461_v0 = vld [vmem:[#allocation3] sm:$0xf]  ;;  %s9457_s30 = sld [smem:[#allocation54_spill]]  ;;  %s9458_s0 = sld [smem:[#allocation52_spill]]  ;;  %v8233_v11 = vmov 0.0|0.0   ;;  %v580_v12 = vld [vmem:[#allocation19] sm:$0xff] }
 0x1f3   :  { %6670 = vmatprep.subr.msk.mxu0 %vm479_vm0, %v461_v0  ;;  %7096 = vmatprep.subr.bf16.mxu1 %v8233_v11  ;;  %v581_v13 = vld [vmem:[#allocation19 + $0x8] sm:$0xff]  ;;  %vm676_vm2 = vcmask 261120   ;;  %s9459_s25 = sld [smem:[#allocation51_spill]]  ;;  %vm8234_vm3 = vmmov 0   ;;  %v8235_v32 = vmov 0.0   ;;  %vm583_vm4 = vcmask 130048  }
 0x1f4   :  { %6671 = vmatpush3.msk.msra.mxu0 %vm479_vm0, %v461_v0  ;;  %v7097_v14 = vpack.c.bf16 %v581_v13, %v580_v12  ;;  %6682 = vmatprep.mubr.msk.f32.mxu1 %vm8234_vm3, %v8235_v32  ;;  %v6265_v34 = vld [vmem:[#allocation5] ss:$0 sm:$0xff]  ;;  %s8236_s11 = smov 112   ;;  %s8237_s21 = smov 80   ;;  %vm8686_vm5 = vmpackc.low %vm583_vm4, %vm583_vm4  ;;  %vm1186_vm6 = vcmask 261248   ;;  %vm3890_vm15 = vcmask 27648  }
 0x1f5   :  { %s8238_s18 = smov 48   ;;  %s8239_s14 = smov 96  }
 0x1f6   :  { %7098 = vmatpush3.bf16.msra.mxu1 %v7097_v14  ;;  %s8240_s6 = smov 64   ;;  %s9462_s22 = sld [smem:[#allocation56_spill]] }
 0x1f7   :  { %v457_v1 = vld [vmem:[%s9455_s4] sm:$0xff]  ;;  %v458_v2 = vld [vmem:[%s9455_s4 + $0x8] sm:$0xff]  ;;  %v459_v3 = vld [vmem:[%s9455_s4 + $0x10] sm:$0xff]  ;;  %s9463_s23 = sld [smem:[#allocation57_spill]]  ;;  %s9464_s26 = sld [smem:[#allocation58_spill]] }
 0x1f8   :  { %6672 = vmatprep.mubr.msk.f32.mxu0 %vm466_vm1, %v457_v1  ;;  %v665_v4 = vld [vmem:[%s9456_s16] sm:$0xff]  ;;  %v666_v5 = vld [vmem:[%s9456_s16 + $0x8] sm:$0xff]  ;;  %v460_v7 = vld [vmem:[%s9455_s4 + $0x18] sm:$0xff]  ;;  %s9465_s28 = sld [smem:[#allocation62_spill]]  ;;  %s9466_s24 = sld [smem:[#allocation53_spill]] }
 0x1f9   :  { %v7099_v6 = vpack.c.bf16 %v666_v5, %v665_v4  ;;  %6673 = vmatmul.mubr.msk.f32.vlgmr.msra.gmra.mrb[0].mxu0 %vm466_vm1, %v458_v2  ;;  %v667_v8 = vld [vmem:[%s9456_s16 + $0x10] sm:$0xff]  ;;  %v668_v9 = vld [vmem:[%s9456_s16 + $0x18] sm:$0xff]  ;;  %v463_v15 = vld [vmem:[%s9457_s30 + $0x8] sm:$0xff]  ;;  %s9467_s17 = sld [smem:[#allocation64_spill]]  ;;  %s9468_s1 = sld [smem:[#allocation67_spill]] }
 0x1fa   :  { %6675 = vmatprep.mubr.msk.f32.mxu0 %vm466_vm1, %v459_v3  ;;  %v7103_v10 = vpack.c.bf16 %v668_v9, %v667_v8  ;;  %v462_v16 = vld [vmem:[%s9457_s30] sm:$0xff]  ;;  %v465_v24 = vld [vmem:[%s9457_s30 + $0x18] sm:$0xff]  ;;  %v464_v25 = vld [vmem:[%s9457_s30 + $0x10] sm:$0xff]  ;;  %s8246_s20 = smov 4  }
 0x1fb   :  { %7100 = vmatprep.subr.bf16.mxu0 %v7099_v6  ;;  %v6262_v19 = vld [vmem:[%s9458_s0] ss:$0 sm:$0xff] }
 0x1fc   :  { %7102 = vmatpush3.bf16.msra.mxu0 %v7099_v6  ;;  %v579_v33 = vld [vmem:[%s9459_s25] sm:$0xff] }
 0x1fd   :  { %6676 = vmatmul.mubr.msk.f32.gmra.mrb[2].mxu0 %vm466_vm1, %v460_v7  ;;  %7104 = vmatprep.subr.bf16.mxu0 %v7103_v10 }
 0x1fe   :  { %6683 = vmatmul.mubr.msk.f32.vlgmr.msra.gmra.mrb[0].mxu1 %vm583_vm4, %v579_v33 }
 0x200   :  { %7106 = vmatpush3.bf16.msra.mxu0 %v7103_v10 }
 0x2cc   :  { %v6674_v17 = vpop.f32.mrb[0].mxu0 }
 0x2cd   :  { %v555_v18 = vadd.f32 %v6674_v17, %v463_v15  ;;  %v549_v20 = vpop.f32.mrb[1].mxu0 }
 0x2ce   :  { %v550_v21 = vadd.f32 %v549_v20, %v462_v16 }
 0x2cf   :  { %v8653_v23 = vadd.f32 %v6262_v19, %v555_v18 }
 0x2d0   :  { %v8651_v22 = vadd.f32 %v6262_v19, %v550_v21  ;;  %v6677_v26 = vpop.f32.mrb[2].mxu0 }
 0x2d1   :  { %v565_v27 = vadd.f32 %v6677_v26, %v465_v24  ;;  %v559_v28 = vpop.f32.mrb[3].mxu0  ;;  %v8714_v4 = vpop.f32.mrb[0].mxu1 }
 0x2d2   :  { %6693 = vmatprep.mubr.msk.f32.mxu0 %vm676_vm2, %v8651_v22  ;;  %v560_v29 = vadd.f32 %v559_v28, %v464_v25  ;;  %v6684_v5 = vpop.f32.mrb[1].mxu1 }
 0x2d3   :  { %6694 = vmatmul.mubr.msk.f32.vlgmr.msra.gmra.mrb[4].mxu0 %vm676_vm2, %v8653_v23  ;;  %v8661_v30 = vadd.f32 %v6262_v19, %v565_v27 }
 0x2d4   :  { %v8663_v31 = vadd.f32 %v6262_v19, %v560_v29 }
 0x2d6   :  { %6696 = vmatprep.mubr.msk.f32.mxu0 %vm676_vm2, %v8663_v31 }
 0x2d7   :  { %6697 = vmatmul.mubr.msk.f32.gmra.mrb[6].mxu0 %vm676_vm2, %v8661_v30 }
 0x3a6   :  { %v6695_v35 = vpop.f32.mrb[4].mxu0 }
 0x3a7   :  { %v8673_v36 = vadd.f32 %v6695_v35, %v6265_v34  ;;  %v755_v37 = vpop.f32.mrb[5].mxu0 }
 0x3a8   :  { %v756_v38 = vadd.f32 %v6265_v34, %v755_v37 }
 0x3a9   :  { %978 = vrot.lane.b32.xlu1 %v8673_v36, %s8236_s11 }
 0x3aa   :  { %6703 = vmatprep.mubr.msk.f32.mxu1 %vm583_vm4, %v756_v38  ;;  %v8679_v39 = vpack.i.bf16 %v8673_v36, %v756_v38  ;;  %v6698_v40 = vpop.f32.mrb[6].mxu0 }
 0x3ab   :  { %v765_v41 = vpop.f32.mrb[7].mxu0  ;;  %v8700_v1 = vadd.f32 %v6698_v40, %v6265_v34 }
 0x3ac   :  { %7378 = vrot.lane.b32.xlu0 %v8679_v39, %s8237_s21  ;;  %v8702_v2 = vadd.f32 %v6265_v34, %v765_v41 }
 0x3ae   :  { %v8708_v3 = vpack.i.bf16 %v8700_v1, %v8702_v2 }
 0x3b0   :  { %976 = vrot.lane.b32.xlu0 %v756_v38, %s8236_s11 }
 0x41b   :  { %v979_v48 = vpop.permute.xlu1 %978 }
 0x41e   :  { %v7379_v42 = vpop.permute.xlu0 %7378 }
 0x41f   :  { %v7381_v43 = vunpack.i.h.bf16 %v7379_v42  ;;  %v7380_v44 = vunpack.i.l.bf16 %v7379_v42 }
 0x421   :  { %v7117_v46 = vpack.c.bf16 %v7381_v43, %v7380_v44 }
 0x422   :  { %v977_v47 = vpop.permute.xlu0 %976 }
 0x423   :  { %7119 = vmatprep.subr.msk.bf16.mxu0 %vm8686_vm5, %v7117_v46  ;;  %6717 = vmatprep.mubr.msk.f32.mxu0 %vm583_vm4, %v977_v47 }
 0x424   :  { %7122 = vmatpush3.bf16.xpose.msk.msra.mxu0 %vm8686_vm5, %v7117_v46 }
 0x42b   :  { %6718 = vmatmul.mubr.msk.f32.vlgmr.msra.gmra.mrb[8].mxu0 %vm583_vm4, %v979_v48 }
 0x4fe   :  { %v6719_v49 = vpop.f32.mrb[8].mxu0 }
 0x4ff   :  { %v1068_v50 = vmul.f32 0.25, %v6719_v49  ;;  %v1058_v51 = vpop.f32.mrb[9].mxu0 }
 0x500   :  { %v1067_v52 = vmul.f32 0.25, %v1058_v51 }
 0x501   :  { %v1072_v53 = vsel %vm583_vm4, %v1068_v50, -inf }
 0x502   :  { %1073 = vmax.xlane.f32.xlu0 %v1072_v53  ;;  %v1069_v54 = vsel %vm583_vm4, %v1067_v52, -inf }
 0x503   :  { %1070 = vmax.xlane.f32.xlu1 %v1069_v54 }
 0x58f   :  { %v1074_v55 = vpop.xlane.xlu0 %1073 }
 0x590   :  { %v1076_v56 = vsub.f32 %v1068_v50, %v1074_v55  ;;  %v1071_v57 = vpop.xlane.xlu1 %1070 }
 0x591   :  { %v1075_v58 = vsub.f32 %v1067_v52, %v1071_v57 }
 0x592   :  { %v1079_v59 = vmul.f32 1.442695, %v1076_v56 }
 0x593   :  { %v1077_v60 = vmul.f32 1.442695, %v1075_v58 }
 0x594   :  { %7463 = vpow2.f32 %v1079_v59 }
 0x595   :  { %7465 = vpow2.f32 %v1077_v60 }
 0x59e   :  { %v7464_v61 = vpop.eup %7463 }
 0x59f   :  { %v7466_v62 = vpop.eup %7465  ;;  %v1084_v63 = vsel %vm583_vm4, %v7464_v61, 0.0 }
 0x5a0   :  { %1085 = vadd.xlane.f32.xlu1 %v1084_v63  ;;  %v1081_v0 = vsel %vm583_vm4, %v7466_v62, 0.0 }
 0x5a1   :  { %1082 = vadd.xlane.f32.xlu0 %v1081_v0 }
 0x5b1   :  { %7388 = vrot.lane.b32.xlu1 %v8679_v39, %s8238_s18 }
 0x5b5   :  { %7393 = vrot.lane.b32.xlu1 %v8708_v3, %s8239_s14 }
 0x5b7   :  { %7383 = vrot.lane.b32.xlu0 %v8679_v39, %s8239_s14 }
 0x62d   :  { %v1086_v6 = vpop.xlane.xlu1 %1085 }
 0x62e   :  { %7467 = vrcp.f32 %v1086_v6  ;;  %v1083_v7 = vpop.xlane.xlu0 %1082 }
 0x62f   :  { %7469 = vrcp.f32 %v1083_v7 }
 0x631   :  { %v7389_v8 = vpop.permute.xlu1 %7388 }
 0x632   :  { %v7391_v9 = vunpack.i.h.bf16 %v7389_v8  ;;  %v7390_v10 = vunpack.i.l.bf16 %v7389_v8  ;;  %v7384_v12 = vpop.permute.xlu0 %7383 }
 0x633   :  { %v7386_v13 = vunpack.i.h.bf16 %v7384_v12  ;;  %v7385_v14 = vunpack.i.l.bf16 %v7384_v12 }
 0x634   :  { %v7123_v15 = vpack.c.bf16 %v7391_v9, %v7390_v10 }
 0x635   :  { %v7107_v16 = vpack.c.bf16 %v7386_v13, %v7385_v14  ;;  %v7394_v17 = vpop.permute.xlu1 %7393 }
 0x636   :  { %v7396_v18 = vunpack.i.h.bf16 %v7394_v17  ;;  %v7395_v19 = vunpack.i.l.bf16 %v7394_v17  ;;  %7124 = vmatprep.subr.bf16.mxu0 %v7123_v15 }
 0x637   :  { %7109 = vmatprep.subr.msk.bf16.mxu1 %vm8686_vm5, %v7107_v16  ;;  %7126 = vmatpush3.bf16.msra.mxu0 %v7123_v15 }
 0x638   :  { %v7468_v20 = vpop.eup %7467  ;;  %v7127_v21 = vpack.c.bf16 %v7396_v18, %v7395_v19  ;;  %7112 = vmatpush3.bf16.xpose.msk.msra.mxu1 %vm8686_vm5, %v7107_v16 }
 0x639   :  { %v7470_v24 = vpop.eup %7469  ;;  %v1090_v26 = vmul.f32 %v7468_v20, %v7464_v61 }
 0x63a   :  { %7129 = vmatprep.subr.msk.bf16.mxu0 %vm8686_vm5, %v7127_v21  ;;  %v1089_v25 = vmul.f32 %v7470_v24, %v7466_v62 }
 0x63c   :  { %6724 = vmatprep.mubr.msk.f32.mxu0 %vm583_vm4, %v1089_v25 }
 0x63d   :  { %6725 = vmatmul.mubr.msk.f32.vlgmr.msra.gmra.mrb[10].mxu0 %vm583_vm4, %v1090_v26 }
 0x63e   :  { %6731 = vmatprep.mubr.msk.f32.mxu0 %vm583_vm4, %v8702_v2 }
 0x63f   :  { %6704 = vmatmul.mubr.msk.f32.vlgmr.msra.gmra.mrb[2].mxu1 %vm583_vm4, %v8673_v36 }
 0x640   :  { %7132 = vmatpush3.bf16.xpose.msk.msra.mxu0 %vm8686_vm5, %v7127_v21 }
 0x647   :  { %6732 = vmatmul.mubr.msk.f32.vlgmr.msra.gmra.mrb[12].mxu0 %vm583_vm4, %v8700_v1 }
 0x710   :  { %v8732_v27 = vpop.f32.mrb[10].mxu0 }
 0x711   :  { %v8734_v28 = vpop.f32.mrb[11].mxu0 }
 0x712   :  { %v6705_v29 = vpop.f32.mrb[2].mxu1 }
 0x713   :  { %v864_v33 = vmul.f32 0.25, %v6705_v29  ;;  %v854_v34 = vpop.f32.mrb[3].mxu1 }
 0x714   :  { %v863_v35 = vmul.f32 0.25, %v854_v34 }
 0x715   :  { %v868_v37 = vsel %vm583_vm4, %v864_v33, -inf }
 0x716   :  { %869 = vmax.xlane.f32.xlu1 %v868_v37  ;;  %v865_v38 = vsel %vm583_vm4, %v863_v35, -inf }
 0x717   :  { %866 = vmax.xlane.f32.xlu0 %v865_v38 }
 0x71a   :  { %v6733_v36 = vpop.f32.mrb[12].mxu0 }
 0x71b   :  { %v1269_v40 = vpop.f32.mrb[13].mxu0  ;;  %v1279_v42 = vmul.f32 0.25, %v6733_v36 }
 0x71c   :  { %v1278_v41 = vmul.f32 0.25, %v1269_v40 }
 0x71d   :  { %v1283_v44 = vsel %vm583_vm4, %v1279_v42, -inf }
 0x71e   :  { %v1280_v43 = vsel %vm583_vm4, %v1278_v41, -inf }
 0x71f   :  { %1281 = vmax.xlane.f32.xlu0 %v1280_v43 }
 0x723   :  { %1284 = vmax.xlane.f32.xlu0 %v1283_v44 }
 0x7a3   :  { %v870_v46 = vpop.xlane.xlu1 %869 }
 0x7a4   :  { %v872_v47 = vsub.f32 %v864_v33, %v870_v46  ;;  %v867_v48 = vpop.xlane.xlu0 %866 }
 0x7a5   :  { %v871_v49 = vsub.f32 %v863_v35, %v867_v48 }
 0x7a6   :  { %v875_v50 = vmul.f32 1.442695, %v872_v47 }
 0x7a7   :  { %v873_v51 = vmul.f32 1.442695, %v871_v49 }
 0x7a8   :  { %7471 = vpow2.f32 %v875_v50 }
 0x7a9   :  { %7473 = vpow2.f32 %v873_v51 }
 0x7ac   :  { %v1282_v52 = vpop.xlane.xlu0 %1281 }
 0x7ad   :  { %v1286_v62 = vsub.f32 %v1278_v41, %v1282_v52 }
 0x7af   :  { %v1288_v63 = vmul.f32 1.442695, %v1286_v62 }
 0x7b0   :  { %v1285_v53 = vpop.xlane.xlu0 %1284 }
 0x7b1   :  { %v1287_v54 = vsub.f32 %v1279_v42, %v1285_v53 }
 0x7b2   :  { %v7472_v55 = vpop.eup %7471 }
 0x7b3   :  { %v7474_v56 = vpop.eup %7473  ;;  %v1290_v57 = vmul.f32 1.442695, %v1287_v54  ;;  %v880_v58 = vsel %vm583_vm4, %v7472_v55, 0.0 }
 0x7b4   :  { %881 = vadd.xlane.f32.xlu0 %v880_v58  ;;  %v877_v59 = vsel %vm583_vm4, %v7474_v56, 0.0 }
 0x7b5   :  { %7475 = vpow2.f32 %v1290_v57  ;;  %878 = vadd.xlane.f32.xlu1 %v877_v59 }
 0x7b6   :  { %7477 = vpow2.f32 %v1288_v63  ;;  %v1607_v63 = vld [vmem:[%s9462_s22] sm:$0xff] }
 0x7bf   :  { %v7476_v60 = vpop.eup %7475 }
 0x7c0   :  { %v1295_v61 = vsel %vm583_vm4, %v7476_v60, 0.0  ;;  %v7478_v0 = vpop.eup %7477 }
 0x7c1   :  { %1296 = vadd.xlane.f32.xlu0 %v1295_v61  ;;  %v1292_v5 = vsel %vm583_vm4, %v7478_v0, 0.0 }
 0x7c6   :  { %7398 = vrot.lane.b32.xlu1 %v8679_v39, %s8240_s6 }
 0x7ca   :  { %7408 = vrot.lane.b32.xlu1 %v8708_v3, %s8237_s21 }
 0x7d7   :  { %7403 = vrot.lane.b32.xlu0 %v8708_v3, %s8240_s6 }
 0x7db   :  { %1393 = vrot.lane.b32.xlu0 %v8700_v1, %s8236_s11 }
 0x7ee   :  { %1293 = vadd.xlane.f32.xlu1 %v1292_v5 }
 0x7ff   :  { %1391 = vrot.lane.b32.xlu1 %v8702_v2, %s8236_s11 }
 0x841   :  { %v882_v39 = vpop.xlane.xlu0 %881 }
 0x842   :  { %7479 = vrcp.f32 %v882_v39  ;;  %v879_v6 = vpop.xlane.xlu1 %878 }
 0x843   :  { %7481 = vrcp.f32 %v879_v6 }
 0x846   :  { %v7399_v7 = vpop.permute.xlu1 %7398 }
 0x847   :  { %v7401_v8 = vunpack.i.h.bf16 %v7399_v7  ;;  %v7400_v9 = vunpack.i.l.bf16 %v7399_v7  ;;  %v1609_v7 = vld [vmem:[%s9462_s22 + $0x10] sm:$0xff] }
 0x849   :  { %v7113_v10 = vpack.c.bf16 %v7401_v8, %v7400_v9  ;;  %v1610_v8 = vld [vmem:[%s9462_s22 + $0x18] sm:$0xff] }
 0x84a   :  { %v7409_v16 = vpop.permute.xlu1 %7408 }
 0x84b   :  { %7114 = vmatprep.subr.bf16.mxu1 %v7113_v10  ;;  %v7411_v17 = vunpack.i.h.bf16 %v7409_v16  ;;  %v7410_v18 = vunpack.i.l.bf16 %v7409_v16 }
 0x84c   :  { %v7480_v12 = vpop.eup %7479  ;;  %7116 = vmatpush3.bf16.msra.mxu1 %v7113_v10 }
 0x84d   :  { %v7482_v1 = vpop.eup %7481  ;;  %v886_v15 = vmul.f32 %v7480_v12, %v7472_v55  ;;  %v7137_v24 = vpack.c.bf16 %v7411_v17, %v7410_v18 }
 0x84e   :  { %v1297_v13 = vpop.xlane.xlu0 %1296  ;;  %v885_v14 = vmul.f32 %v7482_v1, %v7474_v56  ;;  %v7151_v1 = vpack.c.bf16 %v1610_v8, %v1609_v7  ;;  %v2008_v7 = vld [vmem:[%s9464_s26 + $0x10] sm:$0xff]  ;;  %v2009_v8 = vld [vmem:[%s9464_s26 + $0x18] sm:$0xff] }
 0x84f   :  { %7483 = vrcp.f32 %v1297_v13 }
 0x850   :  { %6710 = vmatprep.mubr.msk.f32.mxu1 %vm583_vm4, %v885_v14 }
 0x851   :  { %6711 = vmatmul.mubr.msk.f32.vlgmr.msra.gmra.mrb[4].mxu1 %vm583_vm4, %v886_v15 }
 0x852   :  { %v7404_v2 = vpop.permute.xlu0 %7403 }
 0x853   :  { %v7406_v19 = vunpack.i.h.bf16 %v7404_v2  ;;  %v7405_v20 = vunpack.i.l.bf16 %v7404_v2  ;;  %v8788_v2 = vld [vmem:[#allocation7] ss:$0 sm:$0xff] }
 0x855   :  { %v7133_v21 = vpack.c.bf16 %v7406_v19, %v7405_v20 }
 0x856   :  { %v1394_v37 = vpop.permute.xlu0 %1393 }
 0x857   :  { %7134 = vmatprep.subr.bf16.mxu1 %v7133_v21 }
 0x858   :  { %7136 = vmatpush3.bf16.msra.mxu1 %v7133_v21 }
 0x859   :  { %7139 = vmatprep.subr.msk.bf16.mxu1 %vm8686_vm5, %v7137_v24  ;;  %v7484_v26 = vpop.eup %7483 }
 0x85a   :  { %v1301_v34 = vmul.f32 %v7484_v26, %v7476_v60 }
 0x87b   :  { %v1294_v25 = vpop.xlane.xlu1 %1293 }
 0x87c   :  { %7485 = vrcp.f32 %v1294_v25 }
 0x87f   :  { %v1392_v35 = vpop.permute.xlu1 %1391 }
 0x886   :  { %v7486_v29 = vpop.eup %7485 }
 0x887   :  { %v1300_v33 = vmul.f32 %v7486_v29, %v7478_v0  ;;  %v1608_v0 = vld [vmem:[%s9462_s22 + $0x8] sm:$0xff] }
 0x888   :  { %v7147_v6 = vpack.c.bf16 %v1608_v0, %v1607_v63 }
 0x889   :  { %6738 = vmatprep.mubr.msk.f32.mxu1 %vm583_vm4, %v1300_v33 }
 0x88a   :  { %6739 = vmatmul.mubr.msk.f32.vlgmr.msra.gmra.mrb[6].mxu1 %vm583_vm4, %v1301_v34 }
 0x88b   :  { %7142 = vmatpush3.bf16.xpose.msk.msra.mxu1 %vm8686_vm5, %v7137_v24  ;;  %6745 = vmatprep.mubr.msk.f32.mxu1 %vm583_vm4, %v1392_v35 }
 0x892   :  { %6746 = vmatmul.mubr.msk.f32.vlgmr.msra.gmra.mrb[8].mxu1 %vm583_vm4, %v1394_v37 }
 0x924   :  { %v6712_v38 = vpop.f32.mrb[4].mxu1 }
 0x925   :  { %975 = vst.msk [vmem:[#allocation2 + $0x8] sm:$0xff] %vm583_vm4, %v6712_v38  ;;  %v965_v36 = vpop.f32.mrb[5].mxu1 }
 0x926   :  { %974 = vst.msk [vmem:[#allocation2] sm:$0xff] %vm583_vm4, %v965_v36 }
 0x95d   :  { %v6740_v40 = vpop.f32.mrb[6].mxu1 }
 0x95e   :  { %1390 = vst.msk [vmem:[#allocation2 + $0x18] sm:$0xff] %vm583_vm4, %v6740_v40  ;;  %v1380_v41 = vpop.f32.mrb[7].mxu1 }
 0x95f   :  { %1389 = vst.msk [vmem:[#allocation2 + $0x10] sm:$0xff] %vm583_vm4, %v1380_v41 }
 0x965   :  { %v6747_v42 = vpop.f32.mrb[8].mxu1 }
 0x966   :  { %v1483_v43 = vmul.f32 0.25, %v6747_v42  ;;  %v1473_v44 = vpop.f32.mrb[9].mxu1 }
 0x967   :  { %v1482_v46 = vmul.f32 0.25, %v1473_v44  ;;  %v1795_v44 = vld [vmem:[%s9463_s23 + $0x8] sm:$0xff] }
 0x968   :  { %v1487_v47 = vsel %vm583_vm4, %v1483_v43, -inf }
 0x969   :  { %1488 = vmax.xlane.f32.xlu0 %v1487_v47  ;;  %v1484_v48 = vsel %vm583_vm4, %v1482_v46, -inf  ;;  %v1796_v47 = vld [vmem:[%s9463_s23 + $0x10] sm:$0xff] }
 0x96a   :  { %1485 = vmax.xlane.f32.xlu1 %v1484_v48  ;;  %v1797_v48 = vld [vmem:[%s9463_s23 + $0x18] sm:$0xff] }
 0x9f6   :  { %v1489_v49 = vpop.xlane.xlu0 %1488 }
 0x9f7   :  { %v1491_v50 = vsub.f32 %v1483_v43, %v1489_v49  ;;  %v1486_v51 = vpop.xlane.xlu1 %1485  ;;  %v1794_v43 = vld [vmem:[%s9463_s23] sm:$0xff]  ;;  %v7159_v49 = vpack.c.bf16 %v1797_v48, %v1796_v47 }
 0x9f8   :  { %v1490_v52 = vsub.f32 %v1482_v46, %v1486_v51  ;;  %v7155_v46 = vpack.c.bf16 %v1795_v44, %v1794_v43 }
 0x9f9   :  { %v1494_v53 = vmul.f32 1.442695, %v1491_v50 }
 0x9fa   :  { %v1492_v54 = vmul.f32 1.442695, %v1490_v52  ;;  %7156 = vmatprep.subr.bf16.mxu1 %v7155_v46 }
 0x9fb   :  { %7487 = vpow2.f32 %v1494_v53  ;;  %7158 = vmatpush3.bf16.msra.mxu1 %v7155_v46 }
 0x9fc   :  { %7489 = vpow2.f32 %v1492_v54  ;;  %7160 = vmatprep.subr.bf16.mxu1 %v7159_v49 }
 0x9ff   :  { %7162 = vmatpush3.bf16.msra.mxu1 %v7159_v49 }
 0xa05   :  { %v7488_v55 = vpop.eup %7487 }
 0xa06   :  { %v7490_v56 = vpop.eup %7489  ;;  %v1499_v57 = vsel %vm583_vm4, %v7488_v55, 0.0 }
 0xa07   :  { %1500 = vadd.xlane.f32.xlu1 %v1499_v57  ;;  %v1496_v58 = vsel %vm583_vm4, %v7490_v56, 0.0 }
 0xa08   :  { %1497 = vadd.xlane.f32.xlu0 %v1496_v58  ;;  %v8807_v58 = vld [vmem:[#allocation8] ss:$0 sm:$0xff] }
 0xa18   :  { %1180 = vrot.lane.b32.xlu1 %v8734_v28, %s8207_s15 }
 0xa1c   :  { %1182 = vrot.lane.b32.xlu1 %v8732_v27, %s8207_s15 }
 0xa1e   :  { %7413 = vrot.lane.b32.xlu0 %v8708_v3, %s8238_s18 }
 0xa94   :  { %v1501_v59 = vpop.xlane.xlu1 %1500 }
 0xa95   :  { %7491 = vrcp.f32 %v1501_v59  ;;  %v1498_v60 = vpop.xlane.xlu0 %1497 }
 0xa96   :  { %7493 = vrcp.f32 %v1498_v60 }
 0xa98   :  { %v1181_v61 = vpop.permute.xlu1 %1180 }
 0xa99   :  { %1187 = vst.msk [vmem:[#allocation2] sm:$0xff] %vm1186_vm6, %v1181_v61  ;;  %v7414_v62 = vpop.permute.xlu0 %7413  ;;  %v8810_v61 = vld [vmem:[#allocation10] ss:$0 sm:$0xff] }
 0xa9a   :  { %v7416_v28 = vunpack.i.h.bf16 %v7414_v62  ;;  %v7415_v5 = vunpack.i.l.bf16 %v7414_v62 }
 0xa9c   :  { %v1183_v39 = vpop.permute.xlu1 %1182  ;;  %v7143_v27 = vpack.c.bf16 %v7416_v28, %v7415_v5 }
 0xa9d   :  { %1188 = vst.msk [vmem:[#allocation2 + $0x8] sm:$0xff] %vm1186_vm6, %v1183_v39 }
 0xa9e   :  { %7144 = vmatprep.subr.bf16.mxu0 %v7143_v27 }
 0xa9f   :  { %v7492_v3 = vpop.eup %7491  ;;  %7146 = vmatpush3.bf16.msra.mxu0 %v7143_v27  ;;  %v2006_v27 = vld [vmem:[%s9464_s26] sm:$0xff] }
 0xaa0   :  { %v7494_v9 = vpop.eup %7493  ;;  %7148 = vmatprep.subr.bf16.mxu0 %v7147_v6  ;;  %v1505_v12 = vmul.f32 %v7492_v3, %v7488_v55  ;;  %v1603_v13 = vld [vmem:[#allocation2] sm:$0xff] }
 0xaa1   :  { %v1504_v10 = vmul.f32 %v7494_v9, %v7490_v56  ;;  %v7167_v9 = vpack.c.bf16 %v2009_v8, %v2008_v7 }
 0xaa3   :  { %6752 = vmatprep.mubr.msk.f32.mxu0 %vm583_vm4, %v1504_v10 }
 0xaa4   :  { %6753 = vmatmul.mubr.msk.f32.vlgmr.msra.gmra.mrb[14].mxu0 %vm583_vm4, %v1505_v12  ;;  %v1604_v14 = vld [vmem:[#allocation2 + $0x8] sm:$0xff] }
 0xaa5   :  { %7150 = vmatpush3.bf16.msra.mxu0 %v7147_v6  ;;  %6763 = vmatprep.mubr.msk.f32.mxu0 %vm676_vm2, %v1603_v13  ;;  %v2007_v6 = vld [vmem:[%s9464_s26 + $0x8] sm:$0xff] }
 0xaa6   :  { %7152 = vmatprep.subr.bf16.mxu0 %v7151_v1  ;;  %v7163_v3 = vpack.c.bf16 %v2007_v6, %v2006_v27 }
 0xaa9   :  { %7154 = vmatpush3.bf16.msra.mxu0 %v7151_v1 }
 0xaaa   :  { %7164 = vmatprep.subr.bf16.mxu0 %v7163_v3 }
 0xaac   :  { %6764 = vmatmul.mubr.msk.f32.vlgmr.msra.gmra.mrb[16].mxu0 %vm676_vm2, %v1604_v14 }
 0xaad   :  { %7166 = vmatpush3.bf16.msra.mxu0 %v7163_v3  ;;  %v8241_v3 = vmov -1.0  }
 0xaae   :  { %7168 = vmatprep.subr.bf16.mxu0 %v7167_v9 }
 0xab1   :  { %7170 = vmatpush3.bf16.msra.mxu0 %v7167_v9 }
 0xb77   :  { %v6754_v15 = vpop.f32.mrb[14].mxu0 }
 0xb78   :  { %v1584_v16 = vpop.f32.mrb[15].mxu0 }
 0xb7f   :  { %v6765_v17 = vpop.f32.mrb[16].mxu0 }
 0xb80   :  { %v1702_v18 = vadd.f32 %v6765_v17, %v8788_v2  ;;  %v1696_v19 = vpop.f32.mrb[17].mxu0 }
 0xb81   :  { %v1697_v20 = vadd.f32 %v8788_v2, %v1696_v19 }
 0xb82   :  { %v1716_v21 = vadd.f32 %v1702_v18, %v8653_v23  ;;  %v8840_v18 = vld [vmem:[#allocation11] ss:$0 sm:$0xff] }
 0xb83   :  { %v1715_v24 = vadd.f32 %v1697_v20, %v8651_v22 }
 0xb84   :  { %v1724_v25 = vsel %vm676_vm2, %v1716_v21, 0.0 }
 0xb85   :  { %1725 = vadd.xlane.f32.xlu1 %v1724_v25  ;;  %v1721_v26 = vsel %vm676_vm2, %v1715_v24, 0.0 }
 0xb86   :  { %1722 = vadd.xlane.f32.xlu0 %v1721_v26 }
 0xb96   :  { %1595 = vrot.lane.b32.xlu1 %v1584_v16, %s8207_s15 }
 0xc12   :  { %v1726_v29 = vpop.xlane.xlu1 %1725 }
 0xc13   :  { %v1735_v33 = vmul.f32 0.03125, %v1726_v29  ;;  %v1723_v34 = vpop.xlane.xlu0 %1722 }
 0xc14   :  { %v1734_v35 = vmul.f32 0.03125, %v1723_v34 }
 0xc15   :  { %v1739_v37 = vsub.f32 %v1716_v21, %v1735_v33 }
 0xc16   :  { %v1738_v38 = vsub.f32 %v1715_v24, %v1734_v35  ;;  %v1596_v36 = vpop.permute.xlu1 %1595 }
 0xc17   :  { %1601 = vst.msk [vmem:[#allocation2 + $0x10] sm:$0xff] %vm1186_vm6, %v1596_v36  ;;  %v1743_v40 = vmul.f32 %v1739_v37, %v1739_v37 }
 0xc18   :  { %v1742_v22 = vmul.f32 %v1738_v38, %v1738_v38 }
 0xc19   :  { %v1749_v41 = vsel %vm676_vm2, %v1743_v40, 0.0 }
 0xc1a   :  { %v1746_v23 = vsel %vm676_vm2, %v1742_v22, 0.0 }
 0xc1b   :  { %1747 = vadd.xlane.f32.xlu0 %v1746_v23 }
 0xc1e   :  { %v1605_v42 = vld [vmem:[#allocation2 + $0x10] sm:$0xff] }
 0xc1f   :  { %1750 = vadd.xlane.f32.xlu0 %v1749_v41  ;;  %6766 = vmatprep.mubr.msk.f32.mxu0 %vm676_vm2, %v1605_v42 }
 0xc35   :  { %1597 = vrot.lane.b32.xlu0 %v6754_v15, %s8207_s15 }
 0xca8   :  { %v1748_v50 = vpop.xlane.xlu0 %1747 }
 0xca9   :  { %v1758_v51 = vmul.f32 0.03125, %v1748_v50 }
 0xcab   :  { %v1762_v52 = vadd.f32 1e-05, %v1758_v51 }
 0xcac   :  { %v1751_v53 = vpop.xlane.xlu0 %1750 }
 0xcad   :  { %7495 = vrsqrt.f32 %v1762_v52  ;;  %v1759_v54 = vmul.f32 0.03125, %v1751_v53 }
 0xcaf   :  { %v1763_v55 = vadd.f32 1e-05, %v1759_v54 }
 0xcb0   :  { %v1598_v56 = vpop.permute.xlu0 %1597 }
 0xcb1   :  { %7497 = vrsqrt.f32 %v1763_v55  ;;  %1602 = vst.msk [vmem:[#allocation2 + $0x18] sm:$0xff] %vm1186_vm6, %v1598_v56 }
 0xcb7   :  { %v7496_v57 = vpop.eup %7495 }
 0xcb8   :  { %v1606_v59 = vld [vmem:[#allocation2 + $0x18] sm:$0xff]  ;;  %v1770_v60 = vmul.f32 %v7496_v57, %v1738_v38 }
 0xcb9   :  { %6767 = vmatmul.mubr.msk.f32.gmra.mrb[18].mxu0 %vm676_vm2, %v1606_v59 }
 0xcba   :  { %v1780_v62 = vmul.f32 %v8807_v58, %v1770_v60 }
 0xcbb   :  { %v7498_v63 = vpop.eup %7497 }
 0xcbc   :  { %v1771_v0 = vmul.f32 %v7498_v63, %v1739_v37  ;;  %v8814_v28 = vadd.f32 %v8810_v61, %v1780_v62 }
 0xcbe   :  { %6777 = vmatprep.mubr.msk.f32.mxu1 %vm676_vm2, %v8814_v28  ;;  %v1781_v5 = vmul.f32 %v8807_v58, %v1771_v0 }
 0xcc0   :  { %v8820_v39 = vadd.f32 %v8810_v61, %v1781_v5 }
 0xcc2   :  { %6778 = vmatmul.mubr.msk.f32.vlgmr.msra.gmra.mrb[10].mxu1 %vm676_vm2, %v8820_v39 }
 0xd8c   :  { %v6768_v10 = vpop.f32.mrb[18].mxu0 }
 0xd8d   :  { %v1712_v12 = vadd.f32 %v6768_v10, %v8788_v2  ;;  %v1706_v1 = vpop.f32.mrb[19].mxu0 }
 0xd8e   :  { %v1707_v13 = vadd.f32 %v8788_v2, %v1706_v1 }
 0xd8f   :  { %v8831_v14 = vadd.f32 %v1712_v12, %v8661_v30 }
 0xd90   :  { %v8834_v15 = vadd.f32 %v1707_v13, %v8663_v31 }
 0xd91   :  { %v1730_v16 = vsel %vm676_vm2, %v8831_v14, 0.0 }
 0xd92   :  { %1731 = vadd.xlane.f32.xlu0 %v1730_v16  ;;  %v1727_v17 = vsel %vm676_vm2, %v8834_v15, 0.0 }
 0xd93   :  { %1728 = vadd.xlane.f32.xlu1 %v1727_v17 }
 0xd95   :  { %v6779_v19 = vpop.f32.mrb[10].mxu1 }
 0xd96   :  { %v1889_v20 = vadd.f32 %v6779_v19, %v8840_v18  ;;  %v1883_v2 = vpop.f32.mrb[11].mxu1 }
 0xd97   :  { %v1884_v30 = vadd.f32 %v8840_v18, %v1883_v2 }
 0xd98   :  { %v1907_v21 = vmul.f32 0.70710677, %v1889_v20  ;;  %v1903_v17 = vmul.f32 0.5, %v1889_v20 }
 0xd99   :  { %v1906_v24 = vmul.f32 0.70710677, %v1884_v30  ;;  %v1902_v13 = vmul.f32 0.5, %v1884_v30 }
 0xd9a   :  { %v1919_v31 = vand.u32 2147483647, %v1907_v21  ;;  %vm1911_vm7 = vcmp.ge.f32.partialorder %v1907_v21, 0.0 }
 0xd9b   :  { %v1918_v25 = vand.u32 2147483647, %v1906_v24  ;;  %vm1910_vm8 = vcmp.ge.f32.partialorder %v1906_v24, 0.0  ;;  %v1915_v7 = vsel %vm1911_vm7, 1.0, %v8241_v3 }
 0xd9c   :  { %v1923_v26 = vmul.f32 0.3275911, %v1919_v31  ;;  %v1971_v35 = vsub.f32 0.0, %v1919_v31  ;;  %v1914_v10 = vsel %vm1910_vm8, 1.0, %v8241_v3 }
 0xd9d   :  { %v1922_v29 = vmul.f32 0.3275911, %v1918_v25  ;;  %v1970_v37 = vsub.f32 0.0, %v1918_v25 }
 0xd9e   :  { %v1927_v33 = vadd.f32 1.0, %v1923_v26  ;;  %v1975_v36 = vmul.f32 %v1971_v35, %v1919_v31  ;;  %v8852_v35 = vld [vmem:[#allocation13] ss:$0 sm:$0xff] }
 0xd9f   :  { %v1926_v34 = vadd.f32 1.0, %v1922_v29  ;;  %v1974_v40 = vmul.f32 %v1970_v37, %v1918_v25 }
 0xda0   :  { %7499 = vrcp.f32 %v1927_v33  ;;  %v1980_v43 = vmul.f32 1.442695, %v1975_v36 }
 0xda1   :  { %7501 = vrcp.f32 %v1926_v34  ;;  %v1978_v47 = vmul.f32 1.442695, %v1974_v40 }
 0xda2   :  { %7503 = vpow2.f32 %v1980_v43 }
 0xda3   :  { %7505 = vpow2.f32 %v1978_v47 }
 0xdaa   :  { %v7500_v38 = vpop.eup %7499 }
 0xdab   :  { %v7502_v22 = vpop.eup %7501  ;;  %v1935_v23 = vmul.f32 1.0614054, %v7500_v38 }
 0xdac   :  { %v1934_v41 = vmul.f32 1.0614054, %v7502_v22  ;;  %v7504_v62 = vpop.eup %7503 }
 0xdad   :  { %v1939_v42 = vadd.f32 -1.4531521, %v1935_v23  ;;  %v7506_v0 = vpop.eup %7505 }
 0xdae   :  { %v1938_v44 = vadd.f32 -1.4531521, %v1934_v41 }
 0xdaf   :  { %v1943_v46 = vmul.f32 %v7500_v38, %v1939_v42 }
 0xdb0   :  { %v1942_v48 = vmul.f32 %v7502_v22, %v1938_v44 }
 0xdb1   :  { %v1947_v49 = vadd.f32 1.4214138, %v1943_v46 }
 0xdb2   :  { %v1946_v50 = vadd.f32 1.4214138, %v1942_v48 }
 0xdb3   :  { %v1951_v51 = vmul.f32 %v7500_v38, %v1947_v49 }
 0xdb4   :  { %v1950_v52 = vmul.f32 %v7502_v22, %v1946_v50 }
 0xdb5   :  { %v1955_v53 = vadd.f32 -0.28449672, %v1951_v51 }
 0xdb6   :  { %v1954_v54 = vadd.f32 -0.28449672, %v1950_v52 }
 0xdb7   :  { %v1959_v55 = vmul.f32 %v7500_v38, %v1955_v53 }
 0xdb8   :  { %v1958_v56 = vmul.f32 %v7502_v22, %v1954_v54 }
 0xdb9   :  { %v1963_v57 = vadd.f32 0.2548296, %v1959_v55 }
 0xdba   :  { %v1962_v59 = vadd.f32 0.2548296, %v1958_v56 }
 0xdbb   :  { %v1967_v60 = vmul.f32 %v7500_v38, %v1963_v57 }
 0xdbc   :  { %v1966_v63 = vmul.f32 %v7502_v22, %v1962_v59 }
 0xdbd   :  { %v1987_v5 = vmul.f32 %v7504_v62, %v1967_v60 }
 0xdbe   :  { %v1986_v27 = vmul.f32 %v7506_v0, %v1966_v63  ;;  %v6313_v0 = vld [vmem:[%s9456_s16 + $0x20] sm:$0xff] }
 0xdbf   :  { %v1991_v6 = vsub.f32 1.0, %v1987_v5  ;;  %v6314_v5 = vld [vmem:[%s9456_s16 + $0x28] sm:$0xff] }
 0xdc0   :  { %v1990_v8 = vsub.f32 1.0, %v1986_v27  ;;  %v7171_v27 = vpack.c.bf16 %v6314_v5, %v6313_v0 }
 0xdc1   :  { %v1995_v9 = vmul.f32 %v1991_v6, %v1915_v7  ;;  %v6315_v6 = vld [vmem:[%s9456_s16 + $0x30] sm:$0xff]  ;;  %v6316_v7 = vld [vmem:[%s9456_s16 + $0x38] sm:$0xff] }
 0xdc2   :  { %v1994_v12 = vmul.f32 %v1990_v8, %v1914_v10  ;;  %7172 = vmatprep.subr.bf16.mxu1 %v7171_v27  ;;  %v7175_v8 = vpack.c.bf16 %v6316_v7, %v6315_v6 }
 0xdc3   :  { %v1999_v1 = vadd.f32 1.0, %v1995_v9  ;;  %7174 = vmatpush3.bf16.msra.mxu1 %v7171_v27 }
 0xdc4   :  { %v1998_v16 = vadd.f32 1.0, %v1994_v12  ;;  %7176 = vmatprep.subr.bf16.mxu1 %v7175_v8 }
 0xdc5   :  { %v2003_v2 = vmul.f32 %v1999_v1, %v1903_v17 }
 0xdc6   :  { %v2002_v19 = vmul.f32 %v1998_v16, %v1902_v13 }
 0xdc7   :  { %7178 = vmatpush3.bf16.msra.mxu1 %v7175_v8 }
 0xdc8   :  { %6791 = vmatprep.mubr.msk.f32.mxu0 %vm676_vm2, %v2002_v19 }
 0xdc9   :  { %6792 = vmatmul.mubr.msk.f32.vlgmr.msra.gmra.mrb[20].mxu0 %vm676_vm2, %v2003_v2 }
 0xe1f   :  { %v1732_v21 = vpop.xlane.xlu0 %1731 }
 0xe20   :  { %v1737_v24 = vmul.f32 0.03125, %v1732_v21  ;;  %v1729_v31 = vpop.xlane.xlu1 %1728 }
 0xe21   :  { %v1736_v25 = vmul.f32 0.03125, %v1729_v31 }
 0xe22   :  { %v1741_v26 = vsub.f32 %v8831_v14, %v1737_v24 }
 0xe23   :  { %v1740_v29 = vsub.f32 %v8834_v15, %v1736_v25 }
 0xe24   :  { %v1745_v33 = vmul.f32 %v1741_v26, %v1741_v26 }
 0xe25   :  { %v1744_v34 = vmul.f32 %v1740_v29, %v1740_v29 }
 0xe26   :  { %v1755_v30 = vsel %vm676_vm2, %v1745_v33, 0.0 }
 0xe27   :  { %1756 = vadd.xlane.f32.xlu0 %v1755_v30  ;;  %v1752_v20 = vsel %vm676_vm2, %v1744_v34, 0.0 }
 0xe28   :  { %1753 = vadd.xlane.f32.xlu1 %v1752_v20 }
 0xe9c   :  { %v6793_v37 = vpop.f32.mrb[20].mxu0 }
 0xe9d   :  { %v2101_v38 = vadd.f32 %v6793_v37, %v8852_v35  ;;  %v2095_v36 = vpop.f32.mrb[21].mxu0 }
 0xe9e   :  { %v2096_v22 = vadd.f32 %v8852_v35, %v2095_v36 }
 0xe9f   :  { %v2115_v14 = vadd.f32 %v2101_v38, %v8820_v39 }
 0xea0   :  { %v2114_v15 = vadd.f32 %v2096_v22, %v8814_v28 }
 0xea1   :  { %v2123_v23 = vsel %vm676_vm2, %v2115_v14, 0.0 }
 0xea2   :  { %2124 = vadd.xlane.f32.xlu0 %v2123_v23  ;;  %v2120_v40 = vsel %vm676_vm2, %v2114_v15, 0.0 }
 0xea3   :  { %2121 = vadd.xlane.f32.xlu1 %v2120_v40 }
 0xeb4   :  { %v1757_v41 = vpop.xlane.xlu0 %1756 }
 0xeb5   :  { %v1761_v42 = vmul.f32 0.03125, %v1757_v41  ;;  %v1754_v43 = vpop.xlane.xlu1 %1753 }
 0xeb6   :  { %v1760_v44 = vmul.f32 0.03125, %v1754_v43 }
 0xeb7   :  { %v1765_v46 = vadd.f32 1e-05, %v1761_v42 }
 0xeb8   :  { %v1764_v47 = vadd.f32 1e-05, %v1760_v44 }
 0xeb9   :  { %7507 = vrsqrt.f32 %v1765_v46 }
 0xeba   :  { %7509 = vrsqrt.f32 %v1764_v47 }
 0xec3   :  { %v7508_v48 = vpop.eup %7507 }
 0xec4   :  { %v7510_v49 = vpop.eup %7509  ;;  %v1773_v50 = vmul.f32 %v7508_v48, %v1741_v26 }
 0xec5   :  { %v1772_v39 = vmul.f32 %v7510_v49, %v1740_v29 }
 0xec6   :  { %v1783_v28 = vmul.f32 %v8807_v58, %v1773_v50 }
 0xec7   :  { %v1782_v51 = vmul.f32 %v8807_v58, %v1772_v39 }
 0xec8   :  { %v8866_v53 = vadd.f32 %v8810_v61, %v1783_v28 }
 0xec9   :  { %v8863_v52 = vadd.f32 %v8810_v61, %v1782_v51 }
 0xecb   :  { %6780 = vmatprep.mubr.msk.f32.mxu1 %vm676_vm2, %v8863_v52 }
 0xecc   :  { %6781 = vmatmul.mubr.msk.f32.gmra.mrb[12].mxu1 %vm676_vm2, %v8866_v53 }
 0xf2f   :  { %v2125_v54 = vpop.xlane.xlu0 %2124 }
 0xf30   :  { %v2133_v55 = vmul.f32 0.03125, %v2125_v54  ;;  %v2122_v56 = vpop.xlane.xlu1 %2121 }
 0xf31   :  { %v2132_v58 = vmul.f32 0.03125, %v2122_v56 }
 0xf32   :  { %v8872_v57 = vsub.f32 %v2115_v14, %v2133_v55 }
 0xf33   :  { %v8874_v59 = vsub.f32 %v2114_v15, %v2132_v58 }
 0xf34   :  { %v2141_v61 = vmul.f32 %v8872_v57, %v8872_v57 }
 0xf35   :  { %v2140_v60 = vmul.f32 %v8874_v59, %v8874_v59 }
 0xf36   :  { %v2147_v62 = vsel %vm676_vm2, %v2141_v61, 0.0 }
 0xf37   :  { %2148 = vadd.xlane.f32.xlu0 %v2147_v62  ;;  %v2144_v63 = vsel %vm676_vm2, %v2140_v60, 0.0 }
 0xf38   :  { %2145 = vadd.xlane.f32.xlu1 %v2144_v63 }
 0xf9f   :  { %v6782_v9 = vpop.f32.mrb[12].mxu1 }
 0xfa0   :  { %v8887_v10 = vadd.f32 %v6782_v9, %v8840_v18  ;;  %v1893_v12 = vpop.f32.mrb[13].mxu1 }
 0xfa1   :  { %v1894_v1 = vadd.f32 %v8840_v18, %v1893_v12 }
 0xfa2   :  { %v1909_v13 = vmul.f32 0.70710677, %v8887_v10 }
 0xfa3   :  { %v1908_v16 = vmul.f32 0.70710677, %v1894_v1  ;;  %v1904_v12 = vmul.f32 0.5, %v1894_v1 }
 0xfa4   :  { %v1921_v17 = vand.u32 2147483647, %v1909_v13  ;;  %vm1913_vm9 = vcmp.ge.f32.partialorder %v1909_v13, 0.0  ;;  %v1905_v13 = vmul.f32 0.5, %v8887_v10 }
 0xfa5   :  { %v1920_v19 = vand.u32 2147483647, %v1908_v16  ;;  %vm1912_vm10 = vcmp.ge.f32.partialorder %v1908_v16, 0.0  ;;  %v1917_v5 = vsel %vm1913_vm9, 1.0, %v8241_v3 }
 0xfa6   :  { %v1925_v2 = vmul.f32 0.3275911, %v1921_v17  ;;  %v1973_v25 = vsub.f32 0.0, %v1921_v17  ;;  %v1916_v7 = vsel %vm1912_vm10, 1.0, %v8241_v3 }
 0xfa7   :  { %v1924_v21 = vmul.f32 0.3275911, %v1920_v19  ;;  %v1972_v26 = vsub.f32 0.0, %v1920_v19 }
 0xfa8   :  { %v1929_v24 = vadd.f32 1.0, %v1925_v2  ;;  %v1977_v33 = vmul.f32 %v1973_v25, %v1921_v17 }
 0xfa9   :  { %v1928_v31 = vadd.f32 1.0, %v1924_v21  ;;  %v1976_v20 = vmul.f32 %v1972_v26, %v1920_v19  ;;  %v8896_v21 = vld [vmem:[#allocation14] ss:$0 sm:$0xff]  ;;  %v8900_v26 = vld [vmem:[#allocation16] ss:$0 sm:$0xff] }
 0xfaa   :  { %7511 = vrcp.f32 %v1929_v24  ;;  %v1984_v38 = vmul.f32 1.442695, %v1977_v33 }
 0xfab   :  { %7513 = vrcp.f32 %v1928_v31  ;;  %v1982_v14 = vmul.f32 1.442695, %v1976_v20 }
 0xfac   :  { %7515 = vpow2.f32 %v1984_v38 }
 0xfad   :  { %7517 = vpow2.f32 %v1982_v14 }
 0xfb4   :  { %v7512_v29 = vpop.eup %7511 }
 0xfb5   :  { %v7514_v34 = vpop.eup %7513  ;;  %v1937_v30 = vmul.f32 1.0614054, %v7512_v29 }
 0xfb6   :  { %v1936_v37 = vmul.f32 1.0614054, %v7514_v34  ;;  %v7516_v54 = vpop.eup %7515 }
 0xfb7   :  { %v1941_v18 = vadd.f32 -1.4531521, %v1937_v30  ;;  %v7518_v58 = vpop.eup %7517 }
 0xfb8   :  { %v1940_v36 = vadd.f32 -1.4531521, %v1936_v37 }
 0xfb9   :  { %v1945_v22 = vmul.f32 %v7512_v29, %v1941_v18 }
 0xfba   :  { %v1944_v15 = vmul.f32 %v7514_v34, %v1940_v36 }
 0xfbb   :  { %v1949_v23 = vadd.f32 1.4214138, %v1945_v22 }
 0xfbc   :  { %v1948_v40 = vadd.f32 1.4214138, %v1944_v15 }
 0xfbd   :  { %v1953_v41 = vmul.f32 %v7512_v29, %v1949_v23 }
 0xfbe   :  { %v1952_v42 = vmul.f32 %v7514_v34, %v1948_v40 }
 0xfbf   :  { %v1957_v43 = vadd.f32 -0.28449672, %v1953_v41 }
 0xfc0   :  { %v1956_v44 = vadd.f32 -0.28449672, %v1952_v42 }
 0xfc1   :  { %v1961_v46 = vmul.f32 %v7512_v29, %v1957_v43 }
 0xfc2   :  { %v1960_v47 = vmul.f32 %v7514_v34, %v1956_v44 }
 0xfc3   :  { %v1965_v48 = vadd.f32 0.2548296, %v1961_v46 }
 0xfc4   :  { %v1964_v49 = vadd.f32 0.2548296, %v1960_v47  ;;  %v2149_v50 = vpop.xlane.xlu0 %2148 }
 0xfc5   :  { %v1969_v39 = vmul.f32 %v7512_v29, %v1965_v48  ;;  %v2157_v28 = vmul.f32 0.03125, %v2149_v50  ;;  %v2146_v51 = vpop.xlane.xlu1 %2145 }
 0xfc6   :  { %v1968_v55 = vmul.f32 %v7514_v34, %v1964_v49  ;;  %v2156_v56 = vmul.f32 0.03125, %v2146_v51  ;;  %v8914_v34 = vld [vmem:[#allocation5 + $0x1] ss:$0 sm:$0xff] }
 0xfc7   :  { %v1989_v61 = vmul.f32 %v7516_v54, %v1969_v39  ;;  %v2161_v60 = vadd.f32 1e-05, %v2157_v28 }
 0xfc8   :  { %v1988_v62 = vmul.f32 %v7518_v58, %v1968_v55  ;;  %v2160_v63 = vadd.f32 1e-05, %v2156_v56 }
 0xfc9   :  { %v1993_v0 = vsub.f32 1.0, %v1989_v61  ;;  %7519 = vrsqrt.f32 %v2161_v60 }
 0xfca   :  { %v1992_v27 = vsub.f32 1.0, %v1988_v62  ;;  %7521 = vrsqrt.f32 %v2160_v63 }
 0xfcb   :  { %v1997_v6 = vmul.f32 %v1993_v0, %v1917_v5 }
 0xfcc   :  { %v1996_v8 = vmul.f32 %v1992_v27, %v1916_v7 }
 0xfcd   :  { %v2001_v9 = vadd.f32 1.0, %v1997_v6 }
 0xfce   :  { %v2000_v17 = vadd.f32 1.0, %v1996_v8 }
 0xfcf   :  { %v2005_v2 = vmul.f32 %v2001_v9, %v1905_v13 }
 0xfd0   :  { %v2004_v19 = vmul.f32 %v2000_v17, %v1904_v12 }
 0xfd2   :  { %6794 = vmatprep.mubr.msk.f32.mxu0 %vm676_vm2, %v2004_v19 }
 0xfd3   :  { %v7520_v16 = vpop.eup %7519  ;;  %6795 = vmatmul.mubr.msk.f32.gmra.mrb[22].mxu0 %vm676_vm2, %v2005_v2 }
 0xfd4   :  { %v7522_v24 = vpop.eup %7521  ;;  %v2169_v31 = vmul.f32 %v7520_v16, %v8872_v57 }
 0xfd5   :  { %v2168_v25 = vmul.f32 %v7522_v24, %v8874_v59 }
 0xfd6   :  { %v2179_v1 = vmul.f32 %v8896_v21, %v2169_v31 }
 0xfd7   :  { %v2178_v10 = vmul.f32 %v8896_v21, %v2168_v25 }
 0xfd8   :  { %v8908_v33 = vadd.f32 %v8900_v26, %v2179_v1 }
 0xfd9   :  { %v8905_v29 = vadd.f32 %v8900_v26, %v2178_v10 }
 0xfdb   :  { %6805 = vmatprep.mubr.msk.f32.mxu1 %vm676_vm2, %v8905_v29 }
 0xfdc   :  { %6806 = vmatmul.mubr.msk.f32.vlgmr.msra.gmra.mrb[14].mxu1 %vm676_vm2, %v8908_v33 }
0x10a6   :  { %v6796_v57 = vpop.f32.mrb[22].mxu0 }
0x10a7   :  { %v2105_v59 = vpop.f32.mrb[23].mxu0  ;;  %v2111_v36 = vadd.f32 %v6796_v57, %v8852_v35 }
0x10a8   :  { %v2106_v22 = vadd.f32 %v8852_v35, %v2105_v59 }
0x10a9   :  { %v2117_v14 = vadd.f32 %v2111_v36, %v8866_v53 }
0x10aa   :  { %v2116_v15 = vadd.f32 %v2106_v22, %v8863_v52 }
0x10ab   :  { %v2129_v23 = vsel %vm676_vm2, %v2117_v14, 0.0 }
0x10ac   :  { %v2126_v40 = vsel %vm676_vm2, %v2116_v15, 0.0 }
0x10af   :  { %v6807_v30 = vpop.f32.mrb[14].mxu1 }
0x10b0   :  { %v2289_v20 = vadd.f32 %v6807_v30, %v8914_v34  ;;  %v2283_v37 = vpop.f32.mrb[15].mxu1 }
0x10b1   :  { %v2284_v18 = vadd.f32 %v8914_v34, %v2283_v37 }
0x10b3   :  { %6815 = vmatprep.mubr.msk.f32.mxu0 %vm583_vm4, %v2284_v18  ;;  %v8919_v38 = vpack.i.bf16 %v2289_v20, %v2284_v18 }
0x10b5   :  { %7423 = vrot.lane.b32.xlu0 %v8919_v38, %s8237_s21  ;;  %7418 = vrot.lane.b32.xlu1 %v8919_v38, %s8239_s14 }
0x10b9   :  { %2504 = vrot.lane.b32.xlu0 %v2284_v18, %s8236_s11 }
0x10d8   :  { %2130 = vadd.xlane.f32.xlu0 %v2129_v23 }
0x10d9   :  { %2127 = vadd.xlane.f32.xlu1 %v2126_v40 }
0x10ea   :  { %2506 = vrot.lane.b32.xlu1 %v2289_v20, %s8236_s11 }
0x1127   :  { %v7424_v41 = vpop.permute.xlu0 %7423  ;;  %v7419_v42 = vpop.permute.xlu1 %7418 }
0x1128   :  { %v7426_v43 = vunpack.i.h.bf16 %v7424_v41  ;;  %v7425_v44 = vunpack.i.l.bf16 %v7424_v41  ;;  %v7421_v46 = vunpack.i.h.bf16 %v7419_v42  ;;  %v7420_v47 = vunpack.i.l.bf16 %v7419_v42 }
0x112a   :  { %v7179_v48 = vpack.c.bf16 %v7421_v46, %v7420_v47  ;;  %v7189_v35 = vpack.c.bf16 %v7426_v43, %v7425_v44 }
0x112b   :  { %v2505_v52 = vpop.permute.xlu0 %2504 }
0x112c   :  { %7181 = vmatprep.subr.msk.bf16.mxu0 %vm8686_vm5, %v7179_v48 }
0x112d   :  { %7184 = vmatpush3.bf16.xpose.msk.msra.mxu0 %vm8686_vm5, %v7179_v48 }
0x112e   :  { %7191 = vmatprep.subr.msk.bf16.mxu0 %vm8686_vm5, %v7189_v35 }
0x1134   :  { %6816 = vmatmul.mubr.msk.f32.vlgmr.msra.gmra.mrb[24].mxu0 %vm583_vm4, %v2289_v20 }
0x1135   :  { %7194 = vmatpush3.bf16.xpose.msk.msra.mxu0 %vm8686_vm5, %v7189_v35  ;;  %6829 = vmatprep.mubr.msk.f32.mxu0 %vm583_vm4, %v2505_v52 }
0x1165   :  { %v2131_v53 = vpop.xlane.xlu0 %2130 }
0x1166   :  { %v2135_v49 = vmul.f32 0.03125, %v2131_v53  ;;  %v2128_v50 = vpop.xlane.xlu1 %2127 }
0x1167   :  { %v2134_v39 = vmul.f32 0.03125, %v2128_v50 }
0x1168   :  { %v2139_v28 = vsub.f32 %v2117_v14, %v2135_v49 }
0x1169   :  { %v2138_v51 = vsub.f32 %v2116_v15, %v2134_v39 }
0x116a   :  { %v2507_v54 = vpop.permute.xlu1 %2506  ;;  %v2143_v58 = vmul.f32 %v2139_v28, %v2139_v28 }
0x116b   :  { %6830 = vmatmul.mubr.msk.f32.vlgmr.msra.gmra.mrb[26].mxu0 %vm583_vm4, %v2507_v54  ;;  %v2142_v55 = vmul.f32 %v2138_v51, %v2138_v51 }
0x116c   :  { %v2153_v61 = vsel %vm676_vm2, %v2143_v58, 0.0 }
0x116d   :  { %v2150_v56 = vsel %vm676_vm2, %v2142_v55, 0.0 }
0x116e   :  { %2151 = vadd.xlane.f32.xlu0 %v2150_v56 }
0x1172   :  { %2154 = vadd.xlane.f32.xlu0 %v2153_v61 }
0x11fb   :  { %v2152_v60 = vpop.xlane.xlu0 %2151 }
0x11fc   :  { %v2158_v62 = vmul.f32 0.03125, %v2152_v60 }
0x11fe   :  { %v2162_v63 = vadd.f32 1e-05, %v2158_v62 }
0x11ff   :  { %v2155_v0 = vpop.xlane.xlu0 %2154 }
0x1200   :  { %7523 = vrsqrt.f32 %v2162_v63  ;;  %v2159_v5 = vmul.f32 0.03125, %v2155_v0 }
0x1202   :  { %v2163_v27 = vadd.f32 1e-05, %v2159_v5 }
0x1204   :  { %7525 = vrsqrt.f32 %v2163_v27 }
0x1207   :  { %v6817_v6 = vpop.f32.mrb[24].mxu0 }
0x1208   :  { %v2392_v7 = vmul.f32 0.25, %v6817_v6  ;;  %v2382_v8 = vpop.f32.mrb[25].mxu0 }
0x1209   :  { %v2391_v9 = vmul.f32 0.25, %v2382_v8 }
0x120a   :  { %v7524_v12 = vpop.eup %7523  ;;  %v2396_v17 = vsel %vm583_vm4, %v2392_v7, -inf }
0x120b   :  { %2397 = vmax.xlane.f32.xlu1 %v2396_v17  ;;  %v2393_v13 = vsel %vm583_vm4, %v2391_v9, -inf  ;;  %v2170_v19 = vmul.f32 %v7524_v12, %v2138_v51 }
0x120c   :  { %2394 = vmax.xlane.f32.xlu0 %v2393_v13 }
0x120d   :  { %v2180_v2 = vmul.f32 %v8896_v21, %v2170_v19 }
0x120e   :  { %v7526_v16 = vpop.eup %7525 }
0x120f   :  { %v8950_v24 = vadd.f32 %v8900_v26, %v2180_v2  ;;  %v2171_v31 = vmul.f32 %v7526_v16, %v2139_v28 }
0x1211   :  { %6808 = vmatprep.mubr.msk.f32.mxu1 %vm676_vm2, %v8950_v24  ;;  %v2181_v25 = vmul.f32 %v8896_v21, %v2171_v31 }
0x1213   :  { %v8956_v1 = vadd.f32 %v8900_v26, %v2181_v25 }
0x1215   :  { %6809 = vmatmul.mubr.msk.f32.gmra.mrb[16].mxu1 %vm676_vm2, %v8956_v1 }
0x121c   :  { %7433 = vrot.lane.b32.xlu1 %v8919_v38, %s8238_s18 }
0x123e   :  { %v6831_v10 = vpop.f32.mrb[26].mxu0 }
0x123f   :  { %v2586_v57 = vpop.f32.mrb[27].mxu0  ;;  %v2596_v30 = vmul.f32 0.25, %v6831_v10 }
0x1240   :  { %v2595_v59 = vmul.f32 0.25, %v2586_v57 }
0x1241   :  { %v2600_v37 = vsel %vm583_vm4, %v2596_v30, -inf }
0x1242   :  { %v2597_v20 = vsel %vm583_vm4, %v2595_v59, -inf }
0x1243   :  { %2598 = vmax.xlane.f32.xlu0 %v2597_v20 }
0x1247   :  { %2601 = vmax.xlane.f32.xlu0 %v2600_v37 }
0x125d   :  { %7428 = vrot.lane.b32.xlu0 %v8919_v38, %s8240_s6 }
0x1298   :  { %v2398_v21 = vpop.xlane.xlu1 %2397 }
0x1299   :  { %v2400_v26 = vsub.f32 %v2392_v7, %v2398_v21  ;;  %v2395_v18 = vpop.xlane.xlu0 %2394 }
0x129a   :  { %v2399_v36 = vsub.f32 %v2391_v9, %v2395_v18 }
0x129b   :  { %v2403_v22 = vmul.f32 1.442695, %v2400_v26 }
0x129c   :  { %v2401_v14 = vmul.f32 1.442695, %v2399_v36  ;;  %v7434_v38 = vpop.permute.xlu1 %7433 }
0x129d   :  { %7527 = vpow2.f32 %v2403_v22  ;;  %v7436_v35 = vunpack.i.h.bf16 %v7434_v38  ;;  %v7435_v53 = vunpack.i.l.bf16 %v7434_v38 }
0x129e   :  { %7529 = vpow2.f32 %v2401_v14 }
0x129f   :  { %v7195_v28 = vpack.c.bf16 %v7436_v35, %v7435_v53 }
0x12a7   :  { %v7528_v15 = vpop.eup %7527 }
0x12a8   :  { %v2408_v23 = vsel %vm583_vm4, %v7528_v15, 0.0  ;;  %v7530_v40 = vpop.eup %7529 }
0x12a9   :  { %2409 = vadd.xlane.f32.xlu0 %v2408_v23  ;;  %v2405_v41 = vsel %vm583_vm4, %v7530_v40, 0.0 }
0x12ad   :  { %2406 = vadd.xlane.f32.xlu0 %v2405_v41 }
0x12d0   :  { %v2599_v42 = vpop.xlane.xlu0 %2598 }
0x12d1   :  { %v2603_v43 = vsub.f32 %v2595_v59, %v2599_v42 }
0x12d3   :  { %v2605_v47 = vmul.f32 1.442695, %v2603_v43 }
0x12d4   :  { %v2602_v44 = vpop.xlane.xlu0 %2601 }
0x12d5   :  { %v2604_v46 = vsub.f32 %v2596_v30, %v2602_v44 }
0x12d7   :  { %v2607_v48 = vmul.f32 1.442695, %v2604_v46 }
0x12d8   :  { %v7429_v52 = vpop.permute.xlu0 %7428 }
0x12d9   :  { %7531 = vpow2.f32 %v2607_v48  ;;  %v7431_v49 = vunpack.i.h.bf16 %v7429_v52  ;;  %v7430_v50 = vunpack.i.l.bf16 %v7429_v52 }
0x12da   :  { %7533 = vpow2.f32 %v2605_v47 }
0x12db   :  { %v7185_v39 = vpack.c.bf16 %v7431_v49, %v7430_v50 }
0x12dd   :  { %7186 = vmatprep.subr.bf16.mxu1 %v7185_v39 }
0x12de   :  { %7188 = vmatpush3.bf16.msra.mxu1 %v7185_v39 }
0x12df   :  { %7196 = vmatprep.subr.bf16.mxu1 %v7195_v28 }
0x12e3   :  { %v7532_v51 = vpop.eup %7531 }
0x12e4   :  { %v2612_v54 = vsel %vm583_vm4, %v7532_v51, 0.0  ;;  %v7534_v55 = vpop.eup %7533 }
0x12e5   :  { %2613 = vadd.xlane.f32.xlu0 %v2612_v54  ;;  %v2609_v58 = vsel %vm583_vm4, %v7534_v55, 0.0 }
0x12e8   :  { %v6810_v56 = vpop.f32.mrb[16].mxu1 }
0x12e9   :  { %v2293_v61 = vpop.f32.mrb[17].mxu1  ;;  %2610 = vadd.xlane.f32.xlu0 %v2609_v58  ;;  %v2299_v60 = vadd.f32 %v6810_v56, %v8914_v34 }
0x12ea   :  { %v2294_v62 = vadd.f32 %v8914_v34, %v2293_v61 }
0x12ec   :  { %v8972_v63 = vpack.i.bf16 %v2299_v60, %v2294_v62 }
0x12ff   :  { %7438 = vrot.lane.b32.xlu0 %v8972_v63, %s8239_s14 }
0x1336   :  { %v2410_v0 = vpop.xlane.xlu0 %2409 }
0x1337   :  { %7535 = vrcp.f32 %v2410_v0 }
0x133a   :  { %v2407_v5 = vpop.xlane.xlu0 %2406 }
0x133b   :  { %7537 = vrcp.f32 %v2407_v5 }
0x1341   :  { %v7536_v27 = vpop.eup %7535 }
0x1342   :  { %v2414_v8 = vmul.f32 %v7536_v27, %v7528_v15 }
0x1345   :  { %v7538_v6 = vpop.eup %7537 }
0x1346   :  { %v2413_v7 = vmul.f32 %v7538_v6, %v7530_v40 }
0x1348   :  { %6822 = vmatprep.mubr.msk.f32.mxu1 %vm583_vm4, %v2413_v7 }
0x1349   :  { %6823 = vmatmul.mubr.msk.f32.vlgmr.msra.gmra.mrb[18].mxu1 %vm583_vm4, %v2414_v8 }
0x134a   :  { %7198 = vmatpush3.bf16.msra.mxu1 %v7195_v28 }
0x1372   :  { %v2614_v9 = vpop.xlane.xlu0 %2613 }
0x1373   :  { %7539 = vrcp.f32 %v2614_v9 }
0x1376   :  { %v2611_v34 = vpop.xlane.xlu0 %2610 }
0x1377   :  { %7541 = vrcp.f32 %v2611_v34 }
0x137a   :  { %v7439_v12 = vpop.permute.xlu0 %7438 }
0x137b   :  { %v7441_v17 = vunpack.i.h.bf16 %v7439_v12  ;;  %v7440_v13 = vunpack.i.l.bf16 %v7439_v12 }
0x137d   :  { %v7199_v19 = vpack.c.bf16 %v7441_v17, %v7440_v13  ;;  %v7540_v2 = vpop.eup %7539 }
0x137e   :  { %v2618_v25 = vmul.f32 %v7540_v2, %v7532_v51 }
0x137f   :  { %7201 = vmatprep.subr.msk.bf16.mxu1 %vm8686_vm5, %v7199_v19 }
0x1381   :  { %v7542_v16 = vpop.eup %7541 }
0x1382   :  { %v2617_v31 = vmul.f32 %v7542_v16, %v7534_v55 }
0x1384   :  { %6836 = vmatprep.mubr.msk.f32.mxu1 %vm583_vm4, %v2617_v31 }
0x1385   :  { %6837 = vmatmul.mubr.msk.f32.vlgmr.msra.gmra.mrb[20].mxu1 %vm583_vm4, %v2618_v25 }
0x1386   :  { %7204 = vmatpush3.bf16.xpose.msk.msra.mxu1 %vm8686_vm5, %v7199_v19  ;;  %6843 = vmatprep.mubr.msk.f32.mxu1 %vm583_vm4, %v2294_v62 }
0x138d   :  { %6844 = vmatmul.mubr.msk.f32.vlgmr.msra.gmra.mrb[22].mxu1 %vm583_vm4, %v2299_v60 }
0x141c   :  { %v6824_v10 = vpop.f32.mrb[18].mxu1 }
0x141d   :  { %2503 = vst.msk [vmem:[#allocation2 + $0x8] sm:$0xff] %vm583_vm4, %v6824_v10  ;;  %v2493_v57 = vpop.f32.mrb[19].mxu1 }
0x141e   :  { %2502 = vst.msk [vmem:[#allocation2] sm:$0xff] %vm583_vm4, %v2493_v57 }
0x1458   :  { %v8988_v59 = vpop.f32.mrb[20].mxu1 }
0x1459   :  { %v8990_v30 = vpop.f32.mrb[21].mxu1 }
0x1460   :  { %v6845_v20 = vpop.f32.mrb[22].mxu1 }
0x1461   :  { %v2806_v37 = vmul.f32 0.25, %v6845_v20  ;;  %v2796_v21 = vpop.f32.mrb[23].mxu1  ;;  %v6346_v20 = vld [vmem:[%s9462_s22 + $0x20] sm:$0xff] }
0x1462   :  { %v2805_v26 = vmul.f32 0.25, %v2796_v21 }
0x1463   :  { %v2810_v18 = vsel %vm583_vm4, %v2806_v37, -inf }
0x1464   :  { %2811 = vmax.xlane.f32.xlu1 %v2810_v18  ;;  %v2807_v36 = vsel %vm583_vm4, %v2805_v26, -inf }
0x1465   :  { %2808 = vmax.xlane.f32.xlu0 %v2807_v36 }
0x1475   :  { %7443 = vrot.lane.b32.xlu1 %v8972_v63, %s8240_s6 }
0x1479   :  { %2918 = vrot.lane.b32.xlu1 %v2294_v62, %s8236_s11 }
0x147d   :  { %2920 = vrot.lane.b32.xlu1 %v2299_v60, %s8236_s11 }
0x14f1   :  { %v2812_v22 = vpop.xlane.xlu1 %2811 }
0x14f2   :  { %v2814_v14 = vsub.f32 %v2806_v37, %v2812_v22  ;;  %v2809_v15 = vpop.xlane.xlu0 %2808  ;;  %v6347_v37 = vld [vmem:[%s9462_s22 + $0x28] sm:$0xff] }
0x14f3   :  { %v2813_v23 = vsub.f32 %v2805_v26, %v2809_v15  ;;  %v7219_v21 = vpack.c.bf16 %v6347_v37, %v6346_v20  ;;  %v6348_v15 = vld [vmem:[%s9462_s22 + $0x30] sm:$0xff] }
0x14f4   :  { %v2817_v40 = vmul.f32 1.442695, %v2814_v14 }
0x14f5   :  { %v2815_v41 = vmul.f32 1.442695, %v2813_v23  ;;  %v7444_v42 = vpop.permute.xlu1 %7443  ;;  %v6349_v23 = vld [vmem:[%s9462_s22 + $0x38] sm:$0xff] }
0x14f6   :  { %7543 = vpow2.f32 %v2817_v40  ;;  %v7446_v43 = vunpack.i.h.bf16 %v7444_v42  ;;  %v7445_v44 = vunpack.i.l.bf16 %v7444_v42 }
0x14f7   :  { %7545 = vpow2.f32 %v2815_v41 }
0x14f8   :  { %v7205_v38 = vpack.c.bf16 %v7446_v43, %v7445_v44 }
0x14f9   :  { %v2919_v58 = vpop.permute.xlu1 %2918 }
0x14fa   :  { %7206 = vmatprep.subr.bf16.mxu0 %v7205_v38 }
0x14fb   :  { %7208 = vmatpush3.bf16.msra.mxu0 %v7205_v38 }
0x14fd   :  { %v2921_v61 = vpop.permute.xlu1 %2920 }
0x1500   :  { %v7544_v46 = vpop.eup %7543 }
0x1501   :  { %v2822_v47 = vsel %vm583_vm4, %v7544_v46, 0.0  ;;  %v7546_v48 = vpop.eup %7545 }
0x1502   :  { %2823 = vadd.xlane.f32.xlu0 %v2822_v47  ;;  %v2819_v35 = vsel %vm583_vm4, %v7546_v48, 0.0 }
0x1506   :  { %2820 = vadd.xlane.f32.xlu0 %v2819_v35 }
0x151c   :  { %7448 = vrot.lane.b32.xlu0 %v8972_v63, %s8237_s21 }
0x158f   :  { %v2824_v52 = vpop.xlane.xlu0 %2823 }
0x1590   :  { %7547 = vrcp.f32 %v2824_v52 }
0x1593   :  { %v2821_v53 = vpop.xlane.xlu0 %2820 }
0x1594   :  { %7549 = vrcp.f32 %v2821_v53 }
0x1597   :  { %v7449_v49 = vpop.permute.xlu0 %7448 }
0x1598   :  { %v7451_v50 = vunpack.i.h.bf16 %v7449_v49  ;;  %v7450_v39 = vunpack.i.l.bf16 %v7449_v49 }
0x159a   :  { %v7209_v28 = vpack.c.bf16 %v7451_v50, %v7450_v39  ;;  %v7548_v51 = vpop.eup %7547 }
0x159b   :  { %v2828_v56 = vmul.f32 %v7548_v51, %v7544_v46 }
0x159c   :  { %7211 = vmatprep.subr.msk.bf16.mxu0 %vm8686_vm5, %v7209_v28 }
0x159e   :  { %v7550_v54 = vpop.eup %7549 }
0x159f   :  { %v2827_v55 = vmul.f32 %v7550_v54, %v7546_v48  ;;  %v6350_v48 = vld [vmem:[#allocation7 + $0x1] ss:$0 sm:$0xff] }
0x15a1   :  { %6850 = vmatprep.mubr.msk.f32.mxu0 %vm583_vm4, %v2827_v55 }
0x15a2   :  { %6851 = vmatmul.mubr.msk.f32.vlgmr.msra.gmra.mrb[28].mxu0 %vm583_vm4, %v2828_v56 }
0x15a3   :  { %7214 = vmatpush3.bf16.xpose.msk.msra.mxu0 %vm8686_vm5, %v7209_v28  ;;  %6857 = vmatprep.mubr.msk.f32.mxu0 %vm583_vm4, %v2919_v58  ;;  %vm3979_vm5 = vcmask 125952  }
0x15aa   :  { %6858 = vmatmul.mubr.msk.f32.vlgmr.msra.gmra.mrb[30].mxu0 %vm583_vm4, %v2921_v61 }
0x1675   :  { %v6852_v60 = vpop.f32.mrb[28].mxu0 }
0x1676   :  { %2917 = vst.msk [vmem:[#allocation2 + $0x18] sm:$0xff] %vm583_vm4, %v6852_v60  ;;  %v2907_v62 = vpop.f32.mrb[29].mxu0 }
0x1677   :  { %2916 = vst.msk [vmem:[#allocation2 + $0x10] sm:$0xff] %vm583_vm4, %v2907_v62 }
0x167d   :  { %v6859_v0 = vpop.f32.mrb[30].mxu0 }
0x167e   :  { %v3010_v5 = vmul.f32 0.25, %v6859_v0  ;;  %v3000_v27 = vpop.f32.mrb[31].mxu0 }
0x167f   :  { %v3009_v6 = vmul.f32 0.25, %v3000_v27 }
0x1680   :  { %v3014_v7 = vsel %vm583_vm4, %v3010_v5, -inf }
0x1681   :  { %3015 = vmax.xlane.f32.xlu1 %v3014_v7  ;;  %v3011_v45 = vsel %vm583_vm4, %v3009_v6, -inf }
0x1682   :  { %3012 = vmax.xlane.f32.xlu0 %v3011_v45 }
0x1692   :  { %7453 = vrot.lane.b32.xlu1 %v8972_v63, %s8238_s18 }
0x1696   :  { %2710 = vrot.lane.b32.xlu1 %v8988_v59, %s8207_s15 }
0x170e   :  { %v3016_v8 = vpop.xlane.xlu1 %3015 }
0x170f   :  { %v3018_v9 = vsub.f32 %v3010_v5, %v3016_v8  ;;  %v3013_v34 = vpop.xlane.xlu0 %3012 }
0x1710   :  { %v3017_v12 = vsub.f32 %v3009_v6, %v3013_v34 }
0x1711   :  { %v3021_v17 = vmul.f32 1.442695, %v3018_v9 }
0x1712   :  { %v3019_v13 = vmul.f32 1.442695, %v3017_v12  ;;  %v7454_v19 = vpop.permute.xlu1 %7453 }
0x1713   :  { %v7456_v2 = vunpack.i.h.bf16 %v7454_v19  ;;  %v7455_v16 = vunpack.i.l.bf16 %v7454_v19  ;;  %v6358_v19 = vld [vmem:[%s9463_s23 + $0x28] sm:$0xff] }
0x1714   :  { %7551 = vpow2.f32 %v3019_v13  ;;  %v6357_v13 = vld [vmem:[%s9463_s23 + $0x20] sm:$0xff] }
0x1715   :  { %v7215_v31 = vpack.c.bf16 %v7456_v2, %v7455_v16  ;;  %7553 = vpow2.f32 %v3021_v17  ;;  %v6359_v2 = vld [vmem:[%s9463_s23 + $0x30] sm:$0xff]  ;;  %v6360_v16 = vld [vmem:[%s9463_s23 + $0x38] sm:$0xff] }
0x1716   :  { %v2711_v25 = vpop.permute.xlu1 %2710 }
0x1717   :  { %2715 = vst.msk [vmem:[#allocation2 + $0x8] sm:$0xff] %vm1186_vm6, %v2711_v25  ;;  %7216 = vmatprep.subr.bf16.mxu1 %v7215_v31 }
0x1718   :  { %7218 = vmatpush3.bf16.msra.mxu1 %v7215_v31 }
0x1719   :  { %7220 = vmatprep.subr.bf16.mxu1 %v7219_v21 }
0x171e   :  { %v7552_v63 = vpop.eup %7551  ;;  %v3131_v43 = vld [vmem:[#allocation2 + $0x8] sm:$0xff] }
0x171f   :  { %v3023_v10 = vsel %vm583_vm4, %v7552_v63, 0.0  ;;  %v7554_v57 = vpop.eup %7553 }
0x1720   :  { %3024 = vadd.xlane.f32.xlu0 %v3023_v10  ;;  %v3026_v59 = vsel %vm583_vm4, %v7554_v57, 0.0 }
0x1724   :  { %3027 = vadd.xlane.f32.xlu0 %v3026_v59 }
0x173a   :  { %2708 = vrot.lane.b32.xlu0 %v8990_v30, %s8207_s15  ;;  %v7223_v30 = vpack.c.bf16 %v6349_v23, %v6348_v15 }
0x17ad   :  { %v3025_v26 = vpop.xlane.xlu0 %3024 }
0x17ae   :  { %7555 = vrcp.f32 %v3025_v26 }
0x17b1   :  { %v3028_v18 = vpop.xlane.xlu0 %3027 }
0x17b2   :  { %7557 = vrcp.f32 %v3028_v18 }
0x17b5   :  { %v2709_v36 = vpop.permute.xlu0 %2708 }
0x17b6   :  { %2714 = vst.msk [vmem:[#allocation2] sm:$0xff] %vm1186_vm6, %v2709_v36 }
0x17b8   :  { %v7556_v22 = vpop.eup %7555 }
0x17b9   :  { %v3031_v14 = vmul.f32 %v7556_v22, %v7552_v63 }
0x17bb   :  { %6864 = vmatprep.mubr.msk.f32.mxu1 %vm583_vm4, %v3031_v14 }
0x17bc   :  { %v7558_v40 = vpop.eup %7557 }
0x17bd   :  { %v3032_v41 = vmul.f32 %v7558_v40, %v7554_v57  ;;  %v3130_v42 = vld [vmem:[#allocation2] sm:$0xff] }
0x17bf   :  { %6865 = vmatmul.mubr.msk.f32.vlgmr.msra.gmra.mrb[24].mxu1 %vm583_vm4, %v3032_v41  ;;  %v6355_v41 = vld [vmem:[#allocation8 + $0x1] ss:$0 sm:$0xff] }
0x17c0   :  { %7222 = vmatpush3.bf16.msra.mxu1 %v7219_v21  ;;  %6875 = vmatprep.mubr.msk.f32.mxu1 %vm676_vm2, %v3130_v42 }
0x17c1   :  { %7224 = vmatprep.subr.bf16.mxu1 %v7223_v30 }
0x17c4   :  { %7226 = vmatpush3.bf16.msra.mxu1 %v7223_v30 }
0x17c7   :  { %6876 = vmatmul.mubr.msk.f32.vlgmr.msra.gmra.mrb[26].mxu1 %vm676_vm2, %v3131_v43 }
0x1892   :  { %v6866_v44 = vpop.f32.mrb[24].mxu1 }
0x1893   :  { %3124 = vrot.lane.b32.xlu0 %v6866_v44, %s8207_s15  ;;  %v3111_v38 = vpop.f32.mrb[25].mxu1  ;;  %v6356_v44 = vld [vmem:[#allocation10 + $0x1] ss:$0 sm:$0xff] }
0x1894   :  { %3122 = vrot.lane.b32.xlu1 %v3111_v38, %s8207_s15 }
0x189a   :  { %v6877_v46 = vpop.f32.mrb[26].mxu1 }
0x189b   :  { %v3225_v47 = vpop.f32.mrb[27].mxu1  ;;  %v3231_v35 = vadd.f32 %v6877_v46, %v6350_v48 }
0x189c   :  { %v3226_v53 = vadd.f32 %v6350_v48, %v3225_v47 }
0x189d   :  { %v3245_v52 = vadd.f32 %v3231_v35, %v8908_v33  ;;  %v3728_v35 = vld [vmem:[%s9465_s28] sm:$0xff] }
0x189e   :  { %v3244_v50 = vadd.f32 %v3226_v53, %v8905_v29 }
0x189f   :  { %v3255_v49 = vsel %vm676_vm2, %v3245_v52, 0.0 }
0x18a0   :  { %v3252_v39 = vsel %vm676_vm2, %v3244_v50, 0.0 }
0x18b2   :  { %3256 = vadd.xlane.f32.xlu0 %v3255_v49  ;;  %v3730_v49 = vld [vmem:[%s9465_s28 + $0x10] sm:$0xff] }
0x18b8   :  { %3253 = vadd.xlane.f32.xlu1 %v3252_v39 }
0x1905   :  { %v3125_v28 = vpop.permute.xlu0 %3124 }
0x1906   :  { %3129 = vst.msk [vmem:[#allocation2 + $0x18] sm:$0xff] %vm1186_vm6, %v3125_v28  ;;  %v3123_v51 = vpop.permute.xlu1 %3122 }
0x1907   :  { %3128 = vst.msk [vmem:[#allocation2 + $0x10] sm:$0xff] %vm1186_vm6, %v3123_v51  ;;  %vm4152_vm6 = vcmask 257152  }
0x190d   :  { %v3133_v55 = vld [vmem:[#allocation2 + $0x18] sm:$0xff] }
0x190e   :  { %v3132_v54 = vld [vmem:[#allocation2 + $0x10] sm:$0xff] }
0x190f   :  { %6878 = vmatprep.mubr.msk.f32.mxu1 %vm676_vm2, %v3132_v54 }
0x1910   :  { %6879 = vmatmul.mubr.msk.f32.gmra.mrb[28].mxu1 %vm676_vm2, %v3133_v55 }
0x193f   :  { %v3257_v33 = vpop.xlane.xlu0 %3256 }
0x1940   :  { %v3265_v58 = vmul.f32 0.03125, %v3257_v33 }
0x1942   :  { %v3269_v60 = vsub.f32 %v3245_v52, %v3265_v58  ;;  %v3729_v52 = vld [vmem:[%s9465_s28 + $0x8] sm:$0xff]  ;;  %v6366_v58 = vld [vmem:[%s9464_s26 + $0x20] sm:$0xff] }
0x1943   :  { %v7244_v53 = vpack.c.bf16 %v3729_v52, %v3728_v35 }
0x1944   :  { %v3273_v8 = vmul.f32 %v3269_v60, %v3269_v60 }
0x1945   :  { %v3254_v56 = vpop.xlane.xlu1 %3253 }
0x1946   :  { %v3264_v61 = vmul.f32 0.03125, %v3254_v56  ;;  %v3279_v12 = vsel %vm676_vm2, %v3273_v8, 0.0  ;;  %v582_v8 = vld [vmem:[#allocation20] sm:$0xff] }
0x1948   :  { %v3268_v5 = vsub.f32 %v3244_v50, %v3264_v61  ;;  %v3731_v50 = vld [vmem:[%s9465_s28 + $0x18] sm:$0xff]  ;;  %v6367_v61 = vld [vmem:[%s9464_s26 + $0x28] sm:$0xff] }
0x1949   :  { %v7247_v39 = vpack.c.bf16 %v3731_v50, %v3730_v49 }
0x194a   :  { %v3272_v34 = vmul.f32 %v3268_v5, %v3268_v5 }
0x194c   :  { %v3276_v17 = vsel %vm676_vm2, %v3272_v34, 0.0 }
0x19e3   :  { %v6880_v29 = vpop.f32.mrb[28].mxu1 }
0x19e4   :  { %v3241_v62 = vadd.f32 %v6880_v29, %v6350_v48  ;;  %v3235_v0 = vpop.f32.mrb[29].mxu1  ;;  %v7235_v29 = vpack.c.bf16 %v6367_v61, %v6366_v58 }
0x19e5   :  { %v3236_v27 = vadd.f32 %v6350_v48, %v3235_v0 }
0x19e6   :  { %v3247_v6 = vadd.f32 %v3241_v62, %v8956_v1  ;;  %v7227_v1 = vpack.c.bf16 %v6358_v19, %v6357_v13  ;;  %7236 = vmatprep.subr.bf16.mxu1 %v7235_v29  ;;  %v6369_v62 = vld [vmem:[%s9464_s26 + $0x38] sm:$0xff]  ;;  %v6264_v13 = vld [vmem:[%s9466_s24] ss:$0 sm:$0xff] }
0x19e7   :  { %v3246_v7 = vadd.f32 %v3236_v27, %v8950_v24  ;;  %v7231_v24 = vpack.c.bf16 %v6360_v16, %v6359_v2  ;;  %7238 = vmatpush3.bf16.msra.mxu1 %v7235_v29 }
0x19e8   :  { %v3261_v45 = vsel %vm676_vm2, %v3247_v6, 0.0  ;;  %7228 = vmatprep.subr.bf16.mxu0 %v7227_v1 }
0x19e9   :  { %3262 = vadd.xlane.f32.xlu1 %v3261_v45  ;;  %v3258_v9 = vsel %vm676_vm2, %v3246_v7, 0.0  ;;  %7230 = vmatpush3.bf16.msra.mxu0 %v7227_v1 }
0x19ea   :  { %3259 = vadd.xlane.f32.xlu0 %v3258_v9  ;;  %7232 = vmatprep.subr.bf16.mxu0 %v7231_v24 }
0x19ed   :  { %3280 = vadd.xlane.f32.xlu1 %v3279_v12  ;;  %7234 = vmatpush3.bf16.msra.mxu0 %v7231_v24  ;;  %v654_v12 = vadd.f32 %v8714_v4, %v582_v8  ;;  %v9092_v4 = vld [vmem:[#allocation11 + $0x1] ss:$0 sm:$0xff] }
0x19ee   :  { %3277 = vadd.xlane.f32.xlu0 %v3276_v17  ;;  %7243 = vmatprep.subr.bf16.mxu0 %v8233_v11 }
0x19ef   :  { %v9086_v19 = vadd.f32 %v6264_v13, %v654_v12 }
0x1a76   :  { %v3263_v31 = vpop.xlane.xlu1 %3262 }
0x1a77   :  { %v3267_v25 = vmul.f32 0.03125, %v3263_v31  ;;  %v3260_v63 = vpop.xlane.xlu0 %3259 }
0x1a78   :  { %v3266_v10 = vmul.f32 0.03125, %v3260_v63 }
0x1a79   :  { %v3271_v57 = vsub.f32 %v3247_v6, %v3267_v25 }
0x1a7a   :  { %v3270_v59 = vsub.f32 %v3246_v7, %v3266_v10  ;;  %v3281_v20 = vpop.xlane.xlu1 %3280 }
0x1a7b   :  { %v3289_v37 = vmul.f32 0.03125, %v3281_v20  ;;  %v3278_v21 = vpop.xlane.xlu0 %3277  ;;  %v3275_v26 = vmul.f32 %v3271_v57, %v3271_v57 }
0x1a7c   :  { %v3288_v18 = vmul.f32 0.03125, %v3278_v21  ;;  %v3274_v36 = vmul.f32 %v3270_v59, %v3270_v59 }
0x1a7d   :  { %v3293_v22 = vadd.f32 1e-05, %v3289_v37  ;;  %v3285_v14 = vsel %vm676_vm2, %v3275_v26, 0.0 }
0x1a7e   :  { %v3292_v15 = vadd.f32 1e-05, %v3288_v18  ;;  %3286 = vadd.xlane.f32.xlu1 %v3285_v14  ;;  %v3282_v23 = vsel %vm676_vm2, %v3274_v36, 0.0 }
0x1a7f   :  { %7559 = vrsqrt.f32 %v3293_v22  ;;  %3283 = vadd.xlane.f32.xlu0 %v3282_v23 }
0x1a80   :  { %7561 = vrsqrt.f32 %v3292_v15 }
0x1a89   :  { %v7560_v40 = vpop.eup %7559 }
0x1a8a   :  { %v7562_v30 = vpop.eup %7561  ;;  %v3301_v42 = vmul.f32 %v7560_v40, %v3269_v60  ;;  %v6368_v60 = vld [vmem:[%s9464_s26 + $0x30] sm:$0xff] }
0x1a8b   :  { %v3300_v43 = vmul.f32 %v7562_v30, %v3268_v5  ;;  %v7239_v0 = vpack.c.bf16 %v6369_v62, %v6368_v60 }
0x1a8c   :  { %v3311_v38 = vmul.f32 %v6355_v41, %v3301_v42 }
0x1a8d   :  { %v3310_v46 = vmul.f32 %v6355_v41, %v3300_v43  ;;  %7240 = vmatprep.subr.bf16.mxu1 %v7239_v0 }
0x1a8e   :  { %v9057_v48 = vadd.f32 %v6356_v44, %v3311_v38  ;;  %7242 = vmatpush3.bf16.msra.mxu1 %v7239_v0 }
0x1a8f   :  { %v9055_v47 = vadd.f32 %v6356_v44, %v3310_v46  ;;  %6925 = vmatprep.subr.mxu1 %v8235_v32 }
0x1a91   :  { %6889 = vmatprep.mubr.msk.f32.mxu0 %vm676_vm2, %v9055_v47 }
0x1a92   :  { %6890 = vmatmul.mubr.msk.f32.vlgmr.msra.gmra.mrb[32].mxu0 %vm676_vm2, %v9057_v48 }
0x1a93   :  { %7245 = vmatpush3.bf16.msra.mxu0 %v7244_v53 }
0x1a94   :  { %7246 = vmatprep.subr.bf16.mxu0 %v8233_v11 }
0x1a97   :  { %7248 = vmatpush3.bf16.msra.mxu0 %v7247_v39 }
0x1a98   :  { %6920 = vmatprep.subr.mxu0 %v8235_v32 }
0x1b0b   :  { %v3287_v28 = vpop.xlane.xlu1 %3286 }
0x1b0c   :  { %v3291_v51 = vmul.f32 0.03125, %v3287_v28  ;;  %v3284_v54 = vpop.xlane.xlu0 %3283 }
0x1b0d   :  { %v3290_v55 = vmul.f32 0.03125, %v3284_v54 }
0x1b0e   :  { %v3295_v33 = vadd.f32 1e-05, %v3291_v51 }
0x1b0f   :  { %v3294_v56 = vadd.f32 1e-05, %v3290_v55 }
0x1b10   :  { %7563 = vrsqrt.f32 %v3295_v33 }
0x1b11   :  { %7565 = vrsqrt.f32 %v3294_v56 }
0x1b1a   :  { %v7564_v5 = vpop.eup %7563 }
0x1b1b   :  { %v7566_v27 = vpop.eup %7565  ;;  %v3303_v6 = vmul.f32 %v7564_v5, %v3271_v57 }
0x1b1c   :  { %v3302_v7 = vmul.f32 %v7566_v27, %v3270_v59 }
0x1b1d   :  { %v3313_v45 = vmul.f32 %v6355_v41, %v3303_v6 }
0x1b1e   :  { %v3312_v9 = vmul.f32 %v6355_v41, %v3302_v7 }
0x1b1f   :  { %v9077_v17 = vadd.f32 %v6356_v44, %v3313_v45 }
0x1b20   :  { %v9074_v34 = vadd.f32 %v6356_v44, %v3312_v9 }
0x1b22   :  { %6892 = vmatprep.mubr.msk.f32.mxu0 %vm676_vm2, %v9074_v34 }
0x1b23   :  { %6893 = vmatmul.mubr.msk.f32.gmra.mrb[34].mxu0 %vm676_vm2, %v9077_v17 }
0x1b24   :  { %6917 = vmatprep.mubr.msk.f32.mxu0 %vm8234_vm3, %v8235_v32 }
0x1b27   :  { %6918 = vmatmul.mubr.msk.f32.vlgmr.msra.gmra.mrb[36].mxu0 %vm676_vm2, %v9086_v19 }
0x1b28   :  { %6922 = vmatprep.mubr.msk.f32.mxu0 %vm8234_vm3, %v8235_v32 }
0x1b65   :  { %v6891_v1 = vpop.f32.mrb[32].mxu0 }
0x1b66   :  { %v3421_v2 = vadd.f32 %v6891_v1, %v9092_v4  ;;  %v3415_v16 = vpop.f32.mrb[33].mxu0 }
0x1b67   :  { %v3416_v24 = vadd.f32 %v9092_v4, %v3415_v16 }
0x1b68   :  { %v3439_v31 = vmul.f32 0.70710677, %v3421_v2  ;;  %v3435_v8 = vmul.f32 0.5, %v3421_v2 }
0x1b69   :  { %v3438_v25 = vmul.f32 0.70710677, %v3416_v24  ;;  %v3434_v7 = vmul.f32 0.5, %v3416_v24 }
0x1b6a   :  { %v3451_v63 = vand.u32 2147483647, %v3439_v31  ;;  %vm3443_vm11 = vcmp.ge.f32.partialorder %v3439_v31, 0.0 }
0x1b6b   :  { %v3450_v10 = vand.u32 2147483647, %v3438_v25  ;;  %vm3442_vm12 = vcmp.ge.f32.partialorder %v3438_v25, 0.0  ;;  %v3447_v60 = vsel %vm3443_vm11, 1.0, %v8241_v3  ;;  %v6377_v25 = vld [vmem:[#allocation22] ss:$0 sm:$0xff] }
0x1b6c   :  { %v3455_v57 = vmul.f32 0.3275911, %v3451_v63  ;;  %v3503_v21 = vsub.f32 0.0, %v3451_v63  ;;  %v3446_v5 = vsel %vm3442_vm12, 1.0, %v8241_v3 }
0x1b6d   :  { %v3454_v59 = vmul.f32 0.3275911, %v3450_v10  ;;  %v3502_v26 = vsub.f32 0.0, %v3450_v10 }
0x1b6e   :  { %v3459_v20 = vadd.f32 1.0, %v3455_v57  ;;  %v3507_v36 = vmul.f32 %v3503_v21, %v3451_v63 }
0x1b6f   :  { %v3458_v37 = vadd.f32 1.0, %v3454_v59  ;;  %v3506_v15 = vmul.f32 %v3502_v26, %v3450_v10 }
0x1b70   :  { %7567 = vrcp.f32 %v3459_v20  ;;  %v3512_v41 = vmul.f32 1.442695, %v3507_v36 }
0x1b71   :  { %7569 = vrcp.f32 %v3458_v37  ;;  %v3510_v43 = vmul.f32 1.442695, %v3506_v15 }
0x1b72   :  { %7571 = vpow2.f32 %v3512_v41 }
0x1b73   :  { %7573 = vpow2.f32 %v3510_v43 }
0x1b7a   :  { %v7568_v18 = vpop.eup %7567 }
0x1b7b   :  { %v7570_v22 = vpop.eup %7569  ;;  %v3467_v14 = vmul.f32 1.0614054, %v7568_v18 }
0x1b7c   :  { %v3466_v23 = vmul.f32 1.0614054, %v7570_v22  ;;  %v7572_v55 = vpop.eup %7571 }
0x1b7d   :  { %v3471_v40 = vadd.f32 -1.4531521, %v3467_v14  ;;  %v7574_v56 = vpop.eup %7573 }
0x1b7e   :  { %v3470_v30 = vadd.f32 -1.4531521, %v3466_v23 }
0x1b7f   :  { %v3475_v42 = vmul.f32 %v7568_v18, %v3471_v40 }
0x1b80   :  { %v3474_v44 = vmul.f32 %v7570_v22, %v3470_v30 }
0x1b81   :  { %v3479_v38 = vadd.f32 1.4214138, %v3475_v42 }
0x1b82   :  { %v3478_v46 = vadd.f32 1.4214138, %v3474_v44 }
0x1b83   :  { %v3483_v35 = vmul.f32 %v7568_v18, %v3479_v38 }
0x1b84   :  { %v3482_v52 = vmul.f32 %v7570_v22, %v3478_v46 }
0x1b85   :  { %v3487_v53 = vadd.f32 -0.28449672, %v3483_v35 }
0x1b86   :  { %v3486_v49 = vadd.f32 -0.28449672, %v3482_v52 }
0x1b87   :  { %v3491_v50 = vmul.f32 %v7568_v18, %v3487_v53 }
0x1b88   :  { %v3490_v39 = vmul.f32 %v7570_v22, %v3486_v49 }
0x1b89   :  { %v3495_v28 = vadd.f32 0.2548296, %v3491_v50 }
0x1b8a   :  { %v3494_v51 = vadd.f32 0.2548296, %v3490_v39 }
0x1b8b   :  { %v3499_v54 = vmul.f32 %v7568_v18, %v3495_v28 }
0x1b8c   :  { %v3498_v33 = vmul.f32 %v7570_v22, %v3494_v51 }
0x1b8d   :  { %v3519_v58 = vmul.f32 %v7572_v55, %v3499_v54 }
0x1b8e   :  { %v3518_v61 = vmul.f32 %v7574_v56, %v3498_v33 }
0x1b8f   :  { %v3523_v29 = vsub.f32 1.0, %v3519_v58 }
0x1b90   :  { %v3522_v62 = vsub.f32 1.0, %v3518_v61 }
0x1b91   :  { %v3527_v0 = vmul.f32 %v3523_v29, %v3447_v60 }
0x1b92   :  { %v3526_v27 = vmul.f32 %v3522_v62, %v3446_v5 }
0x1b93   :  { %v3531_v6 = vadd.f32 1.0, %v3527_v0 }
0x1b94   :  { %v3530_v45 = vadd.f32 1.0, %v3526_v27 }
0x1b95   :  { %v3535_v12 = vmul.f32 %v3531_v6, %v3435_v8 }
0x1b96   :  { %v3534_v9 = vmul.f32 %v3530_v45, %v3434_v7 }
0x1b98   :  { %6903 = vmatprep.mubr.msk.f32.mxu1 %vm676_vm2, %v3534_v9 }
0x1b99   :  { %6904 = vmatmul.mubr.msk.f32.vlgmr.msra.gmra.mrb[30].mxu1 %vm676_vm2, %v3535_v12 }
0x1bf6   :  { %v6894_v13 = vpop.f32.mrb[34].mxu0 }
0x1bf7   :  { %v9101_v1 = vadd.f32 %v6894_v13, %v9092_v4  ;;  %v3425_v16 = vpop.f32.mrb[35].mxu0 }
0x1bf8   :  { %v3426_v31 = vadd.f32 %v9092_v4, %v3425_v16 }
0x1bf9   :  { %v3441_v63 = vmul.f32 0.70710677, %v9101_v1  ;;  %v3437_v13 = vmul.f32 0.5, %v9101_v1 }
0x1bfa   :  { %v3440_v10 = vmul.f32 0.70710677, %v3426_v31  ;;  %v3808_v24 = vpop.f32.mrb[36].mxu0  ;;  %v3436_v9 = vmul.f32 0.5, %v3426_v31 }
0x1bfb   :  { %v3453_v57 = vand.u32 2147483647, %v3441_v63  ;;  %v9105_v2 = vadd.f32 %v6377_v25, %v3808_v24  ;;  %v6919_v59 = vpop.f32.mrb[37].mxu0  ;;  %vm3445_vm13 = vcmp.ge.f32.partialorder %v3441_v63, 0.0 }
0x1bfc   :  { %v3452_v20 = vand.u32 2147483647, %v3440_v10  ;;  %vm3444_vm14 = vcmp.ge.f32.partialorder %v3440_v10, 0.0  ;;  %v3449_v5 = vsel %vm3445_vm13, 1.0, %v8241_v3 }
0x1bfd   :  { %v3457_v37 = vmul.f32 0.3275911, %v3453_v57  ;;  %3983 = vrot.lane.b32.xlu1 %v9105_v2, %s8237_s21  ;;  %3813 = vrot.lane.b32.xlu0 %v9105_v2, %s8239_s14  ;;  %v9112_v4 = vrot.slane %v9105_v2, 4  ;;  %v3505_v36 = vsub.f32 0.0, %v3453_v57  ;;  %v3448_v7 = vsel %vm3444_vm14, 1.0, %v8241_v3 }
0x1bfe   :  { %v3456_v21 = vmul.f32 0.3275911, %v3452_v20  ;;  %v3504_v22 = vsub.f32 0.0, %v3452_v20 }
0x1bff   :  { %v3461_v26 = vadd.f32 1.0, %v3457_v37  ;;  %v3509_v15 = vmul.f32 %v3505_v36, %v3453_v57 }
0x1c00   :  { %v3460_v18 = vadd.f32 1.0, %v3456_v21  ;;  %v3508_v41 = vmul.f32 %v3504_v22, %v3452_v20 }
0x1c01   :  { %7575 = vrcp.f32 %v3461_v26  ;;  %3981 = vrot.lane.b32.xlu1 %v9105_v2, %s8236_s11  ;;  %4155 = vrot.lane.b32.xlu0 %v9112_v4, %s8239_s14  ;;  %v3516_v43 = vmul.f32 1.442695, %v3509_v15 }
0x1c02   :  { %7577 = vrcp.f32 %v3460_v18  ;;  %v3514_v46 = vmul.f32 1.442695, %v3508_v41 }
0x1c03   :  { %7579 = vpow2.f32 %v3516_v43 }
0x1c04   :  { %7581 = vpow2.f32 %v3514_v46 }
0x1c05   :  { %4323 = vrot.lane.b32.xlu1 %v9112_v4, %s8237_s21  ;;  %4321 = vrot.lane.b32.xlu0 %v9112_v4, %s8236_s11 }
0x1c0b   :  { %v7576_v14 = vpop.eup %7575 }
0x1c0c   :  { %v7578_v23 = vpop.eup %7577  ;;  %v3469_v40 = vmul.f32 1.0614054, %v7576_v14 }
0x1c0d   :  { %v3468_v30 = vmul.f32 1.0614054, %v7578_v23  ;;  %v7580_v58 = vpop.eup %7579 }
0x1c0e   :  { %v3473_v42 = vadd.f32 -1.4531521, %v3469_v40  ;;  %v7582_v29 = vpop.eup %7581 }
0x1c0f   :  { %v3472_v44 = vadd.f32 -1.4531521, %v3468_v30 }
0x1c10   :  { %v3477_v38 = vmul.f32 %v7576_v14, %v3473_v42 }
0x1c11   :  { %v3476_v35 = vmul.f32 %v7578_v23, %v3472_v44 }
0x1c12   :  { %v3481_v52 = vadd.f32 1.4214138, %v3477_v38 }
0x1c13   :  { %v3480_v53 = vadd.f32 1.4214138, %v3476_v35 }
0x1c14   :  { %v3485_v49 = vmul.f32 %v7576_v14, %v3481_v52 }
0x1c15   :  { %v3484_v50 = vmul.f32 %v7578_v23, %v3480_v53 }
0x1c16   :  { %v3489_v39 = vadd.f32 -0.28449672, %v3485_v49 }
0x1c17   :  { %v3488_v28 = vadd.f32 -0.28449672, %v3484_v50 }
0x1c18   :  { %v3493_v51 = vmul.f32 %v7576_v14, %v3489_v39 }
0x1c19   :  { %v3492_v54 = vmul.f32 %v7578_v23, %v3488_v28 }
0x1c1a   :  { %v3497_v55 = vadd.f32 0.2548296, %v3493_v51 }
0x1c1b   :  { %v3496_v33 = vadd.f32 0.2548296, %v3492_v54 }
0x1c1c   :  { %v3501_v56 = vmul.f32 %v7576_v14, %v3497_v55 }
0x1c1d   :  { %v3500_v61 = vmul.f32 %v7578_v23, %v3496_v33 }
0x1c1e   :  { %v3521_v60 = vmul.f32 %v7580_v58, %v3501_v56 }
0x1c1f   :  { %v3520_v62 = vmul.f32 %v7582_v29, %v3500_v61 }
0x1c20   :  { %v3525_v0 = vsub.f32 1.0, %v3521_v60 }
0x1c21   :  { %v3524_v27 = vsub.f32 1.0, %v3520_v62 }
0x1c22   :  { %v3529_v6 = vmul.f32 %v3525_v0, %v3449_v5 }
0x1c23   :  { %v3528_v45 = vmul.f32 %v3524_v27, %v3448_v7 }
0x1c24   :  { %v3533_v8 = vadd.f32 1.0, %v3529_v6 }
0x1c25   :  { %v3532_v12 = vadd.f32 1.0, %v3528_v45 }
0x1c26   :  { %v3537_v25 = vmul.f32 %v3533_v8, %v3437_v13 }
0x1c27   :  { %v3536_v16 = vmul.f32 %v3532_v12, %v3436_v9 }
0x1c29   :  { %6906 = vmatprep.mubr.msk.f32.mxu1 %vm676_vm2, %v3536_v16 }
0x1c2a   :  { %6907 = vmatmul.mubr.msk.f32.gmra.mrb[32].mxu1 %vm676_vm2, %v3537_v25 }
0x1c2b   :  { %6927 = vmatprep.mubr.msk.f32.mxu1 %vm8234_vm3, %v8235_v32 }
0x1c6c   :  { %v9129_v63 = vpop.f32.mrb[30].mxu1 }
0x1c6d   :  { %v9131_v10 = vpop.f32.mrb[31].mxu1 }
0x1c6f   :  { %v3984_v24 = vpop.permute.xlu1 %3983  ;;  %v3814_v57 = vpop.permute.xlu0 %3813 }
0x1c70   :  { %6921 = vmatpush3.xpose.msk.msra.mxu0 %vm583_vm4, %v3814_v57 }
0x1c71   :  { %6930 = vmatprep.subr.mxu0 %v8235_v32 }
0x1c73   :  { %6923 = vmatmul.mubr.msk.f32.vlgmr.msra.gmra.mrb[38].mxu0 %vm583_vm4, %v9105_v2  ;;  %v3982_v1 = vpop.permute.xlu1 %3981  ;;  %v4156_v31 = vpop.permute.xlu0 %4155 }
0x1c74   :  { %6931 = vmatpush3.xpose.msk.msra.mxu0 %vm583_vm4, %v3984_v24  ;;  %6932 = vmatprep.mubr.msk.f32.mxu0 %vm8234_vm3, %v8235_v32 }
0x1c75   :  { %6940 = vmatprep.subr.mxu0 %v8235_v32 }
0x1c77   :  { %6933 = vmatmul.mubr.msk.f32.vlgmr.msra.gmra.mrb[40].mxu0 %vm583_vm4, %v3982_v1  ;;  %v4324_v59 = vpop.permute.xlu1 %4323  ;;  %v4322_v20 = vpop.permute.xlu0 %4321 }
0x1c78   :  { %6941 = vmatpush3.xpose.msk.msra.mxu0 %vm583_vm4, %v4156_v31  ;;  %6942 = vmatprep.mubr.msk.f32.mxu0 %vm8234_vm3, %v8235_v32 }
0x1c79   :  { %6950 = vmatprep.subr.mxu0 %v8235_v32 }
0x1c7b   :  { %6943 = vmatmul.mubr.msk.f32.vlgmr.msra.gmra.mrb[42].mxu0 %vm583_vm4, %v9112_v4 }
0x1c7c   :  { %6951 = vmatpush3.xpose.msk.msra.mxu0 %vm583_vm4, %v4324_v59  ;;  %6952 = vmatprep.mubr.msk.f32.mxu0 %vm8234_vm3, %v8235_v32 }
0x1c7d   :  { %7249 = vmatprep.subr.bf16.mxu0 %v8233_v11 }
0x1c7f   :  { %6953 = vmatmul.mubr.msk.f32.vlgmr.msra.gmra.mrb[44].mxu0 %vm583_vm4, %v4322_v20 }
0x1c80   :  { %6968 = vmatprep.mubr.msk.f32.mxu0 %vm8234_vm3, %v8235_v32 }
0x1cfd   :  { %v9155_v37 = vpop.f32.mrb[32].mxu1 }
0x1cfe   :  { %v9157_v21 = vpop.f32.mrb[33].mxu1 }
0x1d46   :  { %v3885_v26 = vpop.f32.mrb[38].mxu0 }
0x1d47   :  { %v3889_v18 = vmul.f32 0.25, %v3885_v26  ;;  %v6924_v36 = vpop.f32.mrb[39].mxu0 }
0x1d49   :  { %v3891_v22 = vsel %vm3890_vm15, %v3889_v18, -inf }
0x1d4a   :  { %3892 = vmax.xlane.f32.xlu1 %v3891_v22  ;;  %v4055_v14 = vpop.f32.mrb[40].mxu0 }
0x1d4b   :  { %v4059_v15 = vmul.f32 0.25, %v4055_v14  ;;  %v6934_v23 = vpop.f32.mrb[41].mxu0  ;;  %v4494_v14 = vld [vmem:[%s9467_s17] sm:$0xff] }
0x1d4d   :  { %v4060_v40 = vsel %vm3890_vm15, %v4059_v15, -inf }
0x1d4e   :  { %4061 = vmax.xlane.f32.xlu0 %v4060_v40  ;;  %v4227_v41 = vpop.f32.mrb[42].mxu0  ;;  %v4496_v40 = vld [vmem:[%s9467_s17 + $0x10] sm:$0xff] }
0x1d4f   :  { %v4231_v30 = vmul.f32 0.25, %v4227_v41  ;;  %v6944_v42 = vpop.f32.mrb[43].mxu0  ;;  %v4497_v41 = vld [vmem:[%s9467_s17 + $0x18] sm:$0xff] }
0x1d51   :  { %v4232_v43 = vsel %vm3890_vm15, %v4231_v30, -inf }
0x1d52   :  { %4233 = vmax.xlane.f32.xlu0 %v4232_v43  ;;  %v4395_v44 = vpop.f32.mrb[44].mxu0 }
0x1d53   :  { %v4399_v38 = vmul.f32 0.25, %v4395_v44  ;;  %v6954_v46 = vpop.f32.mrb[45].mxu0 }
0x1d55   :  { %v4400_v35 = vsel %vm3890_vm15, %v4399_v38, -inf }
0x1d56   :  { %4401 = vmax.xlane.f32.xlu1 %v4400_v35 }
0x1d67   :  { %4071 = vrot.lane.b32.xlu1 %v9105_v2, %s8238_s18 }
0x1dd7   :  { %v3893_v52 = vpop.xlane.xlu1 %3892 }
0x1dd8   :  { %v3894_v53 = vsub.f32 %v3889_v18, %v3893_v52 }
0x1dda   :  { %v3895_v49 = vmul.f32 1.442695, %v3894_v53  ;;  %v6395_v53 = vld [vmem:[#allocation23] ss:$0 sm:$0xff] }
0x1ddb   :  { %v4062_v50 = vpop.xlane.xlu0 %4061 }
0x1ddc   :  { %7583 = vpow2.f32 %v3895_v49  ;;  %v4063_v39 = vsub.f32 %v4059_v15, %v4062_v50  ;;  %v4495_v15 = vld [vmem:[%s9467_s17 + $0x8] sm:$0xff] }
0x1ddd   :  { %v7250_v23 = vpack.c.bf16 %v4495_v15, %v4494_v14 }
0x1dde   :  { %v4064_v28 = vmul.f32 1.442695, %v4063_v39 }
0x1ddf   :  { %v4234_v62 = vpop.xlane.xlu0 %4233  ;;  %7251 = vmatpush3.bf16.msra.mxu0 %v7250_v23 }
0x1de0   :  { %7585 = vpow2.f32 %v4064_v28  ;;  %v4235_v0 = vsub.f32 %v4231_v30, %v4234_v62  ;;  %v7253_v30 = vpack.c.bf16 %v4497_v41, %v4496_v40  ;;  %7252 = vmatprep.subr.bf16.mxu0 %v8233_v11  ;;  %v4610_v62 = vld [vmem:[#allocation28 + $0x10] sm:$0xff] }
0x1de2   :  { %v4236_v5 = vmul.f32 1.442695, %v4235_v0  ;;  %v4611_v0 = vld [vmem:[#allocation28 + $0x18] sm:$0xff] }
0x1de3   :  { %v4402_v51 = vpop.xlane.xlu1 %4401  ;;  %7254 = vmatpush3.bf16.msra.mxu0 %v7253_v30 }
0x1de4   :  { %v4403_v54 = vsub.f32 %v4399_v38, %v4402_v51  ;;  %7261 = vmatprep.subr.bf16.mxu0 %v8233_v11 }
0x1de6   :  { %v7584_v55 = vpop.eup %7583  ;;  %v4404_v33 = vmul.f32 1.442695, %v4403_v54 }
0x1de7   :  { %v3897_v56 = vsel %vm3890_vm15, %v7584_v55, 0.0  ;;  %v4072_v7 = vpop.permute.xlu1 %4071 }
0x1de8   :  { %7587 = vpow2.f32 %v4404_v33  ;;  %3898 = vadd.xlane.f32.xlu0 %v3897_v56 }
0x1de9   :  { %7589 = vpow2.f32 %v4236_v5  ;;  %v7259_v5 = vpack.c.bf16 %v4611_v0, %v4610_v62 }
0x1dea   :  { %v7586_v58 = vpop.eup %7585 }
0x1deb   :  { %v4066_v61 = vsel %vm3890_vm15, %v7586_v58, 0.0 }
0x1dec   :  { %4067 = vadd.xlane.f32.xlu1 %v4066_v61  ;;  %v4608_v61 = vld [vmem:[#allocation28] sm:$0xff] }
0x1df2   :  { %v7588_v29 = vpop.eup %7587 }
0x1df3   :  { %v4406_v60 = vsel %vm3890_vm15, %v7588_v29, 0.0  ;;  %v7590_v27 = vpop.eup %7589 }
0x1df4   :  { %4407 = vadd.xlane.f32.xlu1 %v4406_v60  ;;  %v4238_v6 = vsel %vm3890_vm15, %v7590_v27, 0.0 }
0x1dfe   :  { %3902 = vrot.lane.b32.xlu0 %v9105_v2, %s8240_s6 }
0x1e05   :  { %4243 = vrot.lane.b32.xlu1 %v9112_v4, %s8240_s6 }
0x1e1d   :  { %4239 = vadd.xlane.f32.xlu0 %v4238_v6 }
0x1e33   :  { %4411 = vrot.lane.b32.xlu0 %v9112_v4, %s8238_s18 }
0x1e75   :  { %v3899_v45 = vpop.xlane.xlu0 %3898 }
0x1e76   :  { %7591 = vrcp.f32 %v3899_v45  ;;  %v6397_v45 = vld [vmem:[#allocation25] ss:$0 sm:$0xff] }
0x1e79   :  { %v3903_v8 = vpop.permute.xlu0 %3902  ;;  %v4068_v9 = vpop.xlane.xlu1 %4067 }
0x1e7a   :  { %7593 = vrcp.f32 %v4068_v9  ;;  %6926 = vmatpush3.msk.msra.mxu1 %vm479_vm0, %v3903_v8  ;;  %v6398_v9 = vld [vmem:[#allocation26] ss:$0 sm:$0xff] }
0x1e7b   :  { %6935 = vmatprep.subr.mxu1 %v8235_v32 }
0x1e80   :  { %v7592_v2 = vpop.eup %7591 }
0x1e81   :  { %v3901_v12 = vmul.f32 %v7592_v2, %v7584_v55  ;;  %v4408_v13 = vpop.xlane.xlu1 %4407 }
0x1e83   :  { %6928 = vmatmul.mubr.msk.f32.vlgmr.msra.gmra.mrb[34].mxu1 %vm466_vm1, %v3901_v12 }
0x1e84   :  { %v7594_v16 = vpop.eup %7593  ;;  %6936 = vmatpush3.msk.msra.mxu1 %vm479_vm0, %v4072_v7  ;;  %6937 = vmatprep.mubr.msk.f32.mxu1 %vm8234_vm3, %v8235_v32 }
0x1e85   :  { %v4070_v4 = vmul.f32 %v7594_v16, %v7586_v58  ;;  %v4244_v25 = vpop.permute.xlu1 %4243  ;;  %6945 = vmatprep.subr.mxu1 %v8235_v32  ;;  %v4719_v16 = vld [vmem:[#allocation29 + $0x8] sm:$0xff] }
0x1e87   :  { %6938 = vmatmul.mubr.msk.f32.vlgmr.msra.gmra.mrb[36].mxu1 %vm466_vm1, %v4070_v4 }
0x1e88   :  { %6946 = vmatpush3.msk.msra.mxu1 %vm479_vm0, %v4244_v25  ;;  %6947 = vmatprep.mubr.msk.f32.mxu1 %vm8234_vm3, %v8235_v32  ;;  %v4720_v25 = vld [vmem:[#allocation29 + $0x10] sm:$0xff] }
0x1e89   :  { %6955 = vmatprep.subr.mxu1 %v8235_v32 }
0x1eaa   :  { %v4240_v24 = vpop.xlane.xlu0 %4239 }
0x1eab   :  { %7595 = vrcp.f32 %v4240_v24  ;;  %v4721_v24 = vld [vmem:[#allocation29 + $0x18] sm:$0xff] }
0x1eac   :  { %7597 = vrcp.f32 %v4408_v13  ;;  %v4718_v13 = vld [vmem:[#allocation29] sm:$0xff] }
0x1ead   :  { %v7262_v4 = vpack.c.bf16 %v4719_v16, %v4718_v13 }
0x1eae   :  { %v4412_v59 = vpop.permute.xlu0 %4411 }
0x1eb5   :  { %v7596_v57 = vpop.eup %7595 }
0x1eb6   :  { %v4242_v1 = vmul.f32 %v7596_v57, %v7590_v27  ;;  %v7598_v31 = vpop.eup %7597  ;;  %v7265_v57 = vpack.c.bf16 %v4721_v24, %v4720_v25  ;;  %v6403_v25 = vld [vmem:[#allocation32] ss:$0 sm:$0xff] }
0x1eb7   :  { %v4410_v20 = vmul.f32 %v7598_v31, %v7588_v29  ;;  %v4609_v29 = vld [vmem:[#allocation28 + $0x8] sm:$0xff] }
0x1eb8   :  { %6948 = vmatmul.mubr.msk.f32.vlgmr.msra.gmra.mrb[38].mxu1 %vm466_vm1, %v4242_v1  ;;  %v7256_v60 = vpack.c.bf16 %v4609_v29, %v4608_v61  ;;  %v6399_v1 = vld [vmem:[%s9468_s1] ss:$0 sm:$0xff] }
0x1eb9   :  { %6956 = vmatpush3.msk.msra.mxu1 %vm479_vm0, %v4412_v59  ;;  %6957 = vmatprep.mubr.msk.f32.mxu1 %vm8234_vm3, %v8235_v32 }
0x1eba   :  { %7255 = vmatprep.subr.bf16.mxu1 %v8233_v11 }
0x1ebc   :  { %6958 = vmatmul.mubr.msk.f32.vlgmr.msra.gmra.mrb[40].mxu1 %vm466_vm1, %v4410_v20 }
0x1ebd   :  { %6979 = vmatprep.mubr.msk.f32.mxu1 %vm8234_vm3, %v8235_v32  ;;  %7257 = vmatpush3.bf16.msra.mxu1 %v7256_v60 }
0x1ebe   :  { %7258 = vmatprep.subr.bf16.mxu1 %v8233_v11 }
0x1ec1   :  { %7260 = vmatpush3.bf16.msra.mxu1 %v7259_v5 }
0x1ec2   :  { %7267 = vmatprep.subr.bf16.mxu1 %v8233_v11 }
0x1f56   :  { %v3975_v26 = vpop.f32.mrb[34].mxu1 }
0x1f57   :  { %3980 = vst.msk [vmem:[#allocation2] sm:$0xf] %vm3979_vm5, %v3975_v26  ;;  %v6929_v18 = vpop.f32.mrb[35].mxu1 }
0x1f5a   :  { %v4144_v36 = vpop.f32.mrb[36].mxu1 }
0x1f5b   :  { %4149 = vrot.lane.b32.xlu1 %v4144_v36, %s8207_s15  ;;  %v6939_v22 = vpop.f32.mrb[37].mxu1 }
0x1f8b   :  { %v4316_v42 = vpop.f32.mrb[38].mxu1 }
0x1f8c   :  { %4320 = vst.msk [vmem:[#allocation2 + $0x4] sm:$0xf] %vm3979_vm5, %v4316_v42  ;;  %v6949_v43 = vpop.f32.mrb[39].mxu1 }
0x1f8f   :  { %v4484_v44 = vpop.f32.mrb[40].mxu1 }
0x1f90   :  { %4489 = vrot.lane.b32.xlu0 %v4484_v44, %s8207_s15  ;;  %v6959_v38 = vpop.f32.mrb[41].mxu1 }
0x1fcd   :  { %v4150_v46 = vpop.permute.xlu1 %4149 }
0x1fce   :  { %4153 = vst.msk [vmem:[#allocation2] sm:$0xf] %vm4152_vm6, %v4150_v46 }
0x2002   :  { %v4490_v35 = vpop.permute.xlu0 %4489 }
0x2003   :  { %4492 = vst.msk [vmem:[#allocation2 + $0x4] sm:$0xf] %vm4152_vm6, %v4490_v35 }
0x200a   :  { %v4493_v52 = vld [vmem:[#allocation2] sm:$0xff] }
0x200b   :  { %6969 = vmatmul.mubr.msk.f32.vlgmr.msra.gmra.mrb[46].mxu0 %vm676_vm2, %v4493_v52 }
0x200c   :  { %6990 = vmatprep.mubr.msk.f32.mxu0 %vm8234_vm3, %v8235_v32  ;;  %7263 = vmatpush3.bf16.msra.mxu0 %v7262_v4 }
0x200d   :  { %7264 = vmatprep.subr.bf16.mxu0 %v8233_v11 }
0x2010   :  { %7266 = vmatpush3.bf16.msra.mxu0 %v7265_v57  ;;  %v6404_v57 = vld [vmem:[#allocation34] ss:$0 sm:$0xff] }
0x2011   :  { %7004 = vmatprep.subr.mxu0 %v8235_v32 }
0x20de   :  { %v4574_v49 = vpop.f32.mrb[46].mxu0 }
0x20df   :  { %v4575_v50 = vadd.f32 %v6395_v53, %v4574_v49  ;;  %v6970_v39 = vpop.f32.mrb[47].mxu0 }
0x20e1   :  { %v4578_v28 = vadd.f32 %v4575_v50, %v9086_v19 }
0x20e3   :  { %v4581_v51 = vsel %vm676_vm2, %v4578_v28, 0.0 }
0x20e4   :  { %4582 = vadd.xlane.f32.xlu1 %v4581_v51 }
0x2171   :  { %v4583_v54 = vpop.xlane.xlu1 %4582 }
0x2172   :  { %v4584_v55 = vmul.f32 0.03125, %v4583_v54 }
0x2174   :  { %v4585_v33 = vsub.f32 %v4578_v28, %v4584_v55 }
0x2176   :  { %v4586_v56 = vmul.f32 %v4585_v33, %v4585_v33 }
0x2178   :  { %v4587_v58 = vsel %vm676_vm2, %v4586_v56, 0.0 }
0x2179   :  { %4588 = vadd.xlane.f32.xlu0 %v4587_v58 }
0x2206   :  { %v4589_v19 = vpop.xlane.xlu0 %4588 }
0x2207   :  { %v4590_v27 = vmul.f32 0.03125, %v4589_v19 }
0x2209   :  { %v4591_v6 = vadd.f32 1e-05, %v4590_v27 }
0x220b   :  { %7599 = vrsqrt.f32 %v4591_v6  ;;  %v6405_v6 = vld [vmem:[%s9465_s28 + $0x20] sm:$0xff] }
0x2215   :  { %v7600_v7 = vpop.eup %7599 }
0x2216   :  { %v4593_v8 = vmul.f32 %v7600_v7, %v4585_v33  ;;  %v6401_v33 = vld [vmem:[#allocation31] ss:$0 sm:$0xff]  ;;  %v6406_v7 = vld [vmem:[%s9465_s28 + $0x28] sm:$0xff] }
0x2218   :  { %v4600_v2 = vmul.f32 %v6397_v45, %v4593_v8  ;;  %v7268_v45 = vpack.c.bf16 %v6406_v7, %v6405_v6  ;;  %v6407_v8 = vld [vmem:[%s9465_s28 + $0x30] sm:$0xff] }
0x221a   :  { %v4607_v12 = vadd.f32 %v6398_v9, %v4600_v2  ;;  %v6408_v9 = vld [vmem:[%s9465_s28 + $0x38] sm:$0xff] }
0x221b   :  { %v7271_v2 = vpack.c.bf16 %v6408_v9, %v6407_v8 }
0x221c   :  { %6980 = vmatmul.mubr.msk.f32.vlgmr.msra.gmra.mrb[42].mxu1 %vm676_vm2, %v4607_v12 }
0x221d   :  { %7001 = vmatprep.mubr.msk.f32.mxu1 %vm8234_vm3, %v8235_v32  ;;  %7269 = vmatpush3.bf16.msra.mxu1 %v7268_v45 }
0x221e   :  { %7270 = vmatprep.subr.bf16.mxu1 %v8233_v11 }
0x2221   :  { %7272 = vmatpush3.bf16.msra.mxu1 %v7271_v2 }
0x2222   :  { %7009 = vmatprep.subr.mxu1 %v8235_v32 }
0x22ef   :  { %v4688_v31 = vpop.f32.mrb[42].mxu1 }
0x22f0   :  { %v4689_v59 = vadd.f32 %v6399_v1, %v4688_v31  ;;  %v6981_v20 = vpop.f32.mrb[43].mxu1 }
0x22f2   :  { %v4693_v26 = vmul.f32 0.70710677, %v4689_v59  ;;  %v4692_v51 = vmul.f32 0.5, %v4689_v59  ;;  %v6409_v59 = vld [vmem:[#allocation22 + $0x1] ss:$0 sm:$0xff] }
0x22f4   :  { %v4696_v18 = vand.u32 2147483647, %v4693_v26  ;;  %vm4694_vm7 = vcmp.ge.f32.partialorder %v4693_v26, 0.0 }
0x22f5   :  { %v4695_v39 = vsel %vm4694_vm7, 1.0, %v8241_v3 }
0x22f6   :  { %v4697_v36 = vmul.f32 0.3275911, %v4696_v18  ;;  %v4709_v14 = vsub.f32 0.0, %v4696_v18 }
0x22f8   :  { %v4698_v22 = vadd.f32 1.0, %v4697_v36  ;;  %v4710_v23 = vmul.f32 %v4709_v14, %v4696_v18 }
0x22fa   :  { %7601 = vrcp.f32 %v4698_v22  ;;  %v4711_v30 = vmul.f32 1.442695, %v4710_v23 }
0x22fc   :  { %7603 = vpow2.f32 %v4711_v30 }
0x2304   :  { %v7602_v15 = vpop.eup %7601 }
0x2305   :  { %v4700_v40 = vmul.f32 1.0614054, %v7602_v15 }
0x2306   :  { %v7604_v53 = vpop.eup %7603 }
0x2307   :  { %v4701_v41 = vadd.f32 -1.4531521, %v4700_v40 }
0x2309   :  { %v4702_v42 = vmul.f32 %v7602_v15, %v4701_v41 }
0x230b   :  { %v4703_v43 = vadd.f32 1.4214138, %v4702_v42 }
0x230d   :  { %v4704_v44 = vmul.f32 %v7602_v15, %v4703_v43 }
0x230f   :  { %v4705_v38 = vadd.f32 -0.28449672, %v4704_v44 }
0x2311   :  { %v4706_v46 = vmul.f32 %v7602_v15, %v4705_v38 }
0x2313   :  { %v4707_v35 = vadd.f32 0.2548296, %v4706_v46 }
0x2315   :  { %v4708_v52 = vmul.f32 %v7602_v15, %v4707_v35 }
0x2317   :  { %v4713_v49 = vmul.f32 %v7604_v53, %v4708_v52 }
0x2319   :  { %v4714_v50 = vsub.f32 1.0, %v4713_v49 }
0x231b   :  { %v4715_v28 = vmul.f32 %v4714_v50, %v4695_v39 }
0x231d   :  { %v4716_v54 = vadd.f32 1.0, %v4715_v28 }
0x231f   :  { %v4717_v55 = vmul.f32 %v4716_v54, %v4692_v51 }
0x2321   :  { %6991 = vmatmul.mubr.msk.f32.vlgmr.msra.gmra.mrb[48].mxu0 %vm676_vm2, %v4717_v55 }
0x2322   :  { %7006 = vmatprep.mubr.msk.f32.mxu0 %vm8234_vm3, %v8235_v32 }
0x23f4   :  { %v4798_v56 = vpop.f32.mrb[48].mxu0 }
0x23f5   :  { %v4799_v58 = vadd.f32 %v6401_v33, %v4798_v56  ;;  %v6992_v61 = vpop.f32.mrb[49].mxu0 }
0x23f7   :  { %v4802_v29 = vadd.f32 %v4799_v58, %v4607_v12 }
0x23f9   :  { %v4805_v60 = vsel %vm676_vm2, %v4802_v29, 0.0 }
0x23fa   :  { %4806 = vadd.xlane.f32.xlu0 %v4805_v60 }
0x2487   :  { %v4807_v62 = vpop.xlane.xlu0 %4806 }
0x2488   :  { %v4808_v0 = vmul.f32 0.03125, %v4807_v62 }
0x248a   :  { %v4809_v5 = vsub.f32 %v4802_v29, %v4808_v0 }
0x248c   :  { %v4810_v19 = vmul.f32 %v4809_v5, %v4809_v5 }
0x248e   :  { %v4811_v27 = vsel %vm676_vm2, %v4810_v19, 0.0 }
0x248f   :  { %4812 = vadd.xlane.f32.xlu1 %v4811_v27 }
0x251c   :  { %v4813_v12 = vpop.xlane.xlu1 %4812 }
0x251d   :  { %v4814_v13 = vmul.f32 0.03125, %v4813_v12 }
0x251f   :  { %v4815_v16 = vadd.f32 1e-05, %v4814_v13 }
0x2521   :  { %7605 = vrsqrt.f32 %v4815_v16 }
0x252b   :  { %v7606_v4 = vpop.eup %7605 }
0x252c   :  { %v4817_v24 = vmul.f32 %v7606_v4, %v4809_v5 }
0x252e   :  { %v4824_v1 = vmul.f32 %v6403_v25, %v4817_v24 }
0x2530   :  { %v9233_v31 = vadd.f32 %v6404_v57, %v4824_v1 }
0x2532   :  { %7002 = vmatmul.mubr.msk.f32.vlgmr.msra.gmra.mrb[44].mxu1 %vm676_vm2, %v9233_v31 }
0x2533   :  { %7011 = vmatprep.mubr.msk.f32.mxu1 %vm8234_vm3, %v8235_v32 }
0x2605   :  { %v4914_v20 = vpop.f32.mrb[44].mxu1 }
0x2606   :  { %v9239_v26 = vadd.f32 %v6409_v59, %v4914_v20  ;;  %v7003_v18 = vpop.f32.mrb[45].mxu1 }
0x2608   :  { %5087 = vrot.lane.b32.xlu1 %v9239_v26, %s8237_s21  ;;  %4919 = vrot.lane.b32.xlu0 %v9239_v26, %s8239_s14  ;;  %v9246_v36 = vrot.slane %v9239_v26, 4 }
0x260c   :  { %5085 = vrot.lane.b32.xlu1 %v9239_v26, %s8236_s11  ;;  %5258 = vrot.lane.b32.xlu0 %v9246_v36, %s8239_s14 }
0x2610   :  { %5426 = vrot.lane.b32.xlu1 %v9246_v36, %s8237_s21  ;;  %5424 = vrot.lane.b32.xlu0 %v9246_v36, %s8236_s11 }
0x267a   :  { %v5088_v22 = vpop.permute.xlu1 %5087  ;;  %v4920_v14 = vpop.permute.xlu0 %4919 }
0x267b   :  { %7005 = vmatpush3.xpose.msk.msra.mxu0 %vm583_vm4, %v4920_v14 }
0x267c   :  { %7014 = vmatprep.subr.mxu0 %v8235_v32 }
0x267e   :  { %7007 = vmatmul.mubr.msk.f32.vlgmr.msra.gmra.mrb[50].mxu0 %vm583_vm4, %v9239_v26  ;;  %v5086_v15 = vpop.permute.xlu1 %5085  ;;  %v5259_v23 = vpop.permute.xlu0 %5258 }
0x267f   :  { %7015 = vmatpush3.xpose.msk.msra.mxu0 %vm583_vm4, %v5088_v22  ;;  %7016 = vmatprep.mubr.msk.f32.mxu0 %vm8234_vm3, %v8235_v32 }
0x2680   :  { %7024 = vmatprep.subr.mxu0 %v8235_v32 }
0x2682   :  { %7017 = vmatmul.mubr.msk.f32.vlgmr.msra.gmra.mrb[52].mxu0 %vm583_vm4, %v5086_v15  ;;  %v5427_v40 = vpop.permute.xlu1 %5426  ;;  %v5425_v41 = vpop.permute.xlu0 %5424 }
0x2683   :  { %7025 = vmatpush3.xpose.msk.msra.mxu0 %vm583_vm4, %v5259_v23  ;;  %7026 = vmatprep.mubr.msk.f32.mxu0 %vm8234_vm3, %v8235_v32 }
0x2684   :  { %7034 = vmatprep.subr.mxu0 %v8235_v32 }
0x2686   :  { %7027 = vmatmul.mubr.msk.f32.vlgmr.msra.gmra.mrb[54].mxu0 %vm583_vm4, %v9246_v36 }
0x2687   :  { %7035 = vmatpush3.xpose.msk.msra.mxu0 %vm583_vm4, %v5427_v40  ;;  %7036 = vmatprep.mubr.msk.f32.mxu0 %vm8234_vm3, %v8235_v32 }
0x2688   :  { %7273 = vmatprep.subr.bf16.mxu0 %v8233_v11 }
0x268a   :  { %7037 = vmatmul.mubr.msk.f32.vlgmr.msra.gmra.mrb[56].mxu0 %vm583_vm4, %v5425_v41 }
0x268b   :  { %7052 = vmatprep.mubr.msk.f32.mxu0 %vm8234_vm3, %v8235_v32 }
0x2751   :  { %v4991_v30 = vpop.f32.mrb[50].mxu0 }
0x2752   :  { %v4995_v42 = vmul.f32 0.25, %v4991_v30  ;;  %v7008_v43 = vpop.f32.mrb[51].mxu0 }
0x2754   :  { %v4996_v44 = vsel %vm3890_vm15, %v4995_v42, -inf }
0x2755   :  { %v5159_v38 = vpop.f32.mrb[52].mxu0  ;;  %4997 = vmax.xlane.f32.xlu1 %v4996_v44 }
0x2756   :  { %v5163_v46 = vmul.f32 0.25, %v5159_v38  ;;  %v7018_v35 = vpop.f32.mrb[53].mxu0  ;;  %v6427_v38 = vld [vmem:[%s9467_s17 + $0x20] sm:$0xff] }
0x2758   :  { %v5164_v52 = vsel %vm3890_vm15, %v5163_v46, -inf }
0x2759   :  { %5165 = vmax.xlane.f32.xlu0 %v5164_v52  ;;  %v5330_v53 = vpop.f32.mrb[54].mxu0  ;;  %v6429_v52 = vld [vmem:[%s9467_s17 + $0x30] sm:$0xff] }
0x275a   :  { %v5334_v49 = vmul.f32 0.25, %v5330_v53  ;;  %v7028_v50 = vpop.f32.mrb[55].mxu0  ;;  %v6430_v53 = vld [vmem:[%s9467_s17 + $0x38] sm:$0xff] }
0x275c   :  { %v5335_v39 = vsel %vm3890_vm15, %v5334_v49, -inf }
0x275d   :  { %5336 = vmax.xlane.f32.xlu0 %v5335_v39  ;;  %v5498_v28 = vpop.f32.mrb[56].mxu0 }
0x275e   :  { %v5502_v51 = vmul.f32 0.25, %v5498_v28  ;;  %v7038_v54 = vpop.f32.mrb[57].mxu0 }
0x2760   :  { %v5503_v55 = vsel %vm3890_vm15, %v5502_v51, -inf }
0x2761   :  { %5504 = vmax.xlane.f32.xlu1 %v5503_v55 }
0x2772   :  { %5175 = vrot.lane.b32.xlu1 %v9239_v26, %s8238_s18 }
0x27e2   :  { %v4998_v33 = vpop.xlane.xlu1 %4997 }
0x27e3   :  { %v4999_v56 = vsub.f32 %v4995_v42, %v4998_v33 }
0x27e5   :  { %v5000_v58 = vmul.f32 1.442695, %v4999_v56  ;;  %v9329_v56 = vld [vmem:[#allocation13 + $0x1] ss:$0 sm:$0xff] }
0x27e6   :  { %v5166_v61 = vpop.xlane.xlu0 %5165 }
0x27e7   :  { %7607 = vpow2.f32 %v5000_v58  ;;  %v5167_v29 = vsub.f32 %v5163_v46, %v5166_v61  ;;  %v6428_v46 = vld [vmem:[%s9467_s17 + $0x28] sm:$0xff]  ;;  %v6431_v58 = vld [vmem:[#allocation23 + $0x1] ss:$0 sm:$0xff] }
0x27e8   :  { %v7274_v35 = vpack.c.bf16 %v6428_v46, %v6427_v38 }
0x27e9   :  { %v5168_v60 = vmul.f32 1.442695, %v5167_v29  ;;  %v3630_v29 = vadd.f32 %v9329_v56, %v9131_v10 }
0x27ea   :  { %v5337_v9 = vpop.xlane.xlu0 %5336  ;;  %7275 = vmatpush3.bf16.msra.mxu0 %v7274_v35 }
0x27eb   :  { %7609 = vpow2.f32 %v5168_v60  ;;  %v5338_v2 = vsub.f32 %v5334_v49, %v5337_v9  ;;  %v7277_v49 = vpack.c.bf16 %v6430_v53, %v6429_v52  ;;  %7276 = vmatprep.subr.bf16.mxu0 %v8233_v11  ;;  %v5717_v9 = vld [vmem:[#allocation28 + $0x28] sm:$0xff] }
0x27ed   :  { %v5339_v12 = vmul.f32 1.442695, %v5338_v2 }
0x27ee   :  { %v5505_v62 = vpop.xlane.xlu1 %5504  ;;  %7278 = vmatpush3.bf16.msra.mxu0 %v7277_v49 }
0x27ef   :  { %v5506_v0 = vsub.f32 %v5502_v51, %v5505_v62  ;;  %7285 = vmatprep.subr.bf16.mxu0 %v8233_v11 }
0x27f1   :  { %v7608_v5 = vpop.eup %7607  ;;  %v5507_v19 = vmul.f32 1.442695, %v5506_v0 }
0x27f2   :  { %v5002_v27 = vsel %vm3890_vm15, %v7608_v5, 0.0  ;;  %v5176_v4 = vpop.permute.xlu1 %5175 }
0x27f3   :  { %7611 = vpow2.f32 %v5507_v19  ;;  %5003 = vadd.xlane.f32.xlu0 %v5002_v27  ;;  %v3640_v19 = vadd.f32 %v9329_v56, %v9157_v21 }
0x27f4   :  { %7613 = vpow2.f32 %v5339_v12  ;;  %v5719_v12 = vld [vmem:[#allocation28 + $0x38] sm:$0xff] }
0x27f5   :  { %v7610_v6 = vpop.eup %7609 }
0x27f6   :  { %v5170_v7 = vsel %vm3890_vm15, %v7610_v6, 0.0 }
0x27f7   :  { %5171 = vadd.xlane.f32.xlu1 %v5170_v7 }
0x27fd   :  { %v7612_v45 = vpop.eup %7611 }
0x27fe   :  { %v5509_v8 = vsel %vm3890_vm15, %v7612_v45, 0.0  ;;  %v7614_v13 = vpop.eup %7613 }
0x27ff   :  { %5510 = vadd.xlane.f32.xlu1 %v5509_v8  ;;  %v5341_v16 = vsel %vm3890_vm15, %v7614_v13, 0.0  ;;  %v5716_v8 = vld [vmem:[#allocation28 + $0x20] sm:$0xff] }
0x2800   :  { %v7280_v2 = vpack.c.bf16 %v5717_v9, %v5716_v8 }
0x2809   :  { %5007 = vrot.lane.b32.xlu0 %v9239_v26, %s8240_s6 }
0x2810   :  { %5346 = vrot.lane.b32.xlu1 %v9246_v36, %s8240_s6 }
0x2828   :  { %5342 = vadd.xlane.f32.xlu0 %v5341_v16 }
0x283e   :  { %5514 = vrot.lane.b32.xlu0 %v9246_v36, %s8238_s18 }
0x2880   :  { %v5004_v25 = vpop.xlane.xlu0 %5003 }
0x2881   :  { %7615 = vrcp.f32 %v5004_v25 }
0x2884   :  { %v5172_v24 = vpop.xlane.xlu1 %5171  ;;  %v5008_v57 = vpop.permute.xlu0 %5007 }
0x2885   :  { %7617 = vrcp.f32 %v5172_v24  ;;  %7010 = vmatpush3.msk.msra.mxu1 %vm479_vm0, %v5008_v57  ;;  %v6433_v57 = vld [vmem:[#allocation25 + $0x1] ss:$0 sm:$0xff] }
0x2886   :  { %7019 = vmatprep.subr.mxu1 %v8235_v32 }
0x288b   :  { %v7616_v1 = vpop.eup %7615 }
0x288c   :  { %v5006_v59 = vmul.f32 %v7616_v1, %v7608_v5  ;;  %v5511_v20 = vpop.xlane.xlu1 %5510  ;;  %v9335_v5 = vadd.f32 %v3630_v29, %v9055_v47 }
0x288e   :  { %7012 = vmatmul.mubr.msk.f32.vlgmr.msra.gmra.mrb[46].mxu1 %vm466_vm1, %v5006_v59  ;;  %v6434_v59 = vld [vmem:[#allocation26 + $0x1] ss:$0 sm:$0xff] }
0x288f   :  { %v7618_v26 = vpop.eup %7617  ;;  %7020 = vmatpush3.msk.msra.mxu1 %vm479_vm0, %v5176_v4  ;;  %7021 = vmatprep.mubr.msk.f32.mxu1 %vm8234_vm3, %v8235_v32 }
0x2890   :  { %v5174_v18 = vmul.f32 %v7618_v26, %v7610_v6  ;;  %v5347_v36 = vpop.permute.xlu1 %5346  ;;  %7029 = vmatprep.subr.mxu1 %v8235_v32  ;;  %v3656_v6 = vsel %vm676_vm2, %v9335_v5, 0.0 }
0x2892   :  { %7022 = vmatmul.mubr.msk.f32.vlgmr.msra.gmra.mrb[48].mxu1 %vm466_vm1, %v5174_v18  ;;  %v5828_v18 = vld [vmem:[#allocation29 + $0x20] sm:$0xff] }
0x2893   :  { %7030 = vmatpush3.msk.msra.mxu1 %vm479_vm0, %v5347_v36  ;;  %7031 = vmatprep.mubr.msk.f32.mxu1 %vm8234_vm3, %v8235_v32  ;;  %v5829_v36 = vld [vmem:[#allocation29 + $0x28] sm:$0xff] }
0x2894   :  { %7039 = vmatprep.subr.mxu1 %v8235_v32 }
0x28b5   :  { %v5343_v22 = vpop.xlane.xlu0 %5342 }
0x28b6   :  { %7619 = vrcp.f32 %v5343_v22  ;;  %v7286_v22 = vpack.c.bf16 %v5829_v36, %v5828_v18 }
0x28b7   :  { %7621 = vrcp.f32 %v5511_v20 }
0x28b9   :  { %v5515_v40 = vpop.permute.xlu0 %5514 }
0x28c0   :  { %v7620_v14 = vpop.eup %7619 }
0x28c1   :  { %v5345_v15 = vmul.f32 %v7620_v14, %v7614_v13  ;;  %v7622_v23 = vpop.eup %7621  ;;  %v5830_v14 = vld [vmem:[#allocation29 + $0x30] sm:$0xff] }
0x28c2   :  { %v5513_v41 = vmul.f32 %v7622_v23, %v7612_v45 }
0x28c3   :  { %7032 = vmatmul.mubr.msk.f32.vlgmr.msra.gmra.mrb[50].mxu1 %vm466_vm1, %v5345_v15  ;;  %v5831_v15 = vld [vmem:[#allocation29 + $0x38] sm:$0xff] }
0x28c4   :  { %7040 = vmatpush3.msk.msra.mxu1 %vm479_vm0, %v5515_v40  ;;  %7041 = vmatprep.mubr.msk.f32.mxu1 %vm8234_vm3, %v8235_v32  ;;  %v7289_v23 = vpack.c.bf16 %v5831_v15, %v5830_v14  ;;  %v6436_v40 = vld [vmem:[%s9468_s1 + $0x1] ss:$0 sm:$0xff] }
0x28c5   :  { %7279 = vmatprep.subr.bf16.mxu1 %v8233_v11 }
0x28c7   :  { %7042 = vmatmul.mubr.msk.f32.vlgmr.msra.gmra.mrb[52].mxu1 %vm466_vm1, %v5513_v41 }
0x28c8   :  { %7063 = vmatprep.mubr.msk.f32.mxu1 %vm8234_vm3, %v8235_v32  ;;  %7281 = vmatpush3.bf16.msra.mxu1 %v7280_v2 }
0x28c9   :  { %7282 = vmatprep.subr.bf16.mxu1 %v8233_v11 }
0x2961   :  { %v5080_v30 = vpop.f32.mrb[46].mxu1 }
0x2962   :  { %5084 = vst.msk [vmem:[#allocation2] sm:$0xf] %vm3979_vm5, %v5080_v30  ;;  %v7013_v42 = vpop.f32.mrb[47].mxu1 }
0x2965   :  { %v5248_v43 = vpop.f32.mrb[48].mxu1 }
0x2966   :  { %5253 = vrot.lane.b32.xlu1 %v5248_v43, %s8207_s15  ;;  %v7023_v44 = vpop.f32.mrb[49].mxu1 }
0x2996   :  { %v5419_v50 = vpop.f32.mrb[50].mxu1 }
0x2997   :  { %5423 = vst.msk [vmem:[#allocation2 + $0x4] sm:$0xf] %vm3979_vm5, %v5419_v50  ;;  %v7033_v39 = vpop.f32.mrb[51].mxu1 }
0x299a   :  { %v5587_v28 = vpop.f32.mrb[52].mxu1 }
0x299b   :  { %5592 = vrot.lane.b32.xlu0 %v5587_v28, %s8207_s15  ;;  %v7043_v51 = vpop.f32.mrb[53].mxu1  ;;  %s8245_s15 = smov 124  }
0x29d8   :  { %v5254_v54 = vpop.permute.xlu1 %5253 }
0x29d9   :  { %5256 = vst.msk [vmem:[#allocation2] sm:$0xf] %vm4152_vm6, %v5254_v54 }
0x2a0d   :  { %v5593_v55 = vpop.permute.xlu0 %5592 }
0x2a0e   :  { %5595 = vst.msk [vmem:[#allocation2 + $0x4] sm:$0xf] %vm4152_vm6, %v5593_v55 }
0x2a15   :  { %v5596_v33 = vld [vmem:[#allocation2] sm:$0xff] }
0x2a16   :  { %7053 = vmatmul.mubr.msk.f32.vlgmr.msra.gmra.mrb[58].mxu0 %vm676_vm2, %v5596_v33 }
0x2a17   :  { %7074 = vmatprep.mubr.msk.f32.mxu0 %vm8234_vm3, %v8235_v32  ;;  %v9341_v32 = vadd.f32 %v3640_v19, %v9074_v34  ;;  %v5718_v34 = vld [vmem:[#allocation28 + $0x30] sm:$0xff]  ;;  %7287 = vmatpush3.bf16.msra.mxu0 %v7286_v22 }
0x2a18   :  { %v7283_v13 = vpack.c.bf16 %v5719_v12, %v5718_v34  ;;  %7288 = vmatprep.subr.bf16.mxu0 %v8233_v11 }
0x2a19   :  { %v3662_v10 = vsel %vm676_vm2, %v9341_v32, 0.0 }
0x2a1a   :  { %7284 = vmatpush3.bf16.msra.mxu1 %v7283_v13 }
0x2a1b   :  { %7290 = vmatpush3.bf16.msra.mxu0 %v7289_v23 }
0x2ae9   :  { %v5679_v61 = vpop.f32.mrb[58].mxu0 }
0x2aea   :  { %v5680_v60 = vadd.f32 %v6431_v58, %v5679_v61  ;;  %v7054_v62 = vpop.f32.mrb[59].mxu0 }
0x2aec   :  { %v5683_v0 = vadd.f32 %v5680_v60, %v9233_v31 }
0x2aee   :  { %v5688_v27 = vsel %vm676_vm2, %v5683_v0, 0.0 }
0x2aef   :  { %5689 = vadd.xlane.f32.xlu1 %v5688_v27 }
0x2af3   :  { %3657 = vadd.xlane.f32.xlu1 %v3656_v6 }
0x2af7   :  { %3663 = vadd.xlane.f32.xlu1 %v3662_v10  ;;  %v6438_v10 = vld [vmem:[#allocation31 + $0x1] ss:$0 sm:$0xff] }
0x2b7c   :  { %v5690_v31 = vpop.xlane.xlu1 %5689 }
0x2b7d   :  { %v5691_v47 = vmul.f32 0.03125, %v5690_v31 }
0x2b7f   :  { %v5692_v7 = vsub.f32 %v5683_v0, %v5691_v47 }
0x2b80   :  { %v3658_v31 = vpop.xlane.xlu1 %3657 }
0x2b81   :  { %v5693_v45 = vmul.f32 %v5692_v7, %v5692_v7  ;;  %v3668_v2 = vmul.f32 0.03125, %v3658_v31 }
0x2b83   :  { %v5694_v21 = vsel %vm676_vm2, %v5693_v45, 0.0 }
0x2b84   :  { %5695 = vadd.xlane.f32.xlu0 %v5694_v21  ;;  %v3664_v12 = vpop.xlane.xlu1 %3663 }
0x2c11   :  { %v5696_v16 = vpop.xlane.xlu0 %5695 }
0x2c12   :  { %v5697_v4 = vmul.f32 0.03125, %v5696_v16  ;;  %v9362_v16 = vsub.f32 %v9335_v5, %v3668_v2 }
0x2c14   :  { %v5698_v25 = vadd.f32 1e-05, %v5697_v4  ;;  %v3670_v4 = vmul.f32 0.03125, %v3664_v12 }
0x2c16   :  { %7623 = vrsqrt.f32 %v5698_v25  ;;  %v9366_v25 = vsub.f32 %v9341_v32, %v3670_v4  ;;  %v5947_v4 = vld [vmem:[#allocation35 + $0x8] sm:$0xff] }
0x2c20   :  { %v7624_v24 = vpop.eup %7623 }
0x2c21   :  { %v5700_v1 = vmul.f32 %v7624_v24, %v5692_v7  ;;  %v3635_v7 = vadd.f32 %v9129_v63, %v9329_v56 }
0x2c23   :  { %v5707_v20 = vmul.f32 %v6433_v57, %v5700_v1  ;;  %v3649_v9 = vadd.f32 %v3635_v7, %v9057_v48 }
0x2c25   :  { %v5714_v26 = vadd.f32 %v6434_v59, %v5707_v20  ;;  %v3659_v63 = vsel %vm676_vm2, %v3649_v9, 0.0 }
0x2c27   :  { %7064 = vmatmul.mubr.msk.f32.vlgmr.msra.gmra.mrb[54].mxu1 %vm676_vm2, %v5714_v26 }
0x2cfa   :  { %v5797_v41 = vpop.f32.mrb[54].mxu1 }
0x2cfb   :  { %v5798_v30 = vadd.f32 %v6436_v40, %v5797_v41  ;;  %v7065_v42 = vpop.f32.mrb[55].mxu1 }
0x2cfc   :  { %v5949_v42 = vld [vmem:[%s8430_s9 + $0x8] sm:$0xff] }
0x2cfd   :  { %v5802_v43 = vmul.f32 0.70710677, %v5798_v30  ;;  %v5801_v19 = vmul.f32 0.5, %v5798_v30  ;;  %v5946_v30 = vld [vmem:[#allocation35] sm:$0xff] }
0x2cfe   :  { %7079 = vmatprep.mubr.msk.f32.mxu1 %vm676_vm2, %v5946_v30 }
0x2cff   :  { %v5805_v44 = vand.u32 2147483647, %v5802_v43  ;;  %vm5803_vm0 = vcmp.ge.f32.partialorder %v5802_v43, 0.0  ;;  %v5948_v43 = vld [vmem:[%s8430_s9] sm:$0xff]  ;;  %s9469_s9 = sld [smem:[#allocation60_spill]] }
0x2d00   :  { %v5804_v62 = vsel %vm5803_vm0, 1.0, %v8241_v3  ;;  %v3645_v3 = vadd.f32 %v9155_v37, %v9329_v56  ;;  %v3676_v37 = vmul.f32 %v9362_v16, %v9362_v16 }
0x2d01   :  { %v5806_v38 = vmul.f32 0.3275911, %v5805_v44  ;;  %v5818_v35 = vsub.f32 0.0, %v5805_v44 }
0x2d02   :  { %v3651_v13 = vadd.f32 %v3645_v3, %v9077_v17  ;;  %v3680_v56 = vsel %vm676_vm2, %v3676_v37, 0.0  ;;  %v3678_v17 = vmul.f32 %v9366_v25, %v9366_v25 }
0x2d03   :  { %v5807_v46 = vadd.f32 1.0, %v5806_v38  ;;  %v5819_v53 = vmul.f32 %v5818_v35, %v5805_v44  ;;  %v8242_v44 = vmov 0   ;;  %v6450_v38 = vld [vmem:[#allocation37] ss:$0 sm:$0xff]  ;;  %v8244_v35 = vmov 2  }
0x2d04   :  { %v3665_v48 = vsel %vm676_vm2, %v3651_v13, 0.0  ;;  %v3686_v5 = vsel %vm676_vm2, %v3678_v17, 0.0  ;;  %7458 = vset.pattern.permute.xlu1 %v8242_v44  ;;  %7457 = vset.pattern.permute.xlu0 %v8242_v44 }
0x2d05   :  { %7625 = vrcp.f32 %v5807_v46  ;;  %v5820_v39 = vmul.f32 1.442695, %v5819_v53  ;;  %v8243_v46 = vmov 1   ;;  %v6045_v31 = vld [vmem:[%s9469_s9 + $0x8] sm:$0xff]  ;;  %v6046_v2 = vld [vmem:[%s9469_s9 + $0x10] sm:$0xff] }
0x2d07   :  { %7627 = vpow2.f32 %v5820_v39 }
0x2d0f   :  { %v7626_v52 = vpop.eup %7625 }
0x2d10   :  { %v5809_v49 = vmul.f32 1.0614054, %v7626_v52 }
0x2d11   :  { %v7628_v61 = vpop.eup %7627 }
0x2d12   :  { %v5810_v50 = vadd.f32 -1.4531521, %v5809_v49 }
0x2d14   :  { %v5811_v11 = vmul.f32 %v7626_v52, %v5810_v50 }
0x2d16   :  { %v5812_v28 = vadd.f32 1.4214138, %v5811_v11 }
0x2d18   :  { %v5813_v51 = vmul.f32 %v7626_v52, %v5812_v28 }
0x2d1a   :  { %v5814_v54 = vadd.f32 -0.28449672, %v5813_v51 }
0x2d1c   :  { %v5815_v55 = vmul.f32 %v7626_v52, %v5814_v54 }
0x2d1e   :  { %v5816_v33 = vadd.f32 0.2548296, %v5815_v55 }
0x2d20   :  { %v5817_v58 = vmul.f32 %v7626_v52, %v5816_v33 }
0x2d22   :  { %v5822_v29 = vmul.f32 %v7628_v61, %v5817_v58 }
0x2d24   :  { %v5823_v60 = vsub.f32 1.0, %v5822_v29 }
0x2d26   :  { %v5824_v0 = vmul.f32 %v5823_v60, %v5804_v62 }
0x2d28   :  { %v5825_v27 = vadd.f32 1.0, %v5824_v0 }
0x2d2a   :  { %v5826_v6 = vmul.f32 %v5825_v27, %v5801_v19  ;;  %v6440_v19 = vld [vmem:[#allocation32 + $0x1] ss:$0 sm:$0xff] }
0x2d2c   :  { %7075 = vmatmul.mubr.msk.f32.vlgmr.msra.gmra.mrb[60].mxu0 %vm676_vm2, %v5826_v6  ;;  %v6441_v6 = vld [vmem:[#allocation34 + $0x1] ss:$0 sm:$0xff] }
0x2dff   :  { %v5909_v47 = vpop.f32.mrb[60].mxu0 }
0x2e00   :  { %v5910_v45 = vadd.f32 %v6438_v10, %v5909_v47  ;;  %v7076_v21 = vpop.f32.mrb[61].mxu0  ;;  %v6044_v10 = vld [vmem:[%s9469_s9] sm:$0xff] }
0x2e02   :  { %v5913_v8 = vadd.f32 %v5910_v45, %v5714_v26  ;;  %v6375_v45 = vld [vmem:[#allocation14 + $0x1] ss:$0 sm:$0xff] }
0x2e04   :  { %v5918_v34 = vsel %vm676_vm2, %v5913_v8, 0.0 }
0x2e05   :  { %5919 = vadd.xlane.f32.xlu0 %v5918_v34  ;;  %v6047_v34 = vld [vmem:[%s9469_s9 + $0x18] sm:$0xff] }
0x2e09   :  { %3660 = vadd.xlane.f32.xlu0 %v3659_v63 }
0x2e0d   :  { %3666 = vadd.xlane.f32.xlu0 %v3665_v48  ;;  %v7295_v48 = vpack.c.bf16 %v6047_v34, %v6046_v2 }
0x2e11   :  { %3681 = vadd.xlane.f32.xlu0 %v3680_v56 }
0x2e15   :  { %3687 = vadd.xlane.f32.xlu0 %v3686_v5 }
0x2e2b   :  { %5952 = vperm.xlu0 %7457, %v5948_v43  }
0x2e2f   :  { %7462 = vset.pattern.permute.xlu0 %v8244_v35 }
0x2e92   :  { %v5920_v24 = vpop.xlane.xlu0 %5919 }
0x2e93   :  { %v5921_v57 = vmul.f32 0.03125, %v5920_v24 }
0x2e95   :  { %v5922_v1 = vsub.f32 %v5913_v8, %v5921_v57  ;;  %v7291_v8 = vpack.c.bf16 %v6045_v31, %v6044_v10 }
0x2e96   :  { %v3661_v32 = vpop.xlane.xlu0 %3660 }
0x2e97   :  { %v3669_v59 = vmul.f32 0.03125, %v3661_v32  ;;  %v5923_v20 = vmul.f32 %v5922_v1, %v5922_v1 }
0x2e99   :  { %v9375_v26 = vsub.f32 %v3649_v9, %v3669_v59  ;;  %v5924_v18 = vsel %vm676_vm2, %v5923_v20, 0.0 }
0x2e9a   :  { %v3667_v36 = vpop.xlane.xlu0 %3666  ;;  %5925 = vadd.xlane.f32.xlu1 %v5924_v18 }
0x2e9b   :  { %v3671_v22 = vmul.f32 0.03125, %v3667_v36  ;;  %v3677_v14 = vmul.f32 %v9375_v26, %v9375_v26 }
0x2e9d   :  { %v9380_v15 = vsub.f32 %v3651_v13, %v3671_v22  ;;  %v3683_v23 = vsel %vm676_vm2, %v3677_v14, 0.0  ;;  %v6376_v13 = vld [vmem:[#allocation16 + $0x1] ss:$0 sm:$0xff] }
0x2e9e   :  { %3684 = vadd.xlane.f32.xlu1 %v3683_v23  ;;  %v3682_v52 = vpop.xlane.xlu0 %3681  ;;  %v6445_v23 = vld [vmem:[#allocation17] ss:$0 sm:$0xff] }
0x2e9f   :  { %v3679_v40 = vmul.f32 %v9380_v15, %v9380_v15  ;;  %v3692_v53 = vmul.f32 0.03125, %v3682_v52 }
0x2ea1   :  { %v3689_v41 = vsel %vm676_vm2, %v3679_v40, 0.0  ;;  %v3696_v49 = vadd.f32 1e-05, %v3692_v53 }
0x2ea2   :  { %3690 = vadd.xlane.f32.xlu1 %v3689_v41  ;;  %v3688_v39 = vpop.xlane.xlu0 %3687 }
0x2ea3   :  { %7629 = vrsqrt.f32 %v3696_v49  ;;  %v3694_v51 = vmul.f32 0.03125, %v3688_v39 }
0x2ea5   :  { %v3698_v58 = vadd.f32 1e-05, %v3694_v51 }
0x2eaa   :  { %v5953_v20 = vpop.permute.xlu0 %5952 }
0x2ead   :  { %v7630_v62 = vpop.eup %7629 }
0x2eae   :  { %v3704_v47 = vmul.f32 %v7630_v62, %v9362_v16 }
0x2eb0   :  { %v3714_v3 = vmul.f32 %v6375_v45, %v3704_v47 }
0x2eb2   :  { %v3724_v37 = vadd.f32 %v6376_v13, %v3714_v3 }
0x2eb3   :  { %5957 = vperm.xlu1 %7458, %v5949_v42  }
0x2eb7   :  { %7459 = vset.pattern.permute.xlu1 %v8243_v46 }
0x2eb8   :  { %6164 = vperm.xlu1 %7459, %v6450_v38  }
0x2ebc   :  { %7460 = vset.pattern.permute.xlu1 %v8242_v44 }
0x2ebd   :  { %6158 = vperm.xlu1 %7460, %v6450_v38  }
0x2ec1   :  { %7461 = vset.pattern.permute.xlu1 %v8244_v35 }
0x2ec2   :  { %6172 = vperm.xlu1 %7461, %v6450_v38  }
0x2f27   :  { %v5926_v50 = vpop.xlane.xlu1 %5925 }
0x2f28   :  { %v5927_v11 = vmul.f32 0.03125, %v5926_v50 }
0x2f2a   :  { %v5928_v28 = vadd.f32 1e-05, %v5927_v11 }
0x2f2b   :  { %v3685_v54 = vpop.xlane.xlu1 %3684 }
0x2f2c   :  { %7631 = vrsqrt.f32 %v5928_v28  ;;  %v3693_v55 = vmul.f32 0.03125, %v3685_v54 }
0x2f2e   :  { %v3697_v33 = vadd.f32 1e-05, %v3693_v55 }
0x2f2f   :  { %v3691_v61 = vpop.xlane.xlu1 %3690 }
0x2f30   :  { %v3695_v29 = vmul.f32 0.03125, %v3691_v61  ;;  %7633 = vrsqrt.f32 %v3697_v33 }
0x2f31   :  { %7635 = vrsqrt.f32 %v3698_v58 }
0x2f32   :  { %v3699_v60 = vadd.f32 1e-05, %v3695_v29 }
0x2f34   :  { %7637 = vrsqrt.f32 %v3699_v60 }
0x2f36   :  { %v7632_v0 = vpop.eup %7631 }
0x2f37   :  { %v5930_v27 = vmul.f32 %v7632_v0, %v5922_v1 }
0x2f39   :  { %v5937_v7 = vmul.f32 %v6440_v19, %v5930_v27 }
0x2f3a   :  { %v7634_v9 = vpop.eup %7633 }
0x2f3b   :  { %v5944_v21 = vadd.f32 %v6441_v6, %v5937_v7  ;;  %v7636_v12 = vpop.eup %7635  ;;  %v3705_v63 = vmul.f32 %v7634_v9, %v9375_v26 }
0x2f3c   :  { %v3706_v56 = vmul.f32 %v7636_v12, %v9366_v25  ;;  %v5958_v25 = vpop.permute.xlu1 %5957 }
0x2f3d   :  { %7077 = vmatprep.subr.msk.mxu1 %vm676_vm2, %v5944_v21  ;;  %v3715_v17 = vmul.f32 %v6375_v45, %v3705_v63 }
0x2f3e   :  { %7078 = vmatpush3.xpose.msk.msra.mxu1 %vm676_vm2, %v5944_v21  ;;  %v7638_v16 = vpop.eup %7637  ;;  %v3716_v24 = vmul.f32 %v6375_v45, %v3706_v56 }
0x2f3f   :  { %7292 = vmatprep.subr.bf16.mxu1 %v7291_v8  ;;  %v3707_v5 = vmul.f32 %v7638_v16, %v9380_v15  ;;  %v3725_v57 = vadd.f32 %v6376_v13, %v3715_v17 }
0x2f40   :  { %v3726_v32 = vadd.f32 %v6376_v13, %v3716_v24  ;;  %v6165_v36 = vpop.permute.xlu1 %6164 }
0x2f41   :  { %7080 = vmatmul.mubr.msk.f32.vlgmr.msra.gmra.mrb[56].mxu1 %vm676_vm2, %v5947_v4  ;;  %v3717_v1 = vmul.f32 %v6375_v45, %v3707_v5 }
0x2f42   :  { %7294 = vmatpush3.bf16.msra.mxu1 %v7291_v8  ;;  %7090 = vmatprep.mubr.msk.f32.mxu1 %vm676_vm2, %v3724_v37 }
0x2f43   :  { %7296 = vmatprep.subr.bf16.mxu1 %v7295_v48  ;;  %v3727_v59 = vadd.f32 %v6376_v13, %v3717_v1 }
0x2f44   :  { %v6159_v40 = vpop.permute.xlu1 %6158 }
0x2f46   :  { %7298 = vmatpush3.bf16.msra.mxu1 %v7295_v48 }
0x2f48   :  { %v6173_v52 = vpop.permute.xlu1 %6172 }
0x2f49   :  { %7091 = vmatmul.mubr.msk.f32.vlgmr.msra.gmra.mrb[58].mxu1 %vm676_vm2, %v3725_v57 }
0x2f4a   :  { %7093 = vmatprep.mubr.msk.f32.mxu1 %vm676_vm2, %v3726_v32 }
0x2f4d   :  { %7094 = vmatmul.mubr.msk.f32.gmra.mrb[60].mxu1 %vm676_vm2, %v3727_v59  ;;  %vm6201_vm2 = vcmask 64544  }
0x3014   :  { %v7081_v26 = vpop.f32.mrb[56].mxu1 }
0x3015   :  { %v6035_v18 = vpop.f32.mrb[57].mxu1  ;;  %v6041_v14 = vadd.f32 %v7081_v26, %v5958_v25 }
0x3016   :  { %v6036_v22 = vadd.f32 %v6035_v18, %v5953_v20 }
0x3017   :  { %v6168_v41 = vmul.f32 %v6165_v36, %v6041_v14 }
0x3018   :  { %v6167_v15 = vmul.f32 %v6165_v36, %v6036_v22 }
0x301a   :  { %6183 = vrot.lane.b32.xlu1 %v6167_v15, %s8245_s15 }
0x301c   :  { %v7092_v30 = vpop.f32.mrb[58].mxu1 }
0x301d   :  { %v6139_v42 = vadd.f32 %v7092_v30, %v6445_v23  ;;  %v6133_v43 = vpop.f32.mrb[59].mxu1 }
0x301e   :  { %v6134_v44 = vadd.f32 %v6445_v23, %v6133_v43  ;;  %6185 = vrot.lane.b32.xlu1 %v6168_v41, %s8245_s15 }
0x301f   :  { %v6162_v38 = vmul.f32 %v6159_v40, %v6139_v42 }
0x3020   :  { %v6161_v46 = vmul.f32 %v6159_v40, %v6134_v44  ;;  %v7095_v35 = vpop.f32.mrb[60].mxu1 }
0x3021   :  { %v6149_v53 = vadd.f32 %v7095_v35, %v6445_v23  ;;  %v6143_v49 = vpop.f32.mrb[61].mxu1  ;;  %v6170_v50 = vadd.f32 %v6168_v41, %v6162_v38 }
0x3022   :  { %v6144_v39 = vadd.f32 %v6445_v23, %v6143_v49  ;;  %v6169_v11 = vadd.f32 %v6167_v15, %v6161_v46 }
0x3023   :  { %v6176_v28 = vadd.f32 %v6173_v52, %v6170_v50  ;;  %v6180_v61 = vmul.f32 %v6159_v40, %v6149_v53 }
0x3024   :  { %v6175_v51 = vadd.f32 %v6173_v52, %v6169_v11  ;;  %v6179_v54 = vmul.f32 %v6159_v40, %v6144_v39 }
0x3025   :  { %6178 = vst.msk [vmem:[%s8440_s5 + $0x8] sm:$0xff] %vm466_vm1, %v6176_v28 }
0x3026   :  { %6177 = vst.msk [vmem:[%s8440_s5] sm:$0xff] %vm466_vm1, %v6175_v51 }
0x308c   :  { %v6184_v55 = vpop.permute.xlu1 %6183 }
0x308d   :  { %v6189_v33 = vadd.f32 %v6184_v55, %v6179_v54 }
0x308f   :  { %v6191_v58 = vadd.f32 %v6189_v33, %v6173_v52 }
0x3090   :  { %v6186_v29 = vpop.permute.xlu1 %6185 }
0x3091   :  { %v6190_v60 = vadd.f32 %v6186_v29, %v6180_v61  ;;  %6195 = vrot.lane.b32.xlu1 %v6191_v58, %s8246_s20 }
0x3093   :  { %v6192_v62 = vadd.f32 %v6190_v60, %v6173_v52 }
0x3095   :  { %6197 = vrot.lane.b32.xlu1 %v6192_v62, %s8246_s20 }
0x3103   :  { %v6196_v0 = vpop.permute.xlu1 %6195 }
0x3104   :  { %6202 = vst.msk [vmem:[%s8440_s5] sm:$0xff] %vm6201_vm2, %v6196_v0 }
0x3107   :  { %v6198_v19 = vpop.permute.xlu1 %6197 }
0x3108   :  { %6203 = vst.msk [vmem:[%s8440_s5 + $0x8] sm:$0xff] %vm6201_vm2, %v6198_v19 }
0x3109   :  { %6208 = vsyncpa [#allocation4], 1 }
0x310a   :  { %6209 = vsyncpa [#allocation6], 1 }
0x310b   :  { %6210 = vsyncpa [#allocation9], 1 }
0x310c   :  { %6211 = vsyncpa [#allocation12], 1 }
0x310d   :  { %6212 = vsyncpa [#allocation15], 1 }
0x310e   :  { %6213 = vsyncpa [#allocation18], 1 }
0x310f   :  { %6214 = vsyncpa [#allocation21], 1 }
0x3110   :  { %6215 = vsyncpa [#allocation24], 1 }
0x3111   :  { %6216 = vsyncpa [#allocation27], 1 }
0x3112   :  { %6217 = vsyncpa [#allocation30], 1 }
0x3113   :  { %6218 = vsyncpa [#allocation33], 1 }
0x3114   :  { %6219 = vsyncpa [#allocation36], 1 }

</bundles_post_ra>
